<compile_context>
chip_gen: v7x
topology: tpu7x:2x2x1
jax: 0.10.0
libtpu: 0.0.40
codegen_flags: <defaults>
</compile_context>

<pallas_src>
import jax
import jax.numpy as jnp
import numpy as np
from jax import lax
from jax.experimental import pallas as pl
from jax.experimental.pallas import tpu as pltpu

HIDDEN = 64          # hidden_channels (module default)
NUM_LAYERS = 3       # num_gat_layers (module default)
HEADS = 4            # heads (module default); last layer uses 1 head (heads 1..3 skipped)
FC1_OUT = 32
OUT_DIM = 2
OUT_PAD = 128        # lane-dense padded output width (avoids masked narrow stores)
NEG_SLOPE = 0.2      # GATConv LeakyReLU default
MASK_BIG = 1e30      # additive mask bias magnitude
NEG_INF = -1e30      # reference masking value


def heads_for_layer(l):
    return HEADS if l < NUM_LAYERS - 1 else 1


def _round_up(v, m):
    return ((v + m - 1) // m) * m


# ---------------------------------------------------------------------------
# Pallas kernel
# grid = (layer, target-row block); both axes sequential ("arbitrary"):
# every row block of layer l attends over the FULL node-feature buffer written
# by all row blocks of layer l-1 (persistent single VMEM buffer; per-layer
# snapshots of the transformed features make single-buffering safe).
# ---------------------------------------------------------------------------
def gat_kernel(h0_ref, mbias_ref, ea0_ref, ea1_ref,
               wgat_ref, wsrc_ref, wdst_ref, wedge_ref, bgat_ref,
               wfc1_ref, bfc1_ref, wfc2_ref, bfc2_ref,
               out_ref,
               hbuf, xlbuf, asbuf, accbuf):
    l = pl.program_id(0)                 # GAT layer (sequential)
    i = pl.program_id(1)                 # target-row block (sequential)
    n_layers = pl.num_programs(0)
    last_layer = n_layers - 1
    tm = out_ref.shape[0]
    row0 = pl.multiple_of(i * tm, tm)

    # one-time: stage the (wrapper-computed) encoder output as layer-0 input.
    @pl.when((l == 0) & (i == 0))
    def _():
        hbuf[...] = h0_ref[...]

    # once per layer: fused value transform for ALL nodes (one [N,64]x[64,256]
    # matmul; last-layer padded head columns are zero) + per-source attention
    # term a_src = h . (W_h att_src_h) as a lane-dense [1,N] row per head.
    @pl.when(i == 0)
    def _():
        h_all = hbuf[...]                                        # [N, HID] f32
        xl_all = jnp.dot(h_all, wgat_ref[l],
                         preferred_element_type=jnp.float32)     # [N, HEADS*HID]
        for hh in range(HEADS):                                  # static unroll
            xlbuf[hh] = xl_all[:, hh * HIDDEN:(hh + 1) * HIDDEN].astype(jnp.bfloat16)
            asbuf[hh] = lax.dot_general(
                wsrc_ref[l, hh], h_all, (((1,), (1,)), ((), ())),
                preferred_element_type=jnp.float32)              # [1, N]

    # per-block operands (hoisted out of the head loop; casts done once).
    mb = mbias_ref[...].astype(jnp.float32)                      # [TM, N] additive mask bias
    ea0 = ea0_ref[...].astype(jnp.float32)                       # [TM, N]
    ea1 = ea1_ref[...].astype(jnp.float32)
    we = wedge_ref[l]                                            # [2, HEADS]
    h_blk = hbuf[pl.ds(row0, tm), :]                             # [TM, HID] residual (read before write)
    # a_dst per target row, all heads at once: tiny [TM,64]x[64,4] matmul
    adst_blk = jnp.dot(h_blk, wdst_ref[l],
                       preferred_element_type=jnp.float32)       # [TM, HEADS]

    accbuf[...] = jnp.zeros_like(accbuf)

    def do_head(hh):
        a_dst = adst_blk[:, hh:hh + 1]                           # [TM, 1]
        a_src = asbuf[hh]                                        # [1, N]
        w0 = we[0:1, hh:hh + 1]
        w1 = we[1:2, hh:hh + 1]
        # additive mask bias: non-edges get -1e30 and vanish after exp; real edges add 0.
        logits = (a_dst + a_src) + ea0 * w0 + ea1 * w1 + mb      # [TM, N]
        logits = jnp.maximum(logits, NEG_SLOPE * logits)         # LeakyReLU(0.2), 2 VPU ops
        m = jnp.max(logits, axis=-1, keepdims=True)
        e = jnp.exp(logits - m)
        denom = jnp.sum(e, axis=-1, keepdims=True)
        inv = pl.reciprocal(denom, approx=True)                  # EUP, free slot
        # dominant matmul: bf16 operands, f32 accumulation
        agg = jnp.dot(e.astype(jnp.bfloat16), xlbuf[hh],
                      preferred_element_type=jnp.float32) * inv  # [TM, HID]
        accbuf[...] += agg
        # TODO(synk): GATConv's attention-coefficient Dropout(p=0.3) is identity (eval).

    do_head(0)                                                   # head 0 always active
    for hh in range(1, HEADS):                                   # heads 1..3 only on non-last layers
        pl.when(l < last_layer)(lambda hh=hh: do_head(hh))

    # mean over heads (concat=False) is pre-folded into wgat scaling in the wrapper.
    h_new = jnp.maximum(accbuf[...] + bgat_ref[l], 0.0) + h_blk  # relu(GAT) + residual
    # Normalization == 'None' -> identity; feature Dropout -> identity (eval).
    hbuf[pl.ds(row0, tm), :] = h_new

    # fused MLP head on the last layer; fc2 zero-padded to 128 lanes (lane-dense
    # store); wrapper slices [:, :2].  Earlier layers' output-block writebacks are
    # wasted-but-harmless traffic (last write wins).
    @pl.when(l == last_layer)
    def _():
        z = jnp.maximum(
            jnp.dot(h_new, wfc1_ref[...], preferred_element_type=jnp.float32)
            + bfc1_ref[...], 0.0)
        out_ref[...] = jnp.tanh(
            jnp.dot(z, wfc2_ref[...], preferred_element_type=jnp.float32)
            + bfc2_ref[...])


# ---------------------------------------------------------------------------
# Wrapper helpers
# ---------------------------------------------------------------------------
def _resident(shape):
    zeros = (0,) * len(shape)
    return pl.BlockSpec(tuple(shape), lambda *_args, _z=zeros: _z)


def _vmem_cap():
    # Per-chip physical VMEM differs (v5e/v6e: 128 MiB, v7x: 64 MiB); leave
    # headroom for Mosaic internal scratch.
    try:
        cap = int(pltpu.get_tpu_info().vmem_capacity_bytes)
        return min(int(cap * 0.85), 112 * 1024 * 1024)
    except Exception:
        return 64 * 1024 * 1024


def _vmem_need(n_pad, tm):
    stream = 3 * 2 * tm * n_pad * 2                              # mbias/ea0/ea1, double-buffered bf16
    h0 = 2 * n_pad * HIDDEN * 4                                  # resident encoder output
    scratch = (n_pad * HIDDEN * 4                                # hbuf (single buffer)
               + HEADS * n_pad * HIDDEN * 2                      # xlbuf bf16
               + HEADS * 8 * n_pad * 4                           # asbuf (sublane-padded)
               + tm * HIDDEN * 4)                                # accbuf
    tmp = (tm * n_pad * 24                                       # hoisted f32 casts + logits/e temporaries
           + n_pad * (HIDDEN + HEADS * HIDDEN) * 4)              # i==0 transform temporaries
    params = 2 * 4 * (NUM_LAYERS * (HIDDEN * HEADS * HIDDEN + HEADS * 8 * 128
                                    + HIDDEN * 128 + 2 * 128 + HIDDEN)
                      + HIDDEN * 128 + 128 + FC1_OUT * OUT_PAD + OUT_PAD)
    out = 2 * tm * OUT_PAD * 4
    return stream + h0 + scratch + tmp + params + out


def _pick_tm(n_pad, limit):
    tm = max(8, min(int(limit), n_pad))
    tm = (tm // 8) * 8
    while n_pad % tm:
        tm -= 8
    return tm


def _cost_estimate(n_pad):
    flops = 0
    trans = 0
    for l in range(NUM_LAYERS):
        hl = heads_for_layer(l)
        flops += 2 * n_pad * HIDDEN * HEADS * HIDDEN             # fused value transform
        flops += hl * (2 * n_pad * n_pad * HIDDEN                # aggregation matmuls
                       + 10 * n_pad * n_pad                      # logits/softmax chain
                       + 4 * n_pad * HIDDEN)                     # a_src / a_dst
        trans += hl * n_pad * n_pad
    flops += 2 * n_pad * (HIDDEN * FC1_OUT + FC1_OUT * OUT_PAD)
    trans += n_pad * OUT_PAD
    bytes_accessed = (NUM_LAYERS * 3 * n_pad * n_pad * 2
                      + n_pad * HIDDEN * 4
                      + NUM_LAYERS * n_pad * OUT_PAD * 4
                      + 4 * NUM_LAYERS * (HEADS * HIDDEN * HIDDEN + 3 * HEADS * HIDDEN + HIDDEN))
    return int(flops), int(trans), int(bytes_accessed)


def gat_model_forward(x, mbias_bf, ea0_bf, ea1_bf, kp, *, block_rows=256):
    n = x.shape[0]
    # n_pad decoupled from tm: pad N to a lane-dense multiple of 128, then pick
    # tm as a divisor of n_pad (avoids extra padded dense work for awkward N).
    n_pad = _round_up(max(n, 8), 128)
    cap = _vmem_cap()
    tm = _pick_tm(n_pad, block_rows)
    while tm > 64 and _vmem_need(n_pad, tm) > cap:               # auto-shrink for 64 MiB chips
        tm = _pick_tm(n_pad, tm // 2)
    nb = n_pad // tm

    # coord encoder hoisted to the wrapper (a K=2 MXU matmul is ~1.5% utilized;
    # essentially free here and keeps the kernel layout clean).
    h0 = jax.nn.relu(x @ kp["wenc"] + kp["benc"])
    h0 = jnp.pad(h0, ((0, n_pad - n), (0, 0)))

    pr = n_pad - n
    # padded rows/cols stay masked (bias = -1e30) so they never pollute real rows.
    mbias_p = jnp.pad(mbias_bf, ((0, pr), (0, pr)), constant_values=-MASK_BIG)
    ea0_p = jnp.pad(ea0_bf, ((0, pr), (0, pr)))
    ea1_p = jnp.pad(ea1_bf, ((0, pr), (0, pr)))

    dense_spec = pl.BlockSpec((tm, n_pad), lambda l, i: (i, 0))
    in_specs = [
        _resident((n_pad, HIDDEN)),            # h0 (resident, fetched once)
        dense_spec, dense_spec, dense_spec,    # mbias / ea0 / ea1 row blocks (streamed)
        _resident(kp["wgat"].shape),
        _resident(kp["wsrc"].shape),
        _resident(kp["wdst"].shape),
        _resident(kp["wedge"].shape),
        _resident(kp["bgat"].shape),
        _resident(kp["wfc1"].shape),
        _resident(kp["bfc1"].shape),
        _resident(kp["wfc2"].shape),
        _resident(kp["bfc2"].shape),
    ]
    out_specs = pl.BlockSpec((tm, OUT_PAD), lambda l, i: (i, 0))

    scratch = [
        pltpu.VMEM((n_pad, HIDDEN), jnp.float32),          # persistent node features (single buffer)
        pltpu.VMEM((HEADS, n_pad, HIDDEN), jnp.bfloat16),  # per-head transformed features
        pltpu.VMEM((HEADS, 1, n_pad), jnp.float32),        # per-source attention term
        pltpu.VMEM((tm, HIDDEN), jnp.float32),             # per-block head accumulator
    ]

    flops, transc, bytes_acc = _cost_estimate(n_pad)
    vmem_bytes = int(min(max(int(_vmem_need(n_pad, tm) * 1.3) + (8 << 20), 32 << 20), cap))
    out = pl.pallas_call(
        gat_kernel,
        out_shape=jax.ShapeDtypeStruct((n_pad, OUT_PAD), jnp.float32),
        grid_spec=pltpu.PrefetchScalarGridSpec(
            num_scalar_prefetch=0,
            grid=(NUM_LAYERS, nb),
            in_specs=in_specs,
            out_specs=out_specs,
            scratch_shapes=scratch),
        compiler_params=pltpu.CompilerParams(
            # Both axes sequential: a row block of layer l reads features written
            # by ALL row blocks of layer l-1, so the row axis cannot be megacore-
            # sharded without a cross-core barrier.
            dimension_semantics=("arbitrary", "arbitrary"),
            vmem_limit_bytes=vmem_bytes),
        cost_estimate=pl.CostEstimate(
            flops=flops, transcendentals=transc, bytes_accessed=bytes_acc),
    )(h0, mbias_p, ea0_p, ea1_p,
      kp["wgat"], kp["wsrc"], kp["wdst"], kp["wedge"], kp["bgat"],
      kp["wfc1"], kp["bfc1"], kp["wfc2"], kp["bfc2"])
    return out[:n, :OUT_DIM]


# ---------------------------------------------------------------------------
# Parameters (PyTorch-faithful "raw" set + packed kernel set)
# ---------------------------------------------------------------------------
def init_raw_params(key, scale_w=0.15, scale_att=0.25):
    ks = iter(jax.random.split(key, 8 + NUM_LAYERS * 6))

    def rnd(shape, s):
        return s * jax.random.normal(next(ks), shape, jnp.float32)

    raw = {
        "wenc": rnd((2, HIDDEN), scale_w), "benc": rnd((1, HIDDEN), scale_w),
        "wgat": [], "att_src": [], "att_dst": [],
        "lin_edge": [], "att_edge": [], "bias": [],
        "wfc1": rnd((HIDDEN, FC1_OUT), scale_w), "bfc1": rnd((1, FC1_OUT), scale_w),
        "wfc2": rnd((FC1_OUT, OUT_DIM), scale_w), "bfc2": rnd((1, OUT_DIM), scale_w),
    }
    for l in range(NUM_LAYERS):
        hl = heads_for_layer(l)
        raw["wgat"].append(rnd((HIDDEN, hl * HIDDEN), scale_w))
        raw["att_src"].append(rnd((hl, HIDDEN), scale_att))
        raw["att_dst"].append(rnd((hl, HIDDEN), scale_att))
        raw["lin_edge"].append(rnd((2, hl * HIDDEN), scale_att))
        raw["att_edge"].append(rnd((hl, HIDDEN), scale_att))
        raw["bias"].append(rnd((HIDDEN,), scale_w))
    return raw


def compose_edge_weight(raw, l):
    """<lin_edge(ea), att_edge> collapses exactly to a [2, heads] matrix."""
    hl = heads_for_layer(l)
    w = raw["lin_edge"][l].reshape(2, hl, HIDDEN)
    return jnp.einsum("dhc,hc->dh", w, raw["att_edge"][l])


def pack_kernel_params(raw):
    L, H, C = NUM_LAYERS, HEADS, HIDDEN
    wgat = jnp.zeros((L, C, H * C), jnp.float32)    # fused per-layer value transform
    wsrc = jnp.zeros((L, H, 1, C), jnp.float32)     # W_h @ att_src_h  (per-source term)
    wdst = jnp.zeros((L, C, H), jnp.float32)        # W_h @ att_dst_h  (per-target term)
    wedge = jnp.zeros((L, 2, H), jnp.float32)
    bgat = jnp.zeros((L, 1, C), jnp.float32)
    for l in range(L):
        hl = heads_for_layer(l)
        w_l = raw["wgat"][l].reshape(C, hl, C)                       # [C_in, hl, C_out]
        # fold mean-over-heads (concat=False) into the value transform; logits use
        # the UNscaled folded attention vectors, so results are unchanged.
        wgat = wgat.at[l, :, :hl * C].set((w_l / hl).reshape(C, hl * C))
        wsrc = wsrc.at[l, :hl, 0, :].set(jnp.einsum("chk,hk->hc", w_l, raw["att_src"][l]))
        wdst = wdst.at[l, :, :hl].set(jnp.einsum("chk,hk->ch", w_l, raw["att_dst"][l]))
        wedge = wedge.at[l, :, :hl].set(compose_edge_weight(raw, l))
        bgat = bgat.at[l, 0, :].set(raw["bias"][l])
    wfc2 = jnp.zeros((FC1_OUT, OUT_PAD), jnp.float32).at[:, :OUT_DIM].set(raw["wfc2"])
    bfc2 = jnp.zeros((1, OUT_PAD), jnp.float32).at[:, :OUT_DIM].set(raw["bfc2"])
    return {"wgat": wgat, "wsrc": wsrc, "wdst": wdst, "wedge": wedge, "bgat": bgat,
            "wenc": raw["wenc"], "benc": raw["benc"],
            "wfc1": raw["wfc1"], "bfc1": raw["bfc1"], "wfc2": wfc2, "bfc2": bfc2}


# ---------------------------------------------------------------------------
# Graph glue (dense GATConv graph) + pure-JAX reference
# ---------------------------------------------------------------------------
def make_example_graph(key, n, chords=(1, 3, 7)):
    idx = jnp.arange(n, dtype=jnp.int32)
    src = jnp.concatenate([idx for _ in chords])
    dst = jnp.concatenate([(idx + k) % n for k in chords])
    edge_index = jnp.stack([src, dst])                     # source -> target, simple graph
    edge_attr = jax.random.normal(key, (edge_index.shape[1], 2), jnp.float32)
    return edge_index, edge_attr


def build_dense_graph(edge_index, edge_attr, n):
    """mask[i,j]=1 iff edge j->i (self loops added; PyG fill_value='mean')."""
    row, col = edge_index[0], edge_index[1]
    keep = (row != col).astype(jnp.float32)                # remove_self_loops
    mask = jnp.zeros((n, n), jnp.float32).at[col, row].max(keep)
    ea = jnp.zeros((n, n, 2), jnp.float32).at[col, row].add(edge_attr * keep[:, None])
    cnt = jnp.zeros((n,), jnp.float32).at[col].add(keep)
    s = jnp.zeros((n, 2), jnp.float32).at[col].add(edge_attr * keep[:, None])
    loop_attr = jnp.where(cnt[:, None] > 0, s / jnp.maximum(cnt[:, None], 1.0), 0.0)
    d = jnp.arange(n)
    mask = mask.at[d, d].set(1.0)
    ea = ea.at[d, d, :].set(loop_attr)
    return mask, ea[..., 0], ea[..., 1]


def reference_forward(x, mask, ea0, ea1, raw, *, match_kernel_precision=False):
    """Module-faithful pure-JAX forward (f32).  With match_kernel_precision=True the
    aggregation matmul uses the same bf16-operand / f32-accumulation as the kernel."""
    h = jax.nn.relu(x @ raw["wenc"] + raw["benc"])
    for l in range(NUM_LAYERS):
        hl = heads_for_layer(l)
        res = h
        xl = h @ raw["wgat"][l]
        wedge = compose_edge_weight(raw, l)
        acc = jnp.zeros((x.shape[0], HIDDEN), jnp.float32)
        for hh in range(hl):
            xl_h = xl[:, hh * HIDDEN:(hh + 1) * HIDDEN]
            a_src = xl_h @ raw["att_src"][l][hh]
            a_dst = xl_h @ raw["att_dst"][l][hh]
            logits = (a_dst[:, None] + a_src[None, :]
                      + ea0 * wedge[0, hh] + ea1 * wedge[1, hh])
            logits = jnp.where(logits > 0, logits, NEG_SLOPE * logits)
            logits = jnp.where(mask > 0, logits, NEG_INF)
            m = jnp.max(logits, axis=1, keepdims=True)
            e = jnp.exp(logits - m)
            denom = jnp.sum(e, axis=1, keepdims=True)
            if match_kernel_precision:
                agg = jnp.dot(e.astype(jnp.bfloat16), xl_h.astype(jnp.bfloat16),
                              preferred_element_type=jnp.float32) / denom
            else:
                agg = (e / denom) @ xl_h
            acc = acc + agg
        h = jax.nn.relu(acc / hl + raw["bias"][l][None, :]) + res
    z = jax.nn.relu(h @ raw["wfc1"] + raw["bfc1"])
    return jnp.tanh(z @ raw["wfc2"] + raw["bfc2"])


if __name__ == "__main__":
    key = jax.random.PRNGKey(0)
    kx, ke, kp = jax.random.split(key, 3)

    N = 100                                                  # small graph; exercises padding
    x = jax.random.normal(kx, (N, 2), jnp.float32)           # data.x (2-D coordinates)
    edge_index, edge_attr = make_example_graph(ke, N)        # data.edge_index / data.edge_attr
    mask, ea0, ea1 = build_dense_graph(edge_index, edge_attr, N)

    # bf16 storage for the dense O(N^2) graph tensors; the 0/1 mask is converted to
    # an additive bias stream (0 for edges, -1e30 for non-edges).
    mbias_bf = ((mask - 1.0) * MASK_BIG).astype(jnp.bfloat16)
    ea0_bf = ea0.astype(jnp.bfloat16)
    ea1_bf = ea1.astype(jnp.bfloat16)

    raw = init_raw_params(kp)
    kparams = pack_kernel_params(raw)

    # block_rows=64 so the 100-node / 128-padded graph uses 2 row blocks per layer
    # (exercises the multi-block + per-layer transform path).
    out = gat_model_forward(x, mbias_bf, ea0_bf, ea1_bf, kparams, block_rows=64)
    out = jax.block_until_ready(out)
    assert out.shape == (N, OUT_DIM)

    ea0_r = ea0_bf.astype(jnp.float32)
    ea1_r = ea1_bf.astype(jnp.float32)
    # (1) precision-matched reference (same bf16 aggregation) -> tight tolerance
    ref_bf = reference_forward(x, mask, ea0_r, ea1_r, raw, match_kernel_precision=True)
    np.testing.assert_allclose(np.asarray(out), np.asarray(ref_bf), atol=5e-3, rtol=2e-2)
    # (2) pure-f32, module-faithful reference -> bounds the bf16 drift
    ref_f32 = reference_forward(x, mask, ea0_r, ea1_r, raw, match_kernel_precision=False)
    np.testing.assert_allclose(np.asarray(out), np.asarray(ref_f32), atol=5e-2, rtol=5e-2)

    print("KERNEL_OK")
</pallas_src>

<mosaic_0001>
module attributes {stable_mosaic.version = 11 : i64} {
  func.func @gat_kernel(%arg0: i32, %arg1: i32, %arg2: memref<128x64xf32, #tpu.memory_space<vmem>>, %arg3: memref<64x128xbf16, #tpu.memory_space<vmem>>, %arg4: memref<64x128xbf16, #tpu.memory_space<vmem>>, %arg5: memref<64x128xbf16, #tpu.memory_space<vmem>>, %arg6: memref<3x64x256xf32, #tpu.memory_space<vmem>>, %arg7: memref<3x4x1x64xf32, #tpu.memory_space<vmem>>, %arg8: memref<3x64x4xf32, #tpu.memory_space<vmem>>, %arg9: memref<3x2x4xf32, #tpu.memory_space<vmem>>, %arg10: memref<3x1x64xf32, #tpu.memory_space<vmem>>, %arg11: memref<64x32xf32, #tpu.memory_space<vmem>>, %arg12: memref<1x32xf32, #tpu.memory_space<vmem>>, %arg13: memref<32x128xf32, #tpu.memory_space<vmem>>, %arg14: memref<1x128xf32, #tpu.memory_space<vmem>>, %arg15: memref<64x128xf32, #tpu.memory_space<vmem>>, %arg16: memref<128x64xf32, #tpu.memory_space<vmem>>, %arg17: memref<4x128x64xbf16, #tpu.memory_space<vmem>>, %arg18: memref<4x1x128xf32, #tpu.memory_space<vmem>>, %arg19: memref<64x64xf32, #tpu.memory_space<vmem>>) attributes {dimension_semantics = [#tpu.dimension_semantics<arbitrary>, #tpu.dimension_semantics<arbitrary>], iteration_bounds = array<i64: 3, 2>, scalar_prefetch = 0 : i64, scratch_operands = 4 : i64, tpu.core_type = #tpu.core_type<tc>, window_params = [{pipeline_mode = #tpu.pipeline_mode<synchronous>, transform_indices = @transform_0, window_bounds = array<i64: 128, 64>}, {transform_indices = @transform_1, window_bounds = array<i64: 64, 128>}, {transform_indices = @transform_2, window_bounds = array<i64: 64, 128>}, {transform_indices = @transform_3, window_bounds = array<i64: 64, 128>}, {pipeline_mode = #tpu.pipeline_mode<synchronous>, transform_indices = @transform_4, window_bounds = array<i64: 3, 64, 256>}, {pipeline_mode = #tpu.pipeline_mode<synchronous>, transform_indices = @transform_5, window_bounds = array<i64: 3, 4, 1, 64>}, {pipeline_mode = #tpu.pipeline_mode<synchronous>, transform_indices = @transform_6, window_bounds = array<i64: 3, 64, 4>}, {pipeline_mode = #tpu.pipeline_mode<synchronous>, transform_indices = @transform_7, window_bounds = array<i64: 3, 2, 4>}, {pipeline_mode = #tpu.pipeline_mode<synchronous>, transform_indices = @transform_8, window_bounds = array<i64: 3, 1, 64>}, {pipeline_mode = #tpu.pipeline_mode<synchronous>, transform_indices = @transform_9, window_bounds = array<i64: 64, 32>}, {pipeline_mode = #tpu.pipeline_mode<synchronous>, transform_indices = @transform_10, window_bounds = array<i64: 1, 32>}, {pipeline_mode = #tpu.pipeline_mode<synchronous>, transform_indices = @transform_11, window_bounds = array<i64: 32, 128>}, {pipeline_mode = #tpu.pipeline_mode<synchronous>, transform_indices = @transform_12, window_bounds = array<i64: 1, 128>}, {transform_indices = @transform_13, window_bounds = array<i64: 64, 128>}]} {
    %c64_i32 = arith.constant 64 : i32
    %0 = arith.muli %arg1, %c64_i32 : i32
    %1 = tpu.assume_multiple %0, 64 : i32
    %c0_i32 = arith.constant 0 : i32
    %2 = arith.cmpi eq, %arg0, %c0_i32 : i32
    %c0_i32_0 = arith.constant 0 : i32
    %3 = arith.cmpi eq, %arg1, %c0_i32_0 : i32
    %4 = arith.andi %2, %3 : i1
    %5 = arith.extui %4 : i1 to i32
    %c0_i32_1 = arith.constant 0 : i32
    %6 = arith.cmpi ne, %5, %c0_i32_1 : i32
    scf.if %6 {
      %c0_44 = arith.constant 0 : index
      %c0_45 = arith.constant 0 : index
      %85 = vector.load %arg2[%c0_44, %c0_45] : memref<128x64xf32, #tpu.memory_space<vmem>>, vector<128x64xf32>
      %c0_46 = arith.constant 0 : index
      %c0_47 = arith.constant 0 : index
      %86 = vector.load %arg16[%c0_46, %c0_47] : memref<128x64xf32, #tpu.memory_space<vmem>>, vector<128x64xf32>
      tpu.vector_store %arg16[%c0_46, %c0_47], %85 {strides = array<i32>} : memref<128x64xf32, #tpu.memory_space<vmem>>, vector<128x64xf32>,
    } else {
    }
    %c0_i32_2 = arith.constant 0 : i32
    %7 = arith.cmpi eq, %arg1, %c0_i32_2 : i32
    %8 = arith.extui %7 : i1 to i32
    %c0_i32_3 = arith.constant 0 : i32
    %9 = arith.cmpi ne, %8, %c0_i32_3 : i32
    scf.if %9 {
      %c0_44 = arith.constant 0 : index
      %c0_45 = arith.constant 0 : index
      %85 = vector.load %arg16[%c0_44, %c0_45] : memref<128x64xf32, #tpu.memory_space<vmem>>, vector<128x64xf32>
      %86 = arith.index_cast %arg0 : i32 to index
      %c0_46 = arith.constant 0 : index
      %c0_47 = arith.constant 0 : index
      %87 = vector.load %arg6[%86, %c0_46, %c0_47] : memref<3x64x256xf32, #tpu.memory_space<vmem>>, vector<1x64x256xf32>
      %88 = vector.shape_cast %87 : vector<1x64x256xf32> to vector<64x256xf32>
      %cst_48 = arith.constant dense<0.000000e+00> : vector<128x256xf32>
      %89 = tpu.matmul %85, %88, %cst_48 {dimension_numbers = #tpu.dot_dimension_numbers<[1], [0], [0], [1], [0, 0, 1, 1], [], []>} : vector<128x64xf32>, vector<64x256xf32>, vector<128x256xf32> -> vector<128x256xf32>
      %90 = vector.extract_strided_slice %89 {offsets = [0, 0], sizes = [128, 64], strides = [1, 1]} : vector<128x256xf32> to vector<128x64xf32>
      %91 = arith.truncf %90 : vector<128x64xf32> to vector<128x64xbf16>
      %c0_49 = arith.constant 0 : index
      %c0_50 = arith.constant 0 : index
      %c0_51 = arith.constant 0 : index
      %92 = vector.load %arg17[%c0_49, %c0_50, %c0_51] : memref<4x128x64xbf16, #tpu.memory_space<vmem>>, vector<1x128x64xbf16>
      %93 = vector.shape_cast %92 : vector<1x128x64xbf16> to vector<128x64xbf16>
      %94 = vector.shape_cast %91 : vector<128x64xbf16> to vector<1x128x64xbf16>
      tpu.vector_store %arg17[%c0_49, %c0_50, %c0_51], %94 {strides = array<i32>} : memref<4x128x64xbf16, #tpu.memory_space<vmem>>, vector<1x128x64xbf16>,
      %95 = arith.index_cast %arg0 : i32 to index
      %c0_52 = arith.constant 0 : index
      %c0_53 = arith.constant 0 : index
      %c0_54 = arith.constant 0 : index
      %96 = vector.load %arg7[%95, %c0_52, %c0_53, %c0_54] : memref<3x4x1x64xf32, #tpu.memory_space<vmem>>, vector<1x1x1x64xf32>
      %97 = vector.shape_cast %96 : vector<1x1x1x64xf32> to vector<1x64xf32>
      %cst_55 = arith.constant dense<0.000000e+00> : vector<1x128xf32>
      %98 = tpu.matmul %97, %85, %cst_55 {dimension_numbers = #tpu.dot_dimension_numbers<[1], [1], [0], [0], [0, 0, 1, 0], [], []>} : vector<1x64xf32>, vector<128x64xf32>, vector<1x128xf32> -> vector<1x128xf32>
      %c0_56 = arith.constant 0 : index
      %c0_57 = arith.constant 0 : index
      %c0_58 = arith.constant 0 : index
      %99 = vector.load %arg18[%c0_56, %c0_57, %c0_58] : memref<4x1x128xf32, #tpu.memory_space<vmem>>, vector<1x1x128xf32>
      %100 = vector.shape_cast %99 : vector<1x1x128xf32> to vector<1x128xf32>
      %101 = vector.shape_cast %98 : vector<1x128xf32> to vector<1x1x128xf32>
      tpu.vector_store %arg18[%c0_56, %c0_57, %c0_58], %101 {strides = array<i32>} : memref<4x1x128xf32, #tpu.memory_space<vmem>>, vector<1x1x128xf32>,
      %102 = vector.extract_strided_slice %89 {offsets = [0, 64], sizes = [128, 64], strides = [1, 1]} : vector<128x256xf32> to vector<128x64xf32>
      %103 = arith.truncf %102 : vector<128x64xf32> to vector<128x64xbf16>
      %c1 = arith.constant 1 : index
      %c0_59 = arith.constant 0 : index
      %c0_60 = arith.constant 0 : index
      %104 = vector.load %arg17[%c1, %c0_59, %c0_60] : memref<4x128x64xbf16, #tpu.memory_space<vmem>>, vector<1x128x64xbf16>
      %105 = vector.shape_cast %104 : vector<1x128x64xbf16> to vector<128x64xbf16>
      %106 = vector.shape_cast %103 : vector<128x64xbf16> to vector<1x128x64xbf16>
      tpu.vector_store %arg17[%c1, %c0_59, %c0_60], %106 {strides = array<i32>} : memref<4x128x64xbf16, #tpu.memory_space<vmem>>, vector<1x128x64xbf16>,
      %107 = arith.index_cast %arg0 : i32 to index
      %c1_61 = arith.constant 1 : index
      %c0_62 = arith.constant 0 : index
      %c0_63 = arith.constant 0 : index
      %108 = vector.load %arg7[%107, %c1_61, %c0_62, %c0_63] : memref<3x4x1x64xf32, #tpu.memory_space<vmem>>, vector<1x1x1x64xf32>
      %109 = vector.shape_cast %108 : vector<1x1x1x64xf32> to vector<1x64xf32>
      %cst_64 = arith.constant dense<0.000000e+00> : vector<1x128xf32>
      %110 = tpu.matmul %109, %85, %cst_64 {dimension_numbers = #tpu.dot_dimension_numbers<[1], [1], [0], [0], [0, 0, 1, 0], [], []>} : vector<1x64xf32>, vector<128x64xf32>, vector<1x128xf32> -> vector<1x128xf32>
      %c1_65 = arith.constant 1 : index
      %c0_66 = arith.constant 0 : index
      %c0_67 = arith.constant 0 : index
      %111 = vector.load %arg18[%c1_65, %c0_66, %c0_67] : memref<4x1x128xf32, #tpu.memory_space<vmem>>, vector<1x1x128xf32>
      %112 = vector.shape_cast %111 : vector<1x1x128xf32> to vector<1x128xf32>
      %113 = vector.shape_cast %110 : vector<1x128xf32> to vector<1x1x128xf32>
      tpu.vector_store %arg18[%c1_65, %c0_66, %c0_67], %113 {strides = array<i32>} : memref<4x1x128xf32, #tpu.memory_space<vmem>>, vector<1x1x128xf32>,
      %114 = vector.extract_strided_slice %89 {offsets = [0, 128], sizes = [128, 64], strides = [1, 1]} : vector<128x256xf32> to vector<128x64xf32>
      %115 = arith.truncf %114 : vector<128x64xf32> to vector<128x64xbf16>
      %c2 = arith.constant 2 : index
      %c0_68 = arith.constant 0 : index
      %c0_69 = arith.constant 0 : index
      %116 = vector.load %arg17[%c2, %c0_68, %c0_69] : memref<4x128x64xbf16, #tpu.memory_space<vmem>>, vector<1x128x64xbf16>
      %117 = vector.shape_cast %116 : vector<1x128x64xbf16> to vector<128x64xbf16>
      %118 = vector.shape_cast %115 : vector<128x64xbf16> to vector<1x128x64xbf16>
      tpu.vector_store %arg17[%c2, %c0_68, %c0_69], %118 {strides = array<i32>} : memref<4x128x64xbf16, #tpu.memory_space<vmem>>, vector<1x128x64xbf16>,
      %119 = arith.index_cast %arg0 : i32 to index
      %c2_70 = arith.constant 2 : index
      %c0_71 = arith.constant 0 : index
      %c0_72 = arith.constant 0 : index
      %120 = vector.load %arg7[%119, %c2_70, %c0_71, %c0_72] : memref<3x4x1x64xf32, #tpu.memory_space<vmem>>, vector<1x1x1x64xf32>
      %121 = vector.shape_cast %120 : vector<1x1x1x64xf32> to vector<1x64xf32>
      %cst_73 = arith.constant dense<0.000000e+00> : vector<1x128xf32>
      %122 = tpu.matmul %121, %85, %cst_73 {dimension_numbers = #tpu.dot_dimension_numbers<[1], [1], [0], [0], [0, 0, 1, 0], [], []>} : vector<1x64xf32>, vector<128x64xf32>, vector<1x128xf32> -> vector<1x128xf32>
      %c2_74 = arith.constant 2 : index
      %c0_75 = arith.constant 0 : index
      %c0_76 = arith.constant 0 : index
      %123 = vector.load %arg18[%c2_74, %c0_75, %c0_76] : memref<4x1x128xf32, #tpu.memory_space<vmem>>, vector<1x1x128xf32>
      %124 = vector.shape_cast %123 : vector<1x1x128xf32> to vector<1x128xf32>
      %125 = vector.shape_cast %122 : vector<1x128xf32> to vector<1x1x128xf32>
      tpu.vector_store %arg18[%c2_74, %c0_75, %c0_76], %125 {strides = array<i32>} : memref<4x1x128xf32, #tpu.memory_space<vmem>>, vector<1x1x128xf32>,
      %126 = vector.extract_strided_slice %89 {offsets = [0, 192], sizes = [128, 64], strides = [1, 1]} : vector<128x256xf32> to vector<128x64xf32>
      %127 = arith.truncf %126 : vector<128x64xf32> to vector<128x64xbf16>
      %c3 = arith.constant 3 : index
      %c0_77 = arith.constant 0 : index
      %c0_78 = arith.constant 0 : index
      %128 = vector.load %arg17[%c3, %c0_77, %c0_78] : memref<4x128x64xbf16, #tpu.memory_space<vmem>>, vector<1x128x64xbf16>
      %129 = vector.shape_cast %128 : vector<1x128x64xbf16> to vector<128x64xbf16>
      %130 = vector.shape_cast %127 : vector<128x64xbf16> to vector<1x128x64xbf16>
      tpu.vector_store %arg17[%c3, %c0_77, %c0_78], %130 {strides = array<i32>} : memref<4x128x64xbf16, #tpu.memory_space<vmem>>, vector<1x128x64xbf16>,
      %131 = arith.index_cast %arg0 : i32 to index
      %c3_79 = arith.constant 3 : index
      %c0_80 = arith.constant 0 : index
      %c0_81 = arith.constant 0 : index
      %132 = vector.load %arg7[%131, %c3_79, %c0_80, %c0_81] : memref<3x4x1x64xf32, #tpu.memory_space<vmem>>, vector<1x1x1x64xf32>
      %133 = vector.shape_cast %132 : vector<1x1x1x64xf32> to vector<1x64xf32>
      %cst_82 = arith.constant dense<0.000000e+00> : vector<1x128xf32>
      %134 = tpu.matmul %133, %85, %cst_82 {dimension_numbers = #tpu.dot_dimension_numbers<[1], [1], [0], [0], [0, 0, 1, 0], [], []>} : vector<1x64xf32>, vector<128x64xf32>, vector<1x128xf32> -> vector<1x128xf32>
      %c3_83 = arith.constant 3 : index
      %c0_84 = arith.constant 0 : index
      %c0_85 = arith.constant 0 : index
      %135 = vector.load %arg18[%c3_83, %c0_84, %c0_85] : memref<4x1x128xf32, #tpu.memory_space<vmem>>, vector<1x1x128xf32>
      %136 = vector.shape_cast %135 : vector<1x1x128xf32> to vector<1x128xf32>
      %137 = vector.shape_cast %134 : vector<1x128xf32> to vector<1x1x128xf32>
      tpu.vector_store %arg18[%c3_83, %c0_84, %c0_85], %137 {strides = array<i32>} : memref<4x1x128xf32, #tpu.memory_space<vmem>>, vector<1x1x128xf32>,
    } else {
    }
    %c0 = arith.constant 0 : index
    %c0_4 = arith.constant 0 : index
    %10 = vector.load %arg3[%c0, %c0_4] : memref<64x128xbf16, #tpu.memory_space<vmem>>, vector<64x128xbf16>
    %11 = arith.extf %10 : vector<64x128xbf16> to vector<64x128xf32>
    %c0_5 = arith.constant 0 : index
    %c0_6 = arith.constant 0 : index
    %12 = vector.load %arg4[%c0_5, %c0_6] : memref<64x128xbf16, #tpu.memory_space<vmem>>, vector<64x128xbf16>
    %13 = arith.extf %12 : vector<64x128xbf16> to vector<64x128xf32>
    %c0_7 = arith.constant 0 : index
    %c0_8 = arith.constant 0 : index
    %14 = vector.load %arg5[%c0_7, %c0_8] : memref<64x128xbf16, #tpu.memory_space<vmem>>, vector<64x128xbf16>
    %15 = arith.extf %14 : vector<64x128xbf16> to vector<64x128xf32>
    %16 = arith.index_cast %arg0 : i32 to index
    %c0_9 = arith.constant 0 : index
    %c0_10 = arith.constant 0 : index
    %17 = vector.load %arg9[%16, %c0_9, %c0_10] : memref<3x2x4xf32, #tpu.memory_space<vmem>>, vector<1x2x4xf32>
    %18 = vector.shape_cast %17 : vector<1x2x4xf32> to vector<2x4xf32>
    %19 = arith.index_cast %1 : i32 to index
    %c0_11 = arith.constant 0 : index
    %20 = vector.load %arg16[%19, %c0_11] : memref<128x64xf32, #tpu.memory_space<vmem>>, vector<64x64xf32>
    %21 = arith.index_cast %arg0 : i32 to index
    %c0_12 = arith.constant 0 : index
    %c0_13 = arith.constant 0 : index
    %22 = vector.load %arg8[%21, %c0_12, %c0_13] : memref<3x64x4xf32, #tpu.memory_space<vmem>>, vector<1x64x4xf32>
    %23 = vector.shape_cast %22 : vector<1x64x4xf32> to vector<64x4xf32>
    %cst = arith.constant dense<0.000000e+00> : vector<64x4xf32>
    %24 = tpu.matmul %20, %23, %cst {dimension_numbers = #tpu.dot_dimension_numbers<[1], [0], [0], [1], [0, 0, 1, 1], [], []>} : vector<64x64xf32>, vector<64x4xf32>, vector<64x4xf32> -> vector<64x4xf32>
    %cst_14 = arith.constant 0.000000e+00 : f32
    %25 = vector.broadcast %cst_14 : f32 to vector<64x64xf32>
    %c0_15 = arith.constant 0 : index
    %c0_16 = arith.constant 0 : index
    %26 = vector.load %arg19[%c0_15, %c0_16] : memref<64x64xf32, #tpu.memory_space<vmem>>, vector<64x64xf32>
    tpu.vector_store %arg19[%c0_15, %c0_16], %25 {strides = array<i32>} : memref<64x64xf32, #tpu.memory_space<vmem>>, vector<64x64xf32>,
    %27 = vector.extract_strided_slice %24 {offsets = [0, 0], sizes = [64, 1], strides = [1, 1]} : vector<64x4xf32> to vector<64x1xf32>
    %c0_17 = arith.constant 0 : index
    %c0_18 = arith.constant 0 : index
    %c0_19 = arith.constant 0 : index
    %28 = vector.load %arg18[%c0_17, %c0_18, %c0_19] : memref<4x1x128xf32, #tpu.memory_space<vmem>>, vector<1x1x128xf32>
    %29 = vector.shape_cast %28 : vector<1x1x128xf32> to vector<1x128xf32>
    %30 = vector.extract_strided_slice %18 {offsets = [0, 0], sizes = [1, 1], strides = [1, 1]} : vector<2x4xf32> to vector<1x1xf32>
    %31 = vector.extract_strided_slice %18 {offsets = [1, 0], sizes = [1, 1], strides = [1, 1]} : vector<2x4xf32> to vector<1x1xf32>
    %32 = vector.broadcast %27 : vector<64x1xf32> to vector<64x128xf32>
    %33 = vector.broadcast %29 : vector<1x128xf32> to vector<64x128xf32>
    %34 = arith.addf %32, %33 : vector<64x128xf32>
    %35 = vector.broadcast %30 : vector<1x1xf32> to vector<64x128xf32>
    %36 = arith.mulf %13, %35 : vector<64x128xf32>
    %37 = arith.addf %34, %36 : vector<64x128xf32>
    %38 = vector.broadcast %31 : vector<1x1xf32> to vector<64x128xf32>
    %39 = arith.mulf %15, %38 : vector<64x128xf32>
    %40 = arith.addf %37, %39 : vector<64x128xf32>
    %41 = arith.addf %40, %11 : vector<64x128xf32>
    %cst_20 = arith.constant 2.000000e-01 : f32
    %42 = vector.broadcast %cst_20 : f32 to vector<64x128xf32>
    %43 = arith.mulf %42, %41 : vector<64x128xf32>
    %44 = arith.maximumf %41, %43 : vector<64x128xf32>
    %cst_21 = arith.constant dense<0xFF800000> : vector<64xf32>
    %45 = vector.multi_reduction <maximumf>, %44, %cst_21 [1] : vector<64x128xf32> to vector<64xf32>
    %46 = vector.shape_cast %45 : vector<64xf32> to vector<64x1xf32>
    %47 = vector.broadcast %46 : vector<64x1xf32> to vector<64x128xf32>
    %48 = arith.subf %44, %47 : vector<64x128xf32>
    %49 = math.exp %48 : vector<64x128xf32>
    %cst_22 = arith.constant dense<0.000000e+00> : vector<64xf32>
    %50 = vector.multi_reduction <add>, %49, %cst_22 [1] : vector<64x128xf32> to vector<64xf32>
    %51 = vector.shape_cast %50 : vector<64xf32> to vector<64x1xf32>
    %52 = tpu.reciprocal %51 {approx = true} : vector<64x1xf32> -> vector<64x1xf32>
    %53 = arith.truncf %49 : vector<64x128xf32> to vector<64x128xbf16>
    %c0_23 = arith.constant 0 : index
    %c0_24 = arith.constant 0 : index
    %c0_25 = arith.constant 0 : index
    %54 = vector.load %arg17[%c0_23, %c0_24, %c0_25] : memref<4x128x64xbf16, #tpu.memory_space<vmem>>, vector<1x128x64xbf16>
    %55 = vector.shape_cast %54 : vector<1x128x64xbf16> to vector<128x64xbf16>
    %cst_26 = arith.constant dense<0.000000e+00> : vector<64x64xf32>
    %56 = tpu.matmul %53, %55, %cst_26 {dimension_numbers = #tpu.dot_dimension_numbers<[1], [0], [0], [1], [0, 0, 1, 1], [], []>} : vector<64x128xbf16>, vector<128x64xbf16>, vector<64x64xf32> -> vector<64x64xf32>
    %57 = vector.broadcast %52 : vector<64x1xf32> to vector<64x64xf32>
    %58 = arith.mulf %56, %57 : vector<64x64xf32>
    %c0_27 = arith.constant 0 : index
    %c0_28 = arith.constant 0 : index
    %59 = vector.load %arg19[%c0_27, %c0_28] : memref<64x64xf32, #tpu.memory_space<vmem>>, vector<64x64xf32>
    %60 = arith.addf %59, %58 : vector<64x64xf32>
    %c0_29 = arith.constant 0 : index
    %c0_30 = arith.constant 0 : index
    %61 = vector.load %arg19[%c0_29, %c0_30] : memref<64x64xf32, #tpu.memory_space<vmem>>, vector<64x64xf32>
    tpu.vector_store %arg19[%c0_29, %c0_30], %60 {strides = array<i32>} : memref<64x64xf32, #tpu.memory_space<vmem>>, vector<64x64xf32>,
    %c2_i32 = arith.constant 2 : i32
    %62 = arith.cmpi slt, %arg0, %c2_i32 : i32
    %63 = arith.extui %62 : i1 to i32
    %c0_i32_31 = arith.constant 0 : i32
    %64 = arith.cmpi ne, %63, %c0_i32_31 : i32
    scf.if %64 {
      %85 = vector.extract_strided_slice %24 {offsets = [0, 1], sizes = [64, 1], strides = [1, 1]} : vector<64x4xf32> to vector<64x1xf32>
      %c1 = arith.constant 1 : index
      %c0_44 = arith.constant 0 : index
      %c0_45 = arith.constant 0 : index
      %86 = vector.load %arg18[%c1, %c0_44, %c0_45] : memref<4x1x128xf32, #tpu.memory_space<vmem>>, vector<1x1x128xf32>
      %87 = vector.shape_cast %86 : vector<1x1x128xf32> to vector<1x128xf32>
      %88 = vector.extract_strided_slice %18 {offsets = [0, 1], sizes = [1, 1], strides = [1, 1]} : vector<2x4xf32> to vector<1x1xf32>
      %89 = vector.extract_strided_slice %18 {offsets = [1, 1], sizes = [1, 1], strides = [1, 1]} : vector<2x4xf32> to vector<1x1xf32>
      %90 = vector.broadcast %85 : vector<64x1xf32> to vector<64x128xf32>
      %91 = vector.broadcast %87 : vector<1x128xf32> to vector<64x128xf32>
      %92 = arith.addf %90, %91 : vector<64x128xf32>
      %93 = vector.broadcast %88 : vector<1x1xf32> to vector<64x128xf32>
      %94 = arith.mulf %13, %93 : vector<64x128xf32>
      %95 = arith.addf %92, %94 : vector<64x128xf32>
      %96 = vector.broadcast %89 : vector<1x1xf32> to vector<64x128xf32>
      %97 = arith.mulf %15, %96 : vector<64x128xf32>
      %98 = arith.addf %95, %97 : vector<64x128xf32>
      %99 = arith.addf %98, %11 : vector<64x128xf32>
      %cst_46 = arith.constant 2.000000e-01 : f32
      %100 = vector.broadcast %cst_46 : f32 to vector<64x128xf32>
      %101 = arith.mulf %100, %99 : vector<64x128xf32>
      %102 = arith.maximumf %99, %101 : vector<64x128xf32>
      %cst_47 = arith.constant dense<0xFF800000> : vector<64xf32>
      %103 = vector.multi_reduction <maximumf>, %102, %cst_47 [1] : vector<64x128xf32> to vector<64xf32>
      %104 = vector.shape_cast %103 : vector<64xf32> to vector<64x1xf32>
      %105 = vector.broadcast %104 : vector<64x1xf32> to vector<64x128xf32>
      %106 = arith.subf %102, %105 : vector<64x128xf32>
      %107 = math.exp %106 : vector<64x128xf32>
      %cst_48 = arith.constant dense<0.000000e+00> : vector<64xf32>
      %108 = vector.multi_reduction <add>, %107, %cst_48 [1] : vector<64x128xf32> to vector<64xf32>
      %109 = vector.shape_cast %108 : vector<64xf32> to vector<64x1xf32>
      %110 = tpu.reciprocal %109 {approx = true} : vector<64x1xf32> -> vector<64x1xf32>
      %111 = arith.truncf %107 : vector<64x128xf32> to vector<64x128xbf16>
      %c1_49 = arith.constant 1 : index
      %c0_50 = arith.constant 0 : index
      %c0_51 = arith.constant 0 : index
      %112 = vector.load %arg17[%c1_49, %c0_50, %c0_51] : memref<4x128x64xbf16, #tpu.memory_space<vmem>>, vector<1x128x64xbf16>
      %113 = vector.shape_cast %112 : vector<1x128x64xbf16> to vector<128x64xbf16>
      %cst_52 = arith.constant dense<0.000000e+00> : vector<64x64xf32>
      %114 = tpu.matmul %111, %113, %cst_52 {dimension_numbers = #tpu.dot_dimension_numbers<[1], [0], [0], [1], [0, 0, 1, 1], [], []>} : vector<64x128xbf16>, vector<128x64xbf16>, vector<64x64xf32> -> vector<64x64xf32>
      %115 = vector.broadcast %110 : vector<64x1xf32> to vector<64x64xf32>
      %116 = arith.mulf %114, %115 : vector<64x64xf32>
      %c0_53 = arith.constant 0 : index
      %c0_54 = arith.constant 0 : index
      %117 = vector.load %arg19[%c0_53, %c0_54] : memref<64x64xf32, #tpu.memory_space<vmem>>, vector<64x64xf32>
      %118 = arith.addf %117, %116 : vector<64x64xf32>
      %c0_55 = arith.constant 0 : index
      %c0_56 = arith.constant 0 : index
      %119 = vector.load %arg19[%c0_55, %c0_56] : memref<64x64xf32, #tpu.memory_space<vmem>>, vector<64x64xf32>
      tpu.vector_store %arg19[%c0_55, %c0_56], %118 {strides = array<i32>} : memref<64x64xf32, #tpu.memory_space<vmem>>, vector<64x64xf32>,
    } else {
    }
    %c2_i32_32 = arith.constant 2 : i32
    %65 = arith.cmpi slt, %arg0, %c2_i32_32 : i32
    %66 = arith.extui %65 : i1 to i32
    %c0_i32_33 = arith.constant 0 : i32
    %67 = arith.cmpi ne, %66, %c0_i32_33 : i32
    scf.if %67 {
      %85 = vector.extract_strided_slice %24 {offsets = [0, 2], sizes = [64, 1], strides = [1, 1]} : vector<64x4xf32> to vector<64x1xf32>
      %c2 = arith.constant 2 : index
      %c0_44 = arith.constant 0 : index
      %c0_45 = arith.constant 0 : index
      %86 = vector.load %arg18[%c2, %c0_44, %c0_45] : memref<4x1x128xf32, #tpu.memory_space<vmem>>, vector<1x1x128xf32>
      %87 = vector.shape_cast %86 : vector<1x1x128xf32> to vector<1x128xf32>
      %88 = vector.extract_strided_slice %18 {offsets = [0, 2], sizes = [1, 1], strides = [1, 1]} : vector<2x4xf32> to vector<1x1xf32>
      %89 = vector.extract_strided_slice %18 {offsets = [1, 2], sizes = [1, 1], strides = [1, 1]} : vector<2x4xf32> to vector<1x1xf32>
      %90 = vector.broadcast %85 : vector<64x1xf32> to vector<64x128xf32>
      %91 = vector.broadcast %87 : vector<1x128xf32> to vector<64x128xf32>
      %92 = arith.addf %90, %91 : vector<64x128xf32>
      %93 = vector.broadcast %88 : vector<1x1xf32> to vector<64x128xf32>
      %94 = arith.mulf %13, %93 : vector<64x128xf32>
      %95 = arith.addf %92, %94 : vector<64x128xf32>
      %96 = vector.broadcast %89 : vector<1x1xf32> to vector<64x128xf32>
      %97 = arith.mulf %15, %96 : vector<64x128xf32>
      %98 = arith.addf %95, %97 : vector<64x128xf32>
      %99 = arith.addf %98, %11 : vector<64x128xf32>
      %cst_46 = arith.constant 2.000000e-01 : f32
      %100 = vector.broadcast %cst_46 : f32 to vector<64x128xf32>
      %101 = arith.mulf %100, %99 : vector<64x128xf32>
      %102 = arith.maximumf %99, %101 : vector<64x128xf32>
      %cst_47 = arith.constant dense<0xFF800000> : vector<64xf32>
      %103 = vector.multi_reduction <maximumf>, %102, %cst_47 [1] : vector<64x128xf32> to vector<64xf32>
      %104 = vector.shape_cast %103 : vector<64xf32> to vector<64x1xf32>
      %105 = vector.broadcast %104 : vector<64x1xf32> to vector<64x128xf32>
      %106 = arith.subf %102, %105 : vector<64x128xf32>
      %107 = math.exp %106 : vector<64x128xf32>
      %cst_48 = arith.constant dense<0.000000e+00> : vector<64xf32>
      %108 = vector.multi_reduction <add>, %107, %cst_48 [1] : vector<64x128xf32> to vector<64xf32>
      %109 = vector.shape_cast %108 : vector<64xf32> to vector<64x1xf32>
      %110 = tpu.reciprocal %109 {approx = true} : vector<64x1xf32> -> vector<64x1xf32>
      %111 = arith.truncf %107 : vector<64x128xf32> to vector<64x128xbf16>
      %c2_49 = arith.constant 2 : index
      %c0_50 = arith.constant 0 : index
      %c0_51 = arith.constant 0 : index
      %112 = vector.load %arg17[%c2_49, %c0_50, %c0_51] : memref<4x128x64xbf16, #tpu.memory_space<vmem>>, vector<1x128x64xbf16>
      %113 = vector.shape_cast %112 : vector<1x128x64xbf16> to vector<128x64xbf16>
      %cst_52 = arith.constant dense<0.000000e+00> : vector<64x64xf32>
      %114 = tpu.matmul %111, %113, %cst_52 {dimension_numbers = #tpu.dot_dimension_numbers<[1], [0], [0], [1], [0, 0, 1, 1], [], []>} : vector<64x128xbf16>, vector<128x64xbf16>, vector<64x64xf32> -> vector<64x64xf32>
      %115 = vector.broadcast %110 : vector<64x1xf32> to vector<64x64xf32>
      %116 = arith.mulf %114, %115 : vector<64x64xf32>
      %c0_53 = arith.constant 0 : index
      %c0_54 = arith.constant 0 : index
      %117 = vector.load %arg19[%c0_53, %c0_54] : memref<64x64xf32, #tpu.memory_space<vmem>>, vector<64x64xf32>
      %118 = arith.addf %117, %116 : vector<64x64xf32>
      %c0_55 = arith.constant 0 : index
      %c0_56 = arith.constant 0 : index
      %119 = vector.load %arg19[%c0_55, %c0_56] : memref<64x64xf32, #tpu.memory_space<vmem>>, vector<64x64xf32>
      tpu.vector_store %arg19[%c0_55, %c0_56], %118 {strides = array<i32>} : memref<64x64xf32, #tpu.memory_space<vmem>>, vector<64x64xf32>,
    } else {
    }
    %c2_i32_34 = arith.constant 2 : i32
    %68 = arith.cmpi slt, %arg0, %c2_i32_34 : i32
    %69 = arith.extui %68 : i1 to i32
    %c0_i32_35 = arith.constant 0 : i32
    %70 = arith.cmpi ne, %69, %c0_i32_35 : i32
    scf.if %70 {
      %85 = vector.extract_strided_slice %24 {offsets = [0, 3], sizes = [64, 1], strides = [1, 1]} : vector<64x4xf32> to vector<64x1xf32>
      %c3 = arith.constant 3 : index
      %c0_44 = arith.constant 0 : index
      %c0_45 = arith.constant 0 : index
      %86 = vector.load %arg18[%c3, %c0_44, %c0_45] : memref<4x1x128xf32, #tpu.memory_space<vmem>>, vector<1x1x128xf32>
      %87 = vector.shape_cast %86 : vector<1x1x128xf32> to vector<1x128xf32>
      %88 = vector.extract_strided_slice %18 {offsets = [0, 3], sizes = [1, 1], strides = [1, 1]} : vector<2x4xf32> to vector<1x1xf32>
      %89 = vector.extract_strided_slice %18 {offsets = [1, 3], sizes = [1, 1], strides = [1, 1]} : vector<2x4xf32> to vector<1x1xf32>
      %90 = vector.broadcast %85 : vector<64x1xf32> to vector<64x128xf32>
      %91 = vector.broadcast %87 : vector<1x128xf32> to vector<64x128xf32>
      %92 = arith.addf %90, %91 : vector<64x128xf32>
      %93 = vector.broadcast %88 : vector<1x1xf32> to vector<64x128xf32>
      %94 = arith.mulf %13, %93 : vector<64x128xf32>
      %95 = arith.addf %92, %94 : vector<64x128xf32>
      %96 = vector.broadcast %89 : vector<1x1xf32> to vector<64x128xf32>
      %97 = arith.mulf %15, %96 : vector<64x128xf32>
      %98 = arith.addf %95, %97 : vector<64x128xf32>
      %99 = arith.addf %98, %11 : vector<64x128xf32>
      %cst_46 = arith.constant 2.000000e-01 : f32
      %100 = vector.broadcast %cst_46 : f32 to vector<64x128xf32>
      %101 = arith.mulf %100, %99 : vector<64x128xf32>
      %102 = arith.maximumf %99, %101 : vector<64x128xf32>
      %cst_47 = arith.constant dense<0xFF800000> : vector<64xf32>
      %103 = vector.multi_reduction <maximumf>, %102, %cst_47 [1] : vector<64x128xf32> to vector<64xf32>
      %104 = vector.shape_cast %103 : vector<64xf32> to vector<64x1xf32>
      %105 = vector.broadcast %104 : vector<64x1xf32> to vector<64x128xf32>
      %106 = arith.subf %102, %105 : vector<64x128xf32>
      %107 = math.exp %106 : vector<64x128xf32>
      %cst_48 = arith.constant dense<0.000000e+00> : vector<64xf32>
      %108 = vector.multi_reduction <add>, %107, %cst_48 [1] : vector<64x128xf32> to vector<64xf32>
      %109 = vector.shape_cast %108 : vector<64xf32> to vector<64x1xf32>
      %110 = tpu.reciprocal %109 {approx = true} : vector<64x1xf32> -> vector<64x1xf32>
      %111 = arith.truncf %107 : vector<64x128xf32> to vector<64x128xbf16>
      %c3_49 = arith.constant 3 : index
      %c0_50 = arith.constant 0 : index
      %c0_51 = arith.constant 0 : index
      %112 = vector.load %arg17[%c3_49, %c0_50, %c0_51] : memref<4x128x64xbf16, #tpu.memory_space<vmem>>, vector<1x128x64xbf16>
      %113 = vector.shape_cast %112 : vector<1x128x64xbf16> to vector<128x64xbf16>
      %cst_52 = arith.constant dense<0.000000e+00> : vector<64x64xf32>
      %114 = tpu.matmul %111, %113, %cst_52 {dimension_numbers = #tpu.dot_dimension_numbers<[1], [0], [0], [1], [0, 0, 1, 1], [], []>} : vector<64x128xbf16>, vector<128x64xbf16>, vector<64x64xf32> -> vector<64x64xf32>
      %115 = vector.broadcast %110 : vector<64x1xf32> to vector<64x64xf32>
      %116 = arith.mulf %114, %115 : vector<64x64xf32>
      %c0_53 = arith.constant 0 : index
      %c0_54 = arith.constant 0 : index
      %117 = vector.load %arg19[%c0_53, %c0_54] : memref<64x64xf32, #tpu.memory_space<vmem>>, vector<64x64xf32>
      %118 = arith.addf %117, %116 : vector<64x64xf32>
      %c0_55 = arith.constant 0 : index
      %c0_56 = arith.constant 0 : index
      %119 = vector.load %arg19[%c0_55, %c0_56] : memref<64x64xf32, #tpu.memory_space<vmem>>, vector<64x64xf32>
      tpu.vector_store %arg19[%c0_55, %c0_56], %118 {strides = array<i32>} : memref<64x64xf32, #tpu.memory_space<vmem>>, vector<64x64xf32>,
    } else {
    }
    %c0_36 = arith.constant 0 : index
    %c0_37 = arith.constant 0 : index
    %71 = vector.load %arg19[%c0_36, %c0_37] : memref<64x64xf32, #tpu.memory_space<vmem>>, vector<64x64xf32>
    %72 = arith.index_cast %arg0 : i32 to index
    %c0_38 = arith.constant 0 : index
    %c0_39 = arith.constant 0 : index
    %73 = vector.load %arg10[%72, %c0_38, %c0_39] : memref<3x1x64xf32, #tpu.memory_space<vmem>>, vector<1x1x64xf32>
    %74 = vector.shape_cast %73 : vector<1x1x64xf32> to vector<1x64xf32>
    %75 = vector.broadcast %74 : vector<1x64xf32> to vector<64x64xf32>
    %76 = arith.addf %71, %75 : vector<64x64xf32>
    %cst_40 = arith.constant 0.000000e+00 : f32
    %77 = vector.broadcast %cst_40 : f32 to vector<64x64xf32>
    %78 = arith.maximumf %76, %77 : vector<64x64xf32>
    %79 = arith.addf %78, %20 : vector<64x64xf32>
    %80 = arith.index_cast %1 : i32 to index
    %c0_41 = arith.constant 0 : index
    %81 = vector.load %arg16[%80, %c0_41] : memref<128x64xf32, #tpu.memory_space<vmem>>, vector<64x64xf32>
    tpu.vector_store %arg16[%80, %c0_41], %79 {strides = array<i32>} : memref<128x64xf32, #tpu.memory_space<vmem>>, vector<64x64xf32>,
    %c2_i32_42 = arith.constant 2 : i32
    %82 = arith.cmpi eq, %arg0, %c2_i32_42 : i32
    %83 = arith.extui %82 : i1 to i32
    %c0_i32_43 = arith.constant 0 : i32
    %84 = arith.cmpi ne, %83, %c0_i32_43 : i32
    scf.if %84 {
      %c0_44 = arith.constant 0 : index
      %c0_45 = arith.constant 0 : index
      %85 = vector.load %arg11[%c0_44, %c0_45] : memref<64x32xf32, #tpu.memory_space<vmem>>, vector<64x32xf32>
      %cst_46 = arith.constant dense<0.000000e+00> : vector<64x32xf32>
      %86 = tpu.matmul %79, %85, %cst_46 {dimension_numbers = #tpu.dot_dimension_numbers<[1], [0], [0], [1], [0, 0, 1, 1], [], []>} : vector<64x64xf32>, vector<64x32xf32>, vector<64x32xf32> -> vector<64x32xf32>
      %c0_47 = arith.constant 0 : index
      %c0_48 = arith.constant 0 : index
      %87 = vector.load %arg12[%c0_47, %c0_48] : memref<1x32xf32, #tpu.memory_space<vmem>>, vector<1x32xf32>
      %88 = vector.broadcast %87 : vector<1x32xf32> to vector<64x32xf32>
      %89 = arith.addf %86, %88 : vector<64x32xf32>
      %cst_49 = arith.constant 0.000000e+00 : f32
      %90 = vector.broadcast %cst_49 : f32 to vector<64x32xf32>
      %91 = arith.maximumf %89, %90 : vector<64x32xf32>
      %c0_50 = arith.constant 0 : index
      %c0_51 = arith.constant 0 : index
      %92 = vector.load %arg13[%c0_50, %c0_51] : memref<32x128xf32, #tpu.memory_space<vmem>>, vector<32x128xf32>
      %cst_52 = arith.constant dense<0.000000e+00> : vector<64x128xf32>
      %93 = tpu.matmul %91, %92, %cst_52 {dimension_numbers = #tpu.dot_dimension_numbers<[1], [0], [0], [1], [0, 0, 1, 1], [], []>} : vector<64x32xf32>, vector<32x128xf32>, vector<64x128xf32> -> vector<64x128xf32>
      %c0_53 = arith.constant 0 : index
      %c0_54 = arith.constant 0 : index
      %94 = vector.load %arg14[%c0_53, %c0_54] : memref<1x128xf32, #tpu.memory_space<vmem>>, vector<1x128xf32>
      %95 = vector.broadcast %94 : vector<1x128xf32> to vector<64x128xf32>
      %96 = arith.addf %93, %95 : vector<64x128xf32>
      %97 = math.tanh %96 : vector<64x128xf32>
      %c0_55 = arith.constant 0 : index
      %c0_56 = arith.constant 0 : index
      %98 = vector.load %arg15[%c0_55, %c0_56] : memref<64x128xf32, #tpu.memory_space<vmem>>, vector<64x128xf32>
      tpu.vector_store %arg15[%c0_55, %c0_56], %97 {strides = array<i32>} : memref<64x128xf32, #tpu.memory_space<vmem>>, vector<64x128xf32>,
    } else {
    }
    return
  }
  func.func @transform_0(%arg0: i32, %arg1: i32) -> (i32, i32) {
    %c0_i32 = arith.constant 0 : i32
    %c0_i32_0 = arith.constant 0 : i32
    %c0_i32_1 = arith.constant 0 : i32
    return %c0_i32, %c0_i32_0 : i32, i32
  }
  func.func @transform_1(%arg0: i32, %arg1: i32) -> (i32, i32) {
    %c0_i32 = arith.constant 0 : i32
    %c0_i32_0 = arith.constant 0 : i32
    return %arg1, %c0_i32 : i32, i32
  }
  func.func @transform_2(%arg0: i32, %arg1: i32) -> (i32, i32) {
    %c0_i32 = arith.constant 0 : i32
    %c0_i32_0 = arith.constant 0 : i32
    return %arg1, %c0_i32 : i32, i32
  }
  func.func @transform_3(%arg0: i32, %arg1: i32) -> (i32, i32) {
    %c0_i32 = arith.constant 0 : i32
    %c0_i32_0 = arith.constant 0 : i32
    return %arg1, %c0_i32 : i32, i32
  }
  func.func @transform_4(%arg0: i32, %arg1: i32) -> (i32, i32, i32) {
    %c0_i32 = arith.constant 0 : i32
    %c0_i32_0 = arith.constant 0 : i32
    %c0_i32_1 = arith.constant 0 : i32
    %c0_i32_2 = arith.constant 0 : i32
    return %c0_i32, %c0_i32_0, %c0_i32_1 : i32, i32, i32
  }
  func.func @transform_5(%arg0: i32, %arg1: i32) -> (i32, i32, i32, i32) {
    %c0_i32 = arith.constant 0 : i32
    %c0_i32_0 = arith.constant 0 : i32
    %c0_i32_1 = arith.constant 0 : i32
    %c0_i32_2 = arith.constant 0 : i32
    %c0_i32_3 = arith.constant 0 : i32
    return %c0_i32, %c0_i32_0, %c0_i32_1, %c0_i32_2 : i32, i32, i32, i32
  }
  func.func @transform_6(%arg0: i32, %arg1: i32) -> (i32, i32, i32) {
    %c0_i32 = arith.constant 0 : i32
    %c0_i32_0 = arith.constant 0 : i32
    %c0_i32_1 = arith.constant 0 : i32
    %c0_i32_2 = arith.constant 0 : i32
    return %c0_i32, %c0_i32_0, %c0_i32_1 : i32, i32, i32
  }
  func.func @transform_7(%arg0: i32, %arg1: i32) -> (i32, i32, i32) {
    %c0_i32 = arith.constant 0 : i32
    %c0_i32_0 = arith.constant 0 : i32
    %c0_i32_1 = arith.constant 0 : i32
    %c0_i32_2 = arith.constant 0 : i32
    return %c0_i32, %c0_i32_0, %c0_i32_1 : i32, i32, i32
  }
  func.func @transform_8(%arg0: i32, %arg1: i32) -> (i32, i32, i32) {
    %c0_i32 = arith.constant 0 : i32
    %c0_i32_0 = arith.constant 0 : i32
    %c0_i32_1 = arith.constant 0 : i32
    %c0_i32_2 = arith.constant 0 : i32
    return %c0_i32, %c0_i32_0, %c0_i32_1 : i32, i32, i32
  }
  func.func @transform_9(%arg0: i32, %arg1: i32) -> (i32, i32) {
    %c0_i32 = arith.constant 0 : i32
    %c0_i32_0 = arith.constant 0 : i32
    %c0_i32_1 = arith.constant 0 : i32
    return %c0_i32, %c0_i32_0 : i32, i32
  }
  func.func @transform_10(%arg0: i32, %arg1: i32) -> (i32, i32) {
    %c0_i32 = arith.constant 0 : i32
    %c0_i32_0 = arith.constant 0 : i32
    %c0_i32_1 = arith.constant 0 : i32
    return %c0_i32, %c0_i32_0 : i32, i32
  }
  func.func @transform_11(%arg0: i32, %arg1: i32) -> (i32, i32) {
    %c0_i32 = arith.constant 0 : i32
    %c0_i32_0 = arith.constant 0 : i32
    %c0_i32_1 = arith.constant 0 : i32
    return %c0_i32, %c0_i32_0 : i32, i32
  }
  func.func @transform_12(%arg0: i32, %arg1: i32) -> (i32, i32) {
    %c0_i32 = arith.constant 0 : i32
    %c0_i32_0 = arith.constant 0 : i32
    %c0_i32_1 = arith.constant 0 : i32
    return %c0_i32, %c0_i32_0 : i32, i32
  }
  func.func @transform_13(%arg0: i32, %arg1: i32) -> (i32, i32) {
    %c0_i32 = arith.constant 0 : i32
    %c0_i32_0 = arith.constant 0 : i32
    return %arg1, %c0_i32 : i32, i32
  }
}

</mosaic_0001>

<bundles_post_ra>
// kernel: tpu_custom_call.1
= control target key start
LH: loop header
LB: loop body
LE: loop exit
PB: predicated region body
PF: predicated region fallthrough
CT: control target
= control target key end

     0   :  { %s6044_s0 = inlined_call_operand.vmem [shape: f32[128,64], index: 0, kind: input, shape index: {}]   ;;  %s6045_s1 = inlined_call_operand.vmem [shape: bf16[128,128], index: 1, kind: input, shape index: {}]   ;;  %s6046_s2 = inlined_call_operand.hbm [shape: bf16[128,128], index: 2, kind: input, shape index: {}]   ;;  %s6047_s3 = inlined_call_operand.hbm [shape: bf16[128,128], index: 3, kind: input, shape index: {}]   ;;  %s6048_s4 = inlined_call_operand.vmem [shape: f32[3,64,256], index: 4, kind: input, shape index: {}]   ;;  %s6049_s5 = inlined_call_operand.vmem [shape: f32[3,4,1,64], index: 5, kind: input, shape index: {}]   ;;  %s6050_s6 = inlined_call_operand.vmem [shape: f32[3,64,4], index: 6, kind: input, shape index: {}]   ;;  %s6051_s7 = inlined_call_operand.hbm [shape: f32[3,2,4], index: 7, kind: input, shape index: {}]   ;;  %s6052_s8 = inlined_call_operand.hbm [shape: f32[3,1,64], index: 8, kind: input, shape index: {}]   ;;  %s6053_s9 = inlined_call_operand.vmem [shape: f32[64,32], index: 9, kind: input, shape index: {}]   ;;  %s6054_s10 = inlined_call_operand.vmem [shape: f32[1,32], index: 10, kind: input, shape index: {}]   ;;  %s6055_s11 = inlined_call_operand.vmem [shape: f32[32,128], index: 11, kind: input, shape index: {}]   ;;  %s6056_s12 = inlined_call_operand.vmem [shape: f32[1,128], index: 12, kind: input, shape index: {}]   ;;  %s6057_s13 = inlined_call_operand.hbm [shape: f32[128,128], index: 13, kind: output, shape index: {}]  }
   0x1   :  { %6079 = sst [smem:[#allocation37_spill]] %s6046_s2 }
   0x2   :  { %6080 = sst [smem:[#allocation38_spill]] %s6049_s5 }
   0x3   :  { %6081 = sst [smem:[#allocation39_spill]] %s6050_s6 }
   0x4   :  { %6082 = sst [smem:[#allocation40_spill]] %s6051_s7 }
   0x5   :  { %6083 = sst [smem:[#allocation41_spill]] %s6052_s8 }
   0x6   :  { %6084 = sst [smem:[#allocation42_spill]] %s6053_s9 }
   0x7   :  { %6085 = sst [smem:[#allocation43_spill]] %s6054_s10 }
   0x8   :  { %6086 = sst [smem:[#allocation44_spill]] %s6055_s11 }
   0x9   :  { %6087 = sst [smem:[#allocation45_spill]] %s6056_s12 }
   0xa   :  { %6088 = sst [smem:[#allocation46_spill]] %s6057_s13 }
   0xb   :  { %18 = vsyncpa [#allocation7], 0 }
   0xc   :  { %20 = vsyncpa [#allocation7 + $0x1], 0 }
   0xd   :  { %21 = vsyncpa [#allocation10], 0 }
   0xe   :  { %23 = vsyncpa [#allocation10 + $0x1], 0 }
   0xf   :  { %24 = vsyncpa [#allocation13], 0 }
  0x10   :  { %25 = vsyncpa [#allocation8], 0 }
  0x11   :  { %27 = vsyncpa [#allocation8 + $0x1], 0  ;;  %s4688_s25 = smov 0   ;;  %s4690_s26 = smov 0  }
  0x12   :  { %s4692_s27 = smov 0   ;;  %s4694_s28 = smov 0  }
  0x13   :  { %s4696_s29 = smov 0   ;;  %s4698_s30 = smov 0  }
  0x14   :  { %s4700_s14 = smov 0   ;;  %s4702_s15 = smov 0  }
  0x15 LB: > { %6089 = sst [smem:[#allocation20_spill]] %s4563_s25  ;;  %s4729_s16 = sadd.s32 4294967295, %s4591_s15   ;;  %s4591_s15 = sphi %s4702_s15, %s33_s15   ;;  %s4587_s14 = sphi %s4700_s14, %s6150_s14   ;;  %s4583_s30 = sphi %s4698_s30, %s6155_s30   ;;  %s4579_s29 = sphi %s4696_s29, %s6148_s29   ;;  %s4575_s28 = sphi %s4694_s28, %s6154_s28   ;;  %s4571_s27 = sphi %s4692_s27, %s6153_s27   ;;  %s4567_s26 = sphi %s4690_s26, %s6152_s26   ;;  %s4563_s25 = sphi %s4688_s25, %s6151_s25  }
  0x16   : > { %6090 = sst [smem:[#allocation21_spill]] %s4587_s14  ;;  %s3182_s17 = sadd.s32 4294967294, %s4591_s15  }
  0x17   : > { %p112_p0 = scmp.ne.s32.totalorder %s4567_s26, %s4563_s25  ;;  %p6062_p1 = scmp.eq.s32.totalorder %s4729_s16, 0 }
  0x18   : > { %p357_p3 = scmp.eq.s32.totalorder %s3182_s17, 5  ;;  %p3183_p5 = scmp.ge.s32.totalorder %s4591_s15, 1 }
  0x19   : > { %p4738_p4 = por %p6062_p1, %p112_p0  ;;  %p364_p7 = scmp.lt.s32.totalorder %s4591_s15, 7 }
  0x1a   : > { %p4743_p6 = por %p357_p3, %p112_p0  ;;  %s4593_s21 = smov [#allocation11]  }
  0x1b   : > { %s6091_s18 = scalar_select %p4738_p4, 1, 0 }
  0x1c   : > { %s6092_s19 = scalar_select %p4743_p6, 1, 0 }
  0x1d   : > { %p4748_p8 = pnand %p3183_p5, %p364_p7  ;;  %s388_s22 = sshll.u32 %s4593_s21, 4  ;;  %s389_s22 = int_to_ptr.vmem [resolvable:$true] %s388_s22 }
  0x1e   : > { %6093 = sst [smem:[#allocation22_spill]] %s6092_s19  ;;  %s4594_s24 = smov [#allocation12]  }
  0x1f   : > { %s6094_s20 = scalar_select %p4748_p8, 1, 0 }
  0x20   : > { %p4099_p9 = pneg %p4748_p8  ;;  %s401_s17 = sshll.u32 %s4594_s24, 4  ;;  %s4760_s17 = int_to_ptr.vmem [resolvable:$true] %s401_s17 }
  0x21   : > { %s6096_s7 = sld [smem:[#allocation40_spill]] }
  0x22   : > { %p4756_p10 = pnand %p4099_p9, %p6062_p1 }
  0x24   : > { %p4367_p12 = pneg %p4756_p10 }
  0x27   : > { %s4365_s13 = scalar_lea.hbm %s6096_s7, 96 }
  0x28   : > { %p4366_p11 = scmp.ne.s32.totalorder %s6096_s7, %s4365_s13  ;;  %p4372_p3 = scmp.lt.u32.totalorder %s4365_s13, %s6096_s7 }
  0x2a   : > { %p4368_p13 = pnand %p4367_p12, %p4366_p11 }
  0x2c   : > { %p4369_p0 = pneg %p4368_p13 }
  0x2e   : > { %p4374_p5 = pnand %p4372_p3, %p4369_p0 }
  0x30   : > { %4377 = shalt.err (!%p4374_p5)
}
  0x31   : > { %s4378_s24 = scalar_lea.vmem %s389_s22, 96  ;;  %p4386_p2 = scmp.lt.s32.totalorder %s389_s22, %s389_s22 }
  0x32   : > { %p4379_p7 = scmp.ne.s32.totalorder %s389_s22, %s4378_s24  ;;  %p4387_p6 = scmp.lt.s32.totalorder %s4378_s24, %s4378_s24 }
  0x34   : > { %p4381_p9 = pnand %p4379_p7, %p4367_p12  ;;  %p4388_p4 = por %p4387_p6, %p4386_p2 }
  0x36   : > { %p4382_p1 = pneg %p4381_p9 }
  0x38   : > { %p4389_p8 = pnand %p4388_p4, %p4382_p1 }
  0x3a   : > { %4392 = shalt.err (!%p4389_p8)
}
  0x3b   : > { %s4595_s12 = smov 32   ;;  %s4596_s25 = smov 2  }
  0x3c   : > { %4102 = dma.hbm_to_vmem [thread:$0]  (!%p4756_p10), %s6096_s7, 96, %s389_s22, [#allocation10], %s4595_s12, %s4595_s12, %s4596_s25  }
  0x3d   : > { %s6097_s8 = sld [smem:[#allocation41_spill]] }
  0x43   : > { %s4393_s21 = scalar_lea.hbm %s6097_s8, 48 }
  0x44   : > { %p4394_p11 = scmp.ne.s32.totalorder %s6097_s8, %s4393_s21  ;;  %p4400_p4 = scmp.lt.u32.totalorder %s4393_s21, %s6097_s8 }
  0x46   : > { %p4396_p1 = pnand %p4394_p11, %p4367_p12 }
  0x48   : > { %p4397_p2 = pneg %p4396_p1 }
  0x4a   : > { %p4402_p6 = pnand %p4400_p4, %p4397_p2 }
  0x4c   : > { %4405 = shalt.err (!%p4402_p6)
}
  0x4d   : > { %s4406_s22 = scalar_lea.vmem %s4760_s17, 48  ;;  %s4413_s6 = scalar_lea.vmem %s4760_s17, 64 }
  0x4e   : > { %p4407_p8 = scmp.ne.s32.totalorder %s4760_s17, %s4406_s22  ;;  %p4414_p3 = scmp.lt.s32.totalorder %s4760_s17, %s4760_s17 }
  0x4f   : > { %p4415_p5 = scmp.lt.s32.totalorder %s4413_s6, %s4406_s22 }
  0x50   : > { %p4409_p13 = pnand %p4407_p8, %p4367_p12 }
  0x51   : > { %p4416_p7 = por %p4415_p5, %p4414_p3 }
  0x52   : > { %p4410_p0 = pneg %p4409_p13 }
  0x54   : > { %p4417_p9 = pnand %p4416_p7, %p4410_p0 }
  0x56   : > { %4420 = shalt.err (!%p4417_p9)
}
  0x57   : > { %s4597_s5 = smov 16   ;;  %s4598_s9 = smov 1  }
  0x58   : > { %4105 = dma.hbm_to_vmem [thread:$0]  (!%p4756_p10), %s6097_s8, 48, %s4760_s17, [#allocation13], %s4597_s5, %s4597_s5, %s4598_s9  }
  0x59   : > { %s42_s10 = sadd.s32 1, %s4583_s30  ;;  %s45_s11 = sadd.s32 1, %s4587_s14 }
  0x5a   : > { %p43_p12 = scmp.ge.s32.totalorder %s42_s10, 2  ;;  %s99_s13 = sadd.s32 1, %s4571_s27 }
  0x5b   : > { %p106_p11 = scmp.ne.s32.totalorder %s4571_s27, %s4567_s26  ;;  %p107_p1 = scmp.eq.s32.totalorder %s4591_s15, 0 }
  0x5c   : > { %s6157_s10 = smov (%p43_p12, %s42_s10), 0  ;;  %s6159_s11 = smov (!%p43_p12, %s45_s11), %s4587_s14 }
  0x5d   : > { %6098 = sst [smem:[#allocation23_spill]] %s6157_s10  ;;  %s96_s19 = ssub.s32 %s4583_s30, %s6157_s10 }
  0x5e   : > { %p4821_p2 = por %p107_p1, %p106_p11  ;;  %p47_p10 = scmp.ge.s32.totalorder %s6159_s11, 3 }
  0x5f   : > { %p97_p4 = scmp.eq.s32.totalorder %s96_s19, 0  ;;  %p6100_p6 = scmp.eq.s32.totalorder %s4729_s16, 5 }
  0x60   : > { %p4119_p13 = scmp.lt.s32.totalorder %s4591_s15, 6  ;;  %s6161_s11 = smov (%p47_p10, %s6159_s11), 0 }
  0x61   : > { %p4827_p8 = por %p6100_p6, %p106_p11  ;;  %6102 = sst [smem:[#allocation24_spill]] %s6161_s11 }
  0x62   : > { %s4835_s21 = scalar_select %p97_p4, %s4571_s27, %s99_s13  }
  0x63   : > { %s436_s24 = sand.u32 1, %s4571_s27   ;;  %s6066_s22 = sshll.u32 %s4583_s30, 9 }
  0x64   : > { %s4839_s6 = sshll.u32 %s436_s24, 5  ;;  %s6103_s2 = sld [smem:[#allocation37_spill]] }
  0x65   : > { %s440_s25 = scalar_lea.vmem [#allocation6], %s4839_s6  ;;  %p4851_p0 = pnand %p4119_p13, %p4821_p2 }
  0x66   : > { %s447_s19 = sshll.u32 %s440_s25, 4  ;;  %s4857_s7 = scalar_lea.sflag [#allocation7], %s436_s24  ;;  %s4855_s19 = int_to_ptr.vmem [resolvable:$true] %s447_s19 }
  0x67   : > { %p4423_p5 = pneg %p4851_p0 }
  0x6a   : > { %s4846_s12 = scalar_lea.hbm %s6103_s2, %s6066_s22  ;;  %s4426_s25 = scalar_lea.hbm %s6103_s2, 1024 }
  0x6b   : > { %s4421_s5 = scalar_lea.hbm %s4846_s12, 512  ;;  %p4427_p12 = scmp.lt.u32.totalorder %s4846_s12, %s6103_s2 }
  0x6c   : > { %p4422_p3 = scmp.ne.s32.totalorder %s4846_s12, %s4421_s5  ;;  %p4428_p11 = scmp.lt.u32.totalorder %s4426_s25, %s4421_s5 }
  0x6d   : > { %p4430_p2 = scmp.lt.u32.totalorder %s4421_s5, %s4846_s12 }
  0x6e   : > { %p4424_p7 = pnand %p4423_p5, %p4422_p3  ;;  %p4429_p1 = por %p4428_p11, %p4427_p12 }
  0x70   : > { %p4425_p9 = pneg %p4424_p7  ;;  %p4431_p10 = por %p4430_p2, %p4429_p1 }
  0x72   : > { %p4432_p4 = pnand %p4431_p10, %p4425_p9 }
  0x74   : > { %4435 = shalt.err (!%p4432_p4)
}
  0x75   : > { %s4436_s24 = scalar_lea.vmem %s4855_s19, 512  ;;  %s4599_s9 = smov [#allocation6]  }
  0x76   : > { %p4437_p6 = scmp.ne.s32.totalorder %s4855_s19, %s4436_s24  ;;  %s4441_s23 = sshll.u32 %s4599_s9, 4  ;;  %s4442_s23 = int_to_ptr.vmem [resolvable:$false] %s4441_s23 }
  0x77   : > { %s4443_s8 = scalar_lea.vmem %s4442_s23, 1024  ;;  %p4444_p7 = scmp.lt.s32.totalorder %s4855_s19, %s4442_s23 }
  0x78   : > { %p4439_p13 = pnand %p4437_p6, %p4423_p5  ;;  %p4445_p12 = scmp.lt.s32.totalorder %s4443_s8, %s4436_s24 }
  0x7a   : > { %p4440_p3 = pneg %p4439_p13  ;;  %p4446_p11 = por %p4445_p12, %p4444_p7 }
  0x7c   : > { %p4447_p1 = pnand %p4446_p11, %p4440_p3 }
  0x7e   : > { %4450 = shalt.err (!%p4447_p1)
}
  0x7f   : > { %s4600_s22 = smov 64   ;;  %s4601_s5 = smov 4  }
  0x80   : > { %4109 = dma.hbm_to_vmem [thread:$0]  (!%p4851_p0), %s4846_s12, 512, %s4855_s19, %s4857_s7, %s4600_s22, %s4600_s22, %s4601_s5  }
  0x81   : > { %s6105_s25 = sshll.u32 %s4583_s30, 9  ;;  %s461_s8 = scalar_lea.vmem [#allocation9], %s4839_s6 }
  0x82   : > { %s4893_s23 = scalar_lea.hbm %s6047_s3, %s6105_s25  ;;  %s468_s2 = sshll.u32 %s461_s8, 4  ;;  %s4897_s2 = int_to_ptr.vmem [resolvable:$true] %s468_s2 }
  0x83   : > { %s457_s11 = sand.u32 1, %s4591_s15   ;;  %s4451_s14 = scalar_lea.hbm %s4893_s23, 512 }
  0x84   : > { %s4899_s10 = scalar_lea.sflag [#allocation10], %s457_s11  ;;  %p4452_p9 = scmp.ne.s32.totalorder %s4893_s23, %s4451_s14 }
  0x85   : > { %s4456_s19 = scalar_lea.hbm %s6047_s3, 1024  ;;  %p4457_p4 = scmp.lt.u32.totalorder %s4893_s23, %s6047_s3 }
  0x86   : > { %p4454_p2 = pnand %p4452_p9, %p4423_p5  ;;  %p4458_p6 = scmp.lt.u32.totalorder %s4456_s19, %s4451_s14 }
  0x87   : > { %p4460_p3 = scmp.lt.u32.totalorder %s4451_s14, %s4893_s23 }
  0x88   : > { %p4455_p10 = pneg %p4454_p2  ;;  %p4459_p13 = por %p4458_p6, %p4457_p4 }
  0x8a   : > { %p4461_p7 = por %p4460_p3, %p4459_p13 }
  0x8c   : > { %p4462_p12 = pnand %p4461_p7, %p4455_p10 }
  0x8e   : > { %4465 = shalt.err (!%p4462_p12)
}
  0x8f   : > { %s4466_s11 = scalar_lea.vmem %s4897_s2, 512  ;;  %s4602_s6 = smov [#allocation9]  }
  0x90   : > { %p4467_p11 = scmp.ne.s32.totalorder %s4897_s2, %s4466_s11  ;;  %s4471_s9 = sshll.u32 %s4602_s6, 4  ;;  %s4472_s9 = int_to_ptr.vmem [resolvable:$false] %s4471_s9 }
  0x91   : > { %s4473_s8 = scalar_lea.vmem %s4472_s9, 1024  ;;  %p4474_p2 = scmp.lt.s32.totalorder %s4897_s2, %s4472_s9 }
  0x92   : > { %p4469_p1 = pnand %p4467_p11, %p4423_p5  ;;  %p4475_p4 = scmp.lt.s32.totalorder %s4473_s8, %s4466_s11 }
  0x94   : > { %p4470_p9 = pneg %p4469_p1  ;;  %p4476_p6 = por %p4475_p4, %p4474_p2 }
  0x96   : > { %p4477_p13 = pnand %p4476_p6, %p4470_p9 }
  0x98   : > { %4480 = shalt.err (!%p4477_p13)
}
  0x99   : > { %4112 = dma.hbm_to_vmem [thread:$0]  (!%p4851_p0), %s4893_s23, 512, %s4897_s2, %s4899_s10, %s4600_s22, %s4600_s22, %s4601_s5  }
  0x9a   : > { %p6106_p5 = scmp.ne.s32.totalorder %s6094_s20, 0 }
  0x9c   : > { %480 = sbr.rel (%p6106_p5) target bundleno = 2493 (0x9bd), region = 72 }
  0xa3   : > { %s4931_s14 = sand.u32 1, %s4567_s26   ;;  %p6107_p10 = scmp.ne.s32.totalorder %s6091_s18, 0 }
  0xa4   : > { %s3194_s7 = sshll.u32 %s4931_s14, 5  ;;  %s483_s12 = scalar_lea.sflag [#allocation7], %s4931_s14 }
  0xa5   : > { %s4935_s19 = scalar_lea.vmem [#allocation6], %s3194_s7 }
  0xa6   : > { %4542 = dma.done.wait (%p6107_p10), %s483_s12, 512  }
  0xa7   : > { %4544 = vsyncadd (%p6107_p10), %s483_s12, 4294966784  ;;  %s491_s2 = sand.u32 1, %s4729_s16   ;;  %s4942_s10 = scalar_lea.vmem [#allocation9], %s3194_s7 }
  0xa8   : > { %s492_s20 = scalar_lea.sflag [#allocation10], %s491_s2 }
  0xa9   : > { %4546 = dma.done.wait (%p6107_p10), %s492_s20, 512  }
  0xaa   : > { %4548 = vsyncadd (%p6107_p10), %s492_s20, 4294966784  ;;  %p6108_p0 = scmp.eq.s32.totalorder %s4729_s16, 0 }
  0xac   : > { %4550 = dma.done.wait (%p6108_p0), [#allocation10], 96   ;;  %p6109_p3 = pmov %p6108_p0 }
  0xad   : > { %p6110_p7 = pmov %p6108_p0 }
  0xae   : > { %4552 = vsyncadd (%p6109_p3), [#allocation10], 4294967200 }
  0xaf   : > { %4554 = dma.done.wait (%p6110_p7), [#allocation13], 48   ;;  %p6111_p12 = pmov %p6108_p0 }
  0xb0   : > { %s3198_s13 = sshll.u32 %s4931_s14, 6  ;;  %s3199_s18 = sshll.u32 %s4575_s28, 3 }
  0xb1   : > { %4556 = vsyncadd (%p6111_p12), [#allocation13], 4294967248  ;;  %p557_p11 = scmp.lt.s32.totalorder %s3199_s18, 15  ;;  %s3201_s22 = sshll.u32 %s4575_s28, 6 }
  0xb2   : > { %p567_p1 = scmp.eq.s32.totalorder %s4579_s29, 0  ;;  %p568_p9 = scmp.eq.s32.totalorder %s4575_s28, 0 }
  0xb3   : > { %s6163_s18 = smov (!%p557_p11, %s3199_s18), 15  ;;  %s4966_s16 = scalar_lea.vmem [#allocation14], %s3198_s13 }
  0xb4   : > { %s3200_s5 = sshll.u32 %s6163_s18, 2  ;;  %p569_p2 = pnand %p568_p9, %p567_p1 }
  0xb5   : > { %s4964_s24 = scalar_lea.vmem %s6045_s1, %s3200_s5  ;;  %v573_v0 = vld [vmem:[%s6044_s0] sm:$0xff] (!%p569_p2)  ;;  %vm589_vm0 = vcmask (!%p569_p2), 523264   ;;  %v574_v1 = vld [vmem:[%s6044_s0 + $0x8] sm:$0xff] (!%p569_p2)  ;;  %v575_v2 = vld [vmem:[%s6044_s0 + $0x10] sm:$0xff] (!%p569_p2) }
  0xb6   : > { %572 = sbr.rel (%p569_p2) target bundleno = 190 (0xbe), region = 92  ;;  %590 = vst.msk [vmem:[#allocation2] sm:$0xff] (!%p569_p2), %vm589_vm0, %v573_v0  ;;  %591 = vst.msk [vmem:[#allocation2 + $0x8] sm:$0xff] (!%p569_p2), %vm589_vm0, %v574_v1  ;;  %v576_v3 = vld [vmem:[%s6044_s0 + $0x18] sm:$0xff] (!%p569_p2)  ;;  %v577_v4 = vld [vmem:[%s6044_s0 + $0x20] sm:$0xff] (!%p569_p2) }
  0xb7   : > { %592 = vst.msk [vmem:[#allocation2 + $0x10] sm:$0xff] (!%p569_p2), %vm589_vm0, %v575_v2  ;;  %v578_v5 = vld [vmem:[%s6044_s0 + $0x28] sm:$0xff] (!%p569_p2)  ;;  %593 = vst.msk [vmem:[#allocation2 + $0x18] sm:$0xff] (!%p569_p2), %vm589_vm0, %v576_v3  ;;  %v579_v6 = vld [vmem:[%s6044_s0 + $0x30] sm:$0xff] (!%p569_p2) }
  0xb8   : > { %594 = vst.msk [vmem:[#allocation2 + $0x20] sm:$0xff] (!%p569_p2), %vm589_vm0, %v577_v4  ;;  %595 = vst.msk [vmem:[#allocation2 + $0x28] sm:$0xff] (!%p569_p2), %vm589_vm0, %v578_v5  ;;  %v580_v7 = vld [vmem:[%s6044_s0 + $0x38] sm:$0xff] (!%p569_p2)  ;;  %v581_v8 = vld [vmem:[%s6044_s0 + $0x40] sm:$0xff] (!%p569_p2) }
  0xb9   : > { %596 = vst.msk [vmem:[#allocation2 + $0x30] sm:$0xff] (!%p569_p2), %vm589_vm0, %v579_v6  ;;  %597 = vst.msk [vmem:[#allocation2 + $0x38] sm:$0xff] (!%p569_p2), %vm589_vm0, %v580_v7  ;;  %v582_v9 = vld [vmem:[%s6044_s0 + $0x48] sm:$0xff] (!%p569_p2)  ;;  %v583_v10 = vld [vmem:[%s6044_s0 + $0x50] sm:$0xff] (!%p569_p2) }
  0xba   : > { %598 = vst.msk [vmem:[#allocation2 + $0x40] sm:$0xff] (!%p569_p2), %vm589_vm0, %v581_v8  ;;  %v584_v11 = vld [vmem:[%s6044_s0 + $0x58] sm:$0xff] (!%p569_p2)  ;;  %599 = vst.msk [vmem:[#allocation2 + $0x48] sm:$0xff] (!%p569_p2), %vm589_vm0, %v582_v9  ;;  %v585_v12 = vld [vmem:[%s6044_s0 + $0x60] sm:$0xff] (!%p569_p2) }
  0xbb   : > { %600 = vst.msk [vmem:[#allocation2 + $0x50] sm:$0xff] (!%p569_p2), %vm589_vm0, %v583_v10  ;;  %601 = vst.msk [vmem:[#allocation2 + $0x58] sm:$0xff] (!%p569_p2), %vm589_vm0, %v584_v11  ;;  %v586_v13 = vld [vmem:[%s6044_s0 + $0x68] sm:$0xff] (!%p569_p2)  ;;  %v587_v14 = vld [vmem:[%s6044_s0 + $0x70] sm:$0xff] (!%p569_p2) }
  0xbc   : > { %602 = vst.msk [vmem:[#allocation2 + $0x60] sm:$0xff] (!%p569_p2), %vm589_vm0, %v585_v12  ;;  %603 = vst.msk [vmem:[#allocation2 + $0x68] sm:$0xff] (!%p569_p2), %vm589_vm0, %v586_v13  ;;  %v588_v15 = vld [vmem:[%s6044_s0 + $0x78] sm:$0xff] (!%p569_p2) }
  0xbd   : > { %604 = vst.msk [vmem:[#allocation2 + $0x70] sm:$0xff] %vm589_vm0, %v587_v14  ;;  %605 = vst.msk [vmem:[#allocation2 + $0x78] sm:$0xff] %vm589_vm0, %v588_v15 }
  0xbe PF: > { %p3202_p4 = scmp.ne.s32.totalorder %s4575_s28, 0 }
  0xbf   : > { %s3338_s2 = sshll.u32 (!%p3202_p4), %s4579_s29, 7  ;;  %v4603_v16 = vmov (!%p3202_p4), 0.0   ;;  %v4604_v20 = vmov (!%p3202_p4), 0.0|0.0   ;;  %vm4605_vm1 = vmmov (!%p3202_p4), 0   ;;  %v609_v32 = vld [vmem:[#allocation2] sm:$0xff] (!%p3202_p4)  ;;  %v610_v33 = vld [vmem:[#allocation2 + $0x8] sm:$0xff] (!%p3202_p4) }
  0xc0   : > { %608 = sbr.rel (%p3202_p4) target bundleno = 606 (0x25e), region = 96  ;;  %s5037_s18 = scalar_lea.vmem (!%p3202_p4), %s6048_s4, %s3338_s2  ;;  %757 = vmatprep.mubr.f32.mxu0 (!%p3202_p4), %v4603_v16  ;;  %3885 = vmatprep.subr.bf16.mxu1 (!%p3202_p4), %v4604_v20  ;;  %v5055_v37 = vpack.c.bf16 (!%p3202_p4), %v610_v33, %v609_v32  ;;  %vm644_vm2 = vcmask (!%p3202_p4), 523264   ;;  %v611_v46 = vld [vmem:[#allocation2 + $0x10] sm:$0xff] (!%p3202_p4)  ;;  %v612_v47 = vld [vmem:[#allocation2 + $0x18] sm:$0xff] (!%p3202_p4)  ;;  %v613_v49 = vld [vmem:[#allocation2 + $0x20] sm:$0xff] (!%p3202_p4) }
  0xc1   : > { %v629_v17 = vld [vmem:[%s5037_s18 + $0x8] sm:$0xff] (!%p3202_p4)  ;;  %v631_v18 = vld [vmem:[%s5037_s18 + $0x18] sm:$0xff] (!%p3202_p4)  ;;  %v628_v19 = vld [vmem:[%s5037_s18] sm:$0xff] (!%p3202_p4)  ;;  %3589 = vmatprep.mubr.msk.f32.mxu1 (!%p3202_p4), %vm4605_vm1, %v4603_v16  ;;  %v5071_v48 = vpack.c.bf16 (!%p3202_p4), %v612_v47, %v611_v46  ;;  %s3221_s5 = sshll.u32 (!%p3202_p4), %s4579_s29, 2  ;;  %s6114_s11 = sld [smem:[#allocation38_spill]] (!%p3202_p4) }
  0xc2   : > { %v3869_v21 = vpack.c.bf16 (!%p3202_p4), %v631_v18, %v629_v17  ;;  %v630_v22 = vld [vmem:[%s5037_s18 + $0x10] sm:$0xff] (!%p3202_p4)  ;;  %v633_v23 = vld [vmem:[%s5037_s18 + $0x28] sm:$0xff] (!%p3202_p4)  ;;  %v635_v24 = vld [vmem:[%s5037_s18 + $0x38] sm:$0xff] (!%p3202_p4)  ;;  %s4606_s9 = smov (!%p3202_p4), 64  }
  0xc3   : > { %v3871_v25 = vpack.c.bf16 (!%p3202_p4), %v630_v22, %v628_v19  ;;  %v3873_v26 = vpack.c.bf16 (!%p3202_p4), %v635_v24, %v633_v23  ;;  %v632_v27 = vld [vmem:[%s5037_s18 + $0x20] sm:$0xff] (!%p3202_p4)  ;;  %v634_v28 = vld [vmem:[%s5037_s18 + $0x30] sm:$0xff] (!%p3202_p4)  ;;  %v637_v29 = vld [vmem:[%s5037_s18 + $0x48] sm:$0xff] (!%p3202_p4) }
  0xc4   : > { %3870 = vmatprep.subr.bf16.mxu0 (!%p3202_p4), %v3869_v21  ;;  %v639_v30 = vld [vmem:[%s5037_s18 + $0x58] sm:$0xff] (!%p3202_p4)  ;;  %v3875_v31 = vpack.c.bf16 (!%p3202_p4), %v634_v28, %v632_v27  ;;  %v636_v35 = vld [vmem:[%s5037_s18 + $0x40] sm:$0xff] (!%p3202_p4)  ;;  %v638_v36 = vld [vmem:[%s5037_s18 + $0x50] sm:$0xff] (!%p3202_p4) }
  0xc5   : > { %3872 = vmatpush1.bf16.msra.mxu0 (!%p3202_p4), %v3871_v25  ;;  %v3877_v34 = vpack.c.bf16 (!%p3202_p4), %v639_v30, %v637_v29  ;;  %v641_v38 = vld [vmem:[%s5037_s18 + $0x68] sm:$0xff] (!%p3202_p4)  ;;  %v643_v39 = vld [vmem:[%s5037_s18 + $0x78] sm:$0xff] (!%p3202_p4)  ;;  %v3879_v40 = vpack.c.bf16 (!%p3202_p4), %v638_v36, %v636_v35  ;;  %vm5061_vm3 = vmpackc.low (!%p3202_p4), %vm644_vm2, %vm644_vm2 }
  0xc6   : > { %3874 = vmatprep.subr.bf16.mxu0 (!%p3202_p4), %v3873_v26  ;;  %v3881_v42 = vpack.c.bf16 (!%p3202_p4), %v643_v39, %v641_v38  ;;  %v640_v43 = vld [vmem:[%s5037_s18 + $0x60] sm:$0xff] (!%p3202_p4)  ;;  %v642_v44 = vld [vmem:[%s5037_s18 + $0x70] sm:$0xff] (!%p3202_p4)  ;;  %3888 = vmatpush3.bf16.xpose.msk.msra.mxu1 (!%p3202_p4), %vm5061_vm3, %v5055_v37  ;;  %v614_v50 = vld [vmem:[#allocation2 + $0x28] sm:$0xff] (!%p3202_p4) }
  0xc7   : > { %3889 = vmatprep.subr.bf16.mxu1 %v4604_v20  ;;  %v3883_v45 = vpack.c.bf16 %v642_v44, %v640_v43  ;;  %v5080_v51 = vpack.c.bf16 %v614_v50, %v613_v49  ;;  %v615_v52 = vld [vmem:[#allocation2 + $0x30] sm:$0xff]  ;;  %v616_v53 = vld [vmem:[#allocation2 + $0x38] sm:$0xff]  ;;  %v617_v55 = vld [vmem:[#allocation2 + $0x40] sm:$0xff]  ;;  %s5163_s6 = scalar_lea.vmem %s6114_s11, %s3221_s5 }
  0xc8   : > { %v5094_v54 = vpack.c.bf16 %v616_v53, %v615_v52  ;;  %v618_v56 = vld [vmem:[#allocation2 + $0x48] sm:$0xff]  ;;  %v619_v58 = vld [vmem:[#allocation2 + $0x50] sm:$0xff]  ;;  %v620_v59 = vld [vmem:[#allocation2 + $0x58] sm:$0xff] }
  0xc9   : > { %3876 = vmatpush1.bf16.msra.mxu0 %v3875_v31  ;;  %v5108_v57 = vpack.c.bf16 %v618_v56, %v617_v55  ;;  %v5122_v60 = vpack.c.bf16 %v620_v59, %v619_v58  ;;  %v621_v61 = vld [vmem:[#allocation2 + $0x60] sm:$0xff]  ;;  %v622_v62 = vld [vmem:[#allocation2 + $0x68] sm:$0xff]  ;;  %v623_v0 = vld [vmem:[#allocation2 + $0x70] sm:$0xff] }
  0xca   : > { %3878 = vmatprep.subr.bf16.mxu0 %v3877_v34  ;;  %v5136_v63 = vpack.c.bf16 %v622_v62, %v621_v61  ;;  %v624_v1 = vld [vmem:[#allocation2 + $0x78] sm:$0xff]  ;;  %v872_v3 = vld [vmem:[%s5163_s6] sm:$0x1]  ;;  %v3240_v4 = vld [vmem:[%s5163_s6 + $0x1] sm:$0x1] }
  0xcb   : > { %v3914_v2 = vpack.c.bf16 %v624_v1, %v623_v0  ;;  %v3259_v5 = vld [vmem:[%s5163_s6 + $0x2] sm:$0x1]  ;;  %v3278_v6 = vld [vmem:[%s5163_s6 + $0x3] sm:$0x1] }
  0xcd   : > { %3880 = vmatpush1.bf16.msra.mxu0 %v3879_v40 }
  0xce   : > { %3882 = vmatprep.subr.bf16.mxu0 %v3881_v42  ;;  %3892 = vmatpush3.bf16.xpose.msk.msra.mxu1 %vm5061_vm3, %v5071_v48 }
  0xcf   : > { %3893 = vmatprep.subr.bf16.mxu1 %v4604_v20 }
  0xd1   : > { %3884 = vmatpush1.bf16.msra.mxu0 %v3883_v45 }
  0xd2   : > { %3917 = vmatprep.subr.bf16.mxu0 %v4604_v20 }
  0xd4   : > { %3205 = vmatmul.mubr.msk.f32.vlgmr.msra.gmra.mrb[0].mxu0 %vm644_vm2, %v609_v32 }
  0xd5   : > { %763 = vmatprep.mubr.f32.mxu0 %v4603_v16 }
  0xd6   : > { %3896 = vmatpush3.bf16.xpose.msk.msra.mxu1 %vm5061_vm3, %v5080_v51 }
  0xd7   : > { %3897 = vmatprep.subr.bf16.mxu1 %v4604_v20 }
  0xd8   : > { %3206 = vmatmul.mubr.msk.f32.gmra.mrb[2].mxu0 %vm644_vm2, %v610_v33 }
  0xd9   : > { %769 = vmatprep.mubr.f32.mxu0 %v4603_v16 }
  0xda   : > { %3920 = vmatpush3.bf16.xpose.msk.msra.mxu0 %vm5061_vm3, %v5055_v37 }
  0xdb   : > { %3921 = vmatprep.subr.bf16.mxu0 %v4604_v20 }
  0xdc   : > { %3207 = vmatmul.mubr.msk.f32.gmra.mrb[4].mxu0 %vm644_vm2, %v611_v46 }
  0xdd   : > { %775 = vmatprep.mubr.f32.mxu0 %v4603_v16 }
  0xde   : > { %3900 = vmatpush3.bf16.xpose.msk.msra.mxu1 %vm5061_vm3, %v5094_v54 }
  0xdf   : > { %3901 = vmatprep.subr.bf16.mxu1 %v4604_v20 }
  0xe0   : > { %3208 = vmatmul.mubr.msk.f32.gmra.mrb[6].mxu0 %vm644_vm2, %v612_v47 }
  0xe1   : > { %781 = vmatprep.mubr.f32.mxu0 %v4603_v16 }
  0xe2   : > { %3924 = vmatpush3.bf16.xpose.msk.msra.mxu0 %vm5061_vm3, %v5071_v48 }
  0xe3   : > { %3925 = vmatprep.subr.bf16.mxu0 %v4604_v20 }
  0xe4   : > { %3209 = vmatmul.mubr.msk.f32.gmra.mrb[8].mxu0 %vm644_vm2, %v613_v49 }
  0xe5   : > { %787 = vmatprep.mubr.f32.mxu0 %v4603_v16 }
  0xe6   : > { %3904 = vmatpush3.bf16.xpose.msk.msra.mxu1 %vm5061_vm3, %v5108_v57 }
  0xe7   : > { %3905 = vmatprep.subr.bf16.mxu1 %v4604_v20 }
  0xe8   : > { %3210 = vmatmul.mubr.msk.f32.gmra.mrb[10].mxu0 %vm644_vm2, %v614_v50 }
  0xe9   : > { %793 = vmatprep.mubr.f32.mxu0 %v4603_v16 }
  0xea   : > { %3928 = vmatpush3.bf16.xpose.msk.msra.mxu0 %vm5061_vm3, %v5080_v51 }
  0xeb   : > { %3929 = vmatprep.subr.bf16.mxu0 %v4604_v20 }
  0xec   : > { %3211 = vmatmul.mubr.msk.f32.gmra.mrb[12].mxu0 %vm644_vm2, %v615_v52 }
  0xed   : > { %799 = vmatprep.mubr.f32.mxu0 %v4603_v16 }
  0xee   : > { %3908 = vmatpush3.bf16.xpose.msk.msra.mxu1 %vm5061_vm3, %v5122_v60 }
  0xef   : > { %3909 = vmatprep.subr.bf16.mxu1 %v4604_v20 }
  0xf0   : > { %3212 = vmatmul.mubr.msk.f32.gmra.mrb[14].mxu0 %vm644_vm2, %v616_v53 }
  0xf1   : > { %805 = vmatprep.mubr.f32.mxu0 %v4603_v16 }
  0xf2   : > { %3932 = vmatpush3.bf16.xpose.msk.msra.mxu0 %vm5061_vm3, %v5094_v54 }
  0xf3   : > { %3933 = vmatprep.subr.bf16.mxu0 %v4604_v20 }
  0xf4   : > { %3213 = vmatmul.mubr.msk.f32.gmra.mrb[16].mxu0 %vm644_vm2, %v617_v55 }
  0xf5   : > { %811 = vmatprep.mubr.f32.mxu0 %v4603_v16 }
  0xf6   : > { %3912 = vmatpush3.bf16.xpose.msk.msra.mxu1 %vm5061_vm3, %v5136_v63 }
  0xf7   : > { %3913 = vmatprep.subr.bf16.mxu1 %v4604_v20 }
  0xf8   : > { %3214 = vmatmul.mubr.msk.f32.gmra.mrb[18].mxu0 %vm644_vm2, %v618_v56 }
  0xf9   : > { %817 = vmatprep.mubr.f32.mxu0 %v4603_v16 }
  0xfa   : > { %3936 = vmatpush3.bf16.xpose.msk.msra.mxu0 %vm5061_vm3, %v5108_v57 }
  0xfb   : > { %3937 = vmatprep.subr.bf16.mxu0 %v4604_v20 }
  0xfc   : > { %3215 = vmatmul.mubr.msk.f32.gmra.mrb[20].mxu0 %vm644_vm2, %v619_v58 }
  0xfd   : > { %823 = vmatprep.mubr.f32.mxu0 %v4603_v16 }
  0xfe   : > { %3916 = vmatpush3.bf16.xpose.msk.msra.mxu1 %vm5061_vm3, %v3914_v2 }
  0xff   : > { %3949 = vmatprep.subr.bf16.mxu1 %v4604_v20 }
 0x100   : > { %3216 = vmatmul.mubr.msk.f32.gmra.mrb[22].mxu0 %vm644_vm2, %v620_v59 }
 0x101   : > { %829 = vmatprep.mubr.f32.mxu0 %v4603_v16 }
 0x102   : > { %3940 = vmatpush3.bf16.xpose.msk.msra.mxu0 %vm5061_vm3, %v5122_v60 }
 0x103   : > { %3941 = vmatprep.subr.bf16.mxu0 %v4604_v20 }
 0x104   : > { %3217 = vmatmul.mubr.msk.f32.gmra.mrb[24].mxu0 %vm644_vm2, %v621_v61 }
 0x105   : > { %835 = vmatprep.mubr.f32.mxu0 %v4603_v16  ;;  %3590 = vmatmul.mubr.msk.f32.vlgmr.msra.gmra.mrb[0].mxu1 %vm644_vm2, %v872_v3 }
 0x106   : > { %3952 = vmatpush3.bf16.xpose.msk.msra.mxu1 %vm5061_vm3, %v5055_v37  ;;  %3659 = vmatprep.mubr.msk.f32.mxu1 %vm4605_vm1, %v4603_v16 }
 0x107   : > { %3953 = vmatprep.subr.bf16.mxu1 %v4604_v20 }
 0x108   : > { %3218 = vmatmul.mubr.msk.f32.gmra.mrb[26].mxu0 %vm644_vm2, %v622_v62 }
 0x109   : > { %841 = vmatprep.mubr.f32.mxu0 %v4603_v16 }
 0x10a   : > { %3944 = vmatpush3.bf16.xpose.msk.msra.mxu0 %vm5061_vm3, %v5136_v63 }
 0x10b   : > { %3945 = vmatprep.subr.bf16.mxu0 %v4604_v20 }
 0x10c   : > { %3219 = vmatmul.mubr.msk.f32.gmra.mrb[28].mxu0 %vm644_vm2, %v623_v0 }
 0x10d   : > { %847 = vmatprep.mubr.f32.mxu0 %v4603_v16 }
 0x10e   : > { %3956 = vmatpush3.bf16.xpose.msk.msra.mxu1 %vm5061_vm3, %v5071_v48 }
 0x10f   : > { %3957 = vmatprep.subr.bf16.mxu1 %v4604_v20 }
 0x110   : > { %3220 = vmatmul.mubr.msk.f32.gmra.mrb[30].mxu0 %vm644_vm2, %v624_v1 }
 0x111   : > { %3624 = vmatprep.mubr.msk.f32.mxu0 %vm4605_vm1, %v4603_v16 }
 0x112   : > { %3948 = vmatpush3.bf16.xpose.msk.msra.mxu0 %vm5061_vm3, %v3914_v2 }
 0x113   : > { %3981 = vmatprep.subr.bf16.mxu0 %v4604_v20 }
 0x116   : > { %3960 = vmatpush3.bf16.xpose.msk.msra.mxu1 %vm5061_vm3, %v5080_v51 }
 0x117   : > { %3961 = vmatprep.subr.bf16.mxu1 %v4604_v20 }
 0x119   : > { %3625 = vmatmul.mubr.msk.f32.vlgmr.msra.gmra.mrb[32].mxu0 %vm644_vm2, %v3240_v4 }
 0x11a   : > { %3984 = vmatpush3.bf16.xpose.msk.msra.mxu0 %vm5061_vm3, %v5055_v37  ;;  %3694 = vmatprep.mubr.msk.f32.mxu0 %vm4605_vm1, %v4603_v16 }
 0x11b   : > { %3985 = vmatprep.subr.bf16.mxu0 %v4604_v20 }
 0x11e   : > { %3964 = vmatpush3.bf16.xpose.msk.msra.mxu1 %vm5061_vm3, %v5094_v54 }
 0x11f   : > { %3965 = vmatprep.subr.bf16.mxu1 %v4604_v20 }
 0x122   : > { %3988 = vmatpush3.bf16.xpose.msk.msra.mxu0 %vm5061_vm3, %v5071_v48 }
 0x123   : > { %3989 = vmatprep.subr.bf16.mxu0 %v4604_v20 }
 0x126   : > { %3968 = vmatpush3.bf16.xpose.msk.msra.mxu1 %vm5061_vm3, %v5108_v57 }
 0x127   : > { %3969 = vmatprep.subr.bf16.mxu1 %v4604_v20 }
 0x12a   : > { %3992 = vmatpush3.bf16.xpose.msk.msra.mxu0 %vm5061_vm3, %v5080_v51 }
 0x12b   : > { %3993 = vmatprep.subr.bf16.mxu0 %v4604_v20 }
 0x12e   : > { %3972 = vmatpush3.bf16.xpose.msk.msra.mxu1 %vm5061_vm3, %v5122_v60 }
 0x12f   : > { %3973 = vmatprep.subr.bf16.mxu1 %v4604_v20 }
 0x132   : > { %3996 = vmatpush3.bf16.xpose.msk.msra.mxu0 %vm5061_vm3, %v5094_v54 }
 0x133   : > { %3997 = vmatprep.subr.bf16.mxu0 %v4604_v20 }
 0x136   : > { %3976 = vmatpush3.bf16.xpose.msk.msra.mxu1 %vm5061_vm3, %v5136_v63 }
 0x137   : > { %3977 = vmatprep.subr.bf16.mxu1 %v4604_v20 }
 0x13a   : > { %4000 = vmatpush3.bf16.xpose.msk.msra.mxu0 %vm5061_vm3, %v5108_v57 }
 0x13b   : > { %4001 = vmatprep.subr.bf16.mxu0 %v4604_v20 }
 0x13e   : > { %3980 = vmatpush3.bf16.xpose.msk.msra.mxu1 %vm5061_vm3, %v3914_v2 }
 0x142   : > { %4004 = vmatpush3.bf16.xpose.msk.msra.mxu0 %vm5061_vm3, %v5122_v60 }
 0x143   : > { %4005 = vmatprep.subr.bf16.mxu0 %v4604_v20 }
 0x145   : > { %3660 = vmatmul.mubr.msk.f32.vlgmr.msra.gmra.mrb[2].mxu1 %vm644_vm2, %v3259_v5 }
 0x14a   : > { %4008 = vmatpush3.bf16.xpose.msk.msra.mxu0 %vm5061_vm3, %v5136_v63 }
 0x14b   : > { %4009 = vmatprep.subr.bf16.mxu0 %v4604_v20 }
 0x152   : > { %4012 = vmatpush3.bf16.xpose.msk.msra.mxu0 %vm5061_vm3, %v3914_v2 }
 0x159   : > { %3695 = vmatmul.mubr.msk.f32.vlgmr.msra.gmra.mrb[34].mxu0 %vm644_vm2, %v3278_v6 }
 0x1a7   : > { %v759_v7 = vpop.f32.mrb[0].mxu0 }
 0x1a8   : > { %v761_v8 = vpop.f32.mrb[1].mxu0 }
 0x1ab   : > { %v765_v9 = vpop.f32.mrb[2].mxu0 }
 0x1ac   : > { %v854_v10 = vpack.c.bf16 %v765_v9, %v759_v7  ;;  %v767_v11 = vpop.f32.mrb[3].mxu0 }
 0x1ad   : > { %v1066_v12 = vpack.c.bf16 %v767_v11, %v761_v8 }
 0x1ae   : > { %862 = vst.msk [vmem:[#allocation3] sm:$0xff] %vm644_vm2, %v854_v10  ;;  %955 = vrot.lane.b32.xlu0 %v854_v10, %s4606_s9 }
 0x1af   : > { %1075 = vst.msk [vmem:[#allocation3 + $0x80] sm:$0xff] %vm644_vm2, %v1066_v12  ;;  %v771_v13 = vpop.f32.mrb[4].mxu0 }
 0x1b0   : > { %v773_v14 = vpop.f32.mrb[5].mxu0 }
 0x1b2   : > { %1169 = vrot.lane.b32.xlu0 %v1066_v12, %s4606_s9 }
 0x1b3   : > { %v777_v15 = vpop.f32.mrb[6].mxu0 }
 0x1b4   : > { %v855_v16 = vpack.c.bf16 %v777_v15, %v771_v13  ;;  %v779_v17 = vpop.f32.mrb[7].mxu0 }
 0x1b5   : > { %v1067_v18 = vpack.c.bf16 %v779_v17, %v773_v14 }
 0x1b6   : > { %863 = vst.msk [vmem:[#allocation3 + $0x8] sm:$0xff] %vm644_vm2, %v855_v16  ;;  %957 = vrot.lane.b32.xlu0 %v855_v16, %s4606_s9 }
 0x1b7   : > { %1076 = vst.msk [vmem:[#allocation3 + $0x88] sm:$0xff] %vm644_vm2, %v1067_v18  ;;  %1171 = vrot.lane.b32.xlu1 %v1067_v18, %s4606_s9  ;;  %v783_v19 = vpop.f32.mrb[8].mxu0 }
 0x1b8   : > { %v785_v20 = vpop.f32.mrb[9].mxu0 }
 0x1bb   : > { %v789_v21 = vpop.f32.mrb[10].mxu0 }
 0x1bc   : > { %v856_v22 = vpack.c.bf16 %v789_v21, %v783_v19  ;;  %v791_v23 = vpop.f32.mrb[11].mxu0 }
 0x1bd   : > { %v1068_v24 = vpack.c.bf16 %v791_v23, %v785_v20 }
 0x1be   : > { %864 = vst.msk [vmem:[#allocation3 + $0x10] sm:$0xff] %vm644_vm2, %v856_v22  ;;  %959 = vrot.lane.b32.xlu1 %v856_v22, %s4606_s9 }
 0x1bf   : > { %1077 = vst.msk [vmem:[#allocation3 + $0x90] sm:$0xff] %vm644_vm2, %v1068_v24  ;;  %1173 = vrot.lane.b32.xlu0 %v1068_v24, %s4606_s9  ;;  %v795_v25 = vpop.f32.mrb[12].mxu0 }
 0x1c0   : > { %v797_v26 = vpop.f32.mrb[13].mxu0 }
 0x1c3   : > { %v801_v27 = vpop.f32.mrb[14].mxu0 }
 0x1c4   : > { %v857_v28 = vpack.c.bf16 %v801_v27, %v795_v25  ;;  %v803_v29 = vpop.f32.mrb[15].mxu0 }
 0x1c5   : > { %v1069_v30 = vpack.c.bf16 %v803_v29, %v797_v26 }
 0x1c6   : > { %865 = vst.msk [vmem:[#allocation3 + $0x18] sm:$0xff] %vm644_vm2, %v857_v28  ;;  %961 = vrot.lane.b32.xlu1 %v857_v28, %s4606_s9 }
 0x1c7   : > { %1078 = vst.msk [vmem:[#allocation3 + $0x98] sm:$0xff] %vm644_vm2, %v1069_v30  ;;  %v807_v31 = vpop.f32.mrb[16].mxu0 }
 0x1c8   : > { %v809_v32 = vpop.f32.mrb[17].mxu0 }
 0x1ca   : > { %1175 = vrot.lane.b32.xlu1 %v1069_v30, %s4606_s9 }
 0x1cb   : > { %v813_v33 = vpop.f32.mrb[18].mxu0 }
 0x1cc   : > { %v858_v34 = vpack.c.bf16 %v813_v33, %v807_v31  ;;  %v815_v35 = vpop.f32.mrb[19].mxu0 }
 0x1cd   : > { %v1070_v36 = vpack.c.bf16 %v815_v35, %v809_v32 }
 0x1ce   : > { %866 = vst.msk [vmem:[#allocation3 + $0x20] sm:$0xff] %vm644_vm2, %v858_v34  ;;  %963 = vrot.lane.b32.xlu0 %v858_v34, %s4606_s9 }
 0x1cf   : > { %1079 = vst.msk [vmem:[#allocation3 + $0xa0] sm:$0xff] %vm644_vm2, %v1070_v36  ;;  %v819_v37 = vpop.f32.mrb[20].mxu0 }
 0x1d0   : > { %v821_v38 = vpop.f32.mrb[21].mxu0 }
 0x1d2   : > { %1177 = vrot.lane.b32.xlu0 %v1070_v36, %s4606_s9 }
 0x1d3   : > { %v825_v39 = vpop.f32.mrb[22].mxu0 }
 0x1d4   : > { %v859_v40 = vpack.c.bf16 %v825_v39, %v819_v37  ;;  %v827_v41 = vpop.f32.mrb[23].mxu0 }
 0x1d5   : > { %v1071_v42 = vpack.c.bf16 %v827_v41, %v821_v38 }
 0x1d6   : > { %867 = vst.msk [vmem:[#allocation3 + $0x28] sm:$0xff] %vm644_vm2, %v859_v40  ;;  %965 = vrot.lane.b32.xlu1 %v859_v40, %s4606_s9 }
 0x1d7   : > { %1080 = vst.msk [vmem:[#allocation3 + $0xa8] sm:$0xff] %vm644_vm2, %v1071_v42  ;;  %v831_v43 = vpop.f32.mrb[24].mxu0 }
 0x1d8   : > { %v833_v44 = vpop.f32.mrb[25].mxu0  ;;  %v942_v48 = vpop.f32.mrb[0].mxu1 }
 0x1d9   : > { %946 = vst [vmem:[#allocation4] sm:$0x1] %v942_v48  ;;  %v3591_v50 = vpop.f32.mrb[1].mxu1 }
 0x1da   : > { %1179 = vrot.lane.b32.xlu1 %v1071_v42, %s4606_s9 }
 0x1db   : > { %v837_v45 = vpop.f32.mrb[26].mxu0 }
 0x1dc   : > { %v860_v46 = vpack.c.bf16 %v837_v45, %v831_v43  ;;  %v839_v47 = vpop.f32.mrb[27].mxu0 }
 0x1dd   : > { %v1072_v49 = vpack.c.bf16 %v839_v47, %v833_v44 }
 0x1de   : > { %868 = vst.msk [vmem:[#allocation3 + $0x30] sm:$0xff] %vm644_vm2, %v860_v46  ;;  %967 = vrot.lane.b32.xlu0 %v860_v46, %s4606_s9 }
 0x1df   : > { %1081 = vst.msk [vmem:[#allocation3 + $0xb0] sm:$0xff] %vm644_vm2, %v1072_v49  ;;  %v843_v51 = vpop.f32.mrb[28].mxu0 }
 0x1e0   : > { %v845_v52 = vpop.f32.mrb[29].mxu0 }
 0x1e2   : > { %1181 = vrot.lane.b32.xlu0 %v1072_v49, %s4606_s9 }
 0x1e3   : > { %v849_v53 = vpop.f32.mrb[30].mxu0 }
 0x1e4   : > { %v861_v54 = vpack.c.bf16 %v849_v53, %v843_v51  ;;  %v851_v55 = vpop.f32.mrb[31].mxu0 }
 0x1e5   : > { %v1073_v56 = vpack.c.bf16 %v851_v55, %v845_v52 }
 0x1e6   : > { %869 = vst.msk [vmem:[#allocation3 + $0x38] sm:$0xff] %vm644_vm2, %v861_v54  ;;  %969 = vrot.lane.b32.xlu1 %v861_v54, %s4606_s9 }
 0x1e7   : > { %1082 = vst.msk [vmem:[#allocation3 + $0xb8] sm:$0xff] %vm644_vm2, %v1073_v56 }
 0x1ea   : > { %1183 = vrot.lane.b32.xlu1 %v1073_v56, %s4606_s9 }
 0x1ec   : > { %v1060_v57 = vpop.f32.mrb[32].mxu0 }
 0x1ed   : > { %1065 = vst [vmem:[#allocation4 + $0x1] sm:$0x1] %v1060_v57  ;;  %v3626_v58 = vpop.f32.mrb[33].mxu0 }
 0x218   : > { %v1155_v59 = vpop.f32.mrb[2].mxu1 }
 0x219   : > { %1160 = vst [vmem:[#allocation4 + $0x2] sm:$0x1] %v1155_v59  ;;  %v3661_v60 = vpop.f32.mrb[3].mxu1 }
 0x220   : > { %v956_v61 = vpop.permute.xlu0 %955 }
 0x221   : > { %980 = vst.msk [vmem:[#allocation3 + $0x40] sm:$0xff] %vm644_vm2, %v956_v61 }
 0x224   : > { %v1170_v62 = vpop.permute.xlu0 %1169 }
 0x225   : > { %1194 = vst.msk [vmem:[#allocation3 + $0xc0] sm:$0xff] %vm644_vm2, %v1170_v62 }
 0x228   : > { %v958_v63 = vpop.permute.xlu0 %957 }
 0x229   : > { %981 = vst.msk [vmem:[#allocation3 + $0x48] sm:$0xff] %vm644_vm2, %v958_v63  ;;  %v1172_v0 = vpop.permute.xlu1 %1171 }
 0x22a   : > { %1195 = vst.msk [vmem:[#allocation3 + $0xc8] sm:$0xff] %vm644_vm2, %v1172_v0 }
 0x22c   : > { %v1274_v1 = vpop.f32.mrb[34].mxu0 }
 0x22d   : > { %1279 = vst [vmem:[#allocation4 + $0x3] sm:$0x1] %v1274_v1  ;;  %v3696_v2 = vpop.f32.mrb[35].mxu0 }
 0x230   : > { %v960_v3 = vpop.permute.xlu1 %959 }
 0x231   : > { %982 = vst.msk [vmem:[#allocation3 + $0x50] sm:$0xff] %vm644_vm2, %v960_v3  ;;  %v1174_v4 = vpop.permute.xlu0 %1173 }
 0x232   : > { %1196 = vst.msk [vmem:[#allocation3 + $0xd0] sm:$0xff] %vm644_vm2, %v1174_v4 }
 0x238   : > { %v962_v5 = vpop.permute.xlu1 %961 }
 0x239   : > { %983 = vst.msk [vmem:[#allocation3 + $0x58] sm:$0xff] %vm644_vm2, %v962_v5 }
 0x23c   : > { %v1176_v6 = vpop.permute.xlu1 %1175 }
 0x23d   : > { %1197 = vst.msk [vmem:[#allocation3 + $0xd8] sm:$0xff] %vm644_vm2, %v1176_v6 }
 0x240   : > { %v964_v7 = vpop.permute.xlu0 %963 }
 0x241   : > { %984 = vst.msk [vmem:[#allocation3 + $0x60] sm:$0xff] %vm644_vm2, %v964_v7 }
 0x244   : > { %v1178_v8 = vpop.permute.xlu0 %1177 }
 0x245   : > { %1198 = vst.msk [vmem:[#allocation3 + $0xe0] sm:$0xff] %vm644_vm2, %v1178_v8 }
 0x248   : > { %v966_v9 = vpop.permute.xlu1 %965 }
 0x249   : > { %985 = vst.msk [vmem:[#allocation3 + $0x68] sm:$0xff] %vm644_vm2, %v966_v9 }
 0x24c   : > { %v1180_v10 = vpop.permute.xlu1 %1179 }
 0x24d   : > { %1199 = vst.msk [vmem:[#allocation3 + $0xe8] sm:$0xff] %vm644_vm2, %v1180_v10 }
 0x250   : > { %v968_v11 = vpop.permute.xlu0 %967 }
 0x251   : > { %986 = vst.msk [vmem:[#allocation3 + $0x70] sm:$0xff] %vm644_vm2, %v968_v11 }
 0x254   : > { %v1182_v12 = vpop.permute.xlu0 %1181 }
 0x255   : > { %1200 = vst.msk [vmem:[#allocation3 + $0xf0] sm:$0xff] %vm644_vm2, %v1182_v12 }
 0x258   : > { %v970_v13 = vpop.permute.xlu1 %969 }
 0x259   : > { %987 = vst.msk [vmem:[#allocation3 + $0x78] sm:$0xff] %vm644_vm2, %v970_v13 }
 0x25c   : > { %v1184_v14 = vpop.permute.xlu1 %1183 }
 0x25d   : > { %1201 = vst.msk [vmem:[#allocation3 + $0xf8] sm:$0xff] %vm644_vm2, %v1184_v14 }
 0x25e PF: > { %s3297_s8 = sshll.u32 %s4579_s29, 6  ;;  %vm1350_vm4 = vcmask 523264   ;;  %s6115_s2 = sld [smem:[#allocation39_spill]]  ;;  %v4607_v35 = vmov 0   ;;  %v1675_v46 = vld [vmem:[#allocation3] sm:$0xff]  ;;  %v1676_v47 = vld [vmem:[#allocation3 + $0x8] sm:$0xff] }
 0x25f   : > { %s5307_s13 = scalar_lea.vmem [#allocation2], %s3201_s22  ;;  %4209 = vset.pattern.permute.xlu0 %v4607_v35  ;;  %4210 = vset.pattern.permute.xlu1 %v4607_v35  ;;  %s3296_s22 = sshll.u32 %s4579_s29, 1  ;;  %v3357_v48 = vld [vmem:[%s4935_s19] sm:$0xff]   ;;  %v3391_v52 = vld [vmem:[%s4935_s19 + $0x8] sm:$0xff]   ;;  %v5391_v55 = vld [vmem:[#allocation4] ss:$0 sm:$0xff] }
 0x260   : > { %v5310_v15 = vld [vmem:[%s5307_s13] sm:$0xff]  ;;  %v5315_v28 = vld [vmem:[%s5307_s13 + $0x8] sm:$0xff]  ;;  %v5318_v29 = vld [vmem:[%s5307_s13 + $0x10] sm:$0xff]  ;;  %s1329_s18 = scalar_lea.vmem [#allocation11], %s3296_s22  ;;  %3725 = vmatprep.subr.bf16.mxu1 %v1675_v46  ;;  %v5383_v50 = vunpack.c.l.bf16 %v3357_v48  ;;  %v5398_v59 = vunpack.c.h.bf16 %v3391_v52  ;;  %v5400_v60 = vunpack.c.h.bf16 %v3357_v48  ;;  %v5405_v0 = vunpack.c.l.bf16 %v3391_v52  ;;  %p3307_p6 = scmp.ge.s32.totalorder %s4579_s29, 2 }
 0x261   : > { %6116 = vst [vmem:[#allocation25_spill] sm:$0xff] %v5310_v15  ;;  %3713 = vmatprep.mubr.msk.f32.mxu0 %vm1350_vm4, %v5310_v15  ;;  %6117 = vst [vmem:[#allocation26_spill] sm:$0xff] %v5315_v28  ;;  %v5325_v30 = vld [vmem:[%s5307_s13 + $0x18] sm:$0xff]  ;;  %v5328_v31 = vld [vmem:[%s5307_s13 + $0x20] sm:$0xff]  ;;  %3726 = vmatpush3.bf16.msra.mxu1 %v1675_v46 }
 0x262   : > { %6118 = vst [vmem:[#allocation27_spill] sm:$0xff] %v5318_v29  ;;  %6119 = vst [vmem:[#allocation28_spill] sm:$0xff] %v5325_v30  ;;  %v5335_v32 = vld [vmem:[%s5307_s13 + $0x28] sm:$0xff]  ;;  %v5338_v33 = vld [vmem:[%s5307_s13 + $0x30] sm:$0xff]  ;;  %3727 = vmatprep.subr.bf16.mxu1 %v1676_v47 }
 0x263   : > { %6120 = vst [vmem:[#allocation29_spill] sm:$0xff] %v5328_v31  ;;  %6121 = vst [vmem:[#allocation30_spill] sm:$0xff] %v5335_v32  ;;  %v5345_v34 = vld [vmem:[%s5307_s13 + $0x38] sm:$0xff]  ;;  %v5350_v36 = vld [vmem:[%s1329_s18] sm:$0x3] }
 0x264   : > { %s1341_s20 = scalar_lea.vmem %s6115_s2, %s3297_s8  ;;  %6122 = vst [vmem:[#allocation31_spill] sm:$0xff] %v5338_v33  ;;  %6123 = vst [vmem:[#allocation32_spill] sm:$0xff] %v5345_v34  ;;  %v5354_v37 = vrot.slane %v5350_v36, 1  ;;  %v3373_v49 = vld [vmem:[%s4942_s10] sm:$0xff]   ;;  %v3394_v53 = vld [vmem:[%s4942_s10 + $0x8] sm:$0xff]  }
 0x265   : > { %v1342_v16 = vld [vmem:[%s1341_s20] sm:$0xff]  ;;  %v1343_v17 = vld [vmem:[%s1341_s20 + $0x8] sm:$0xff]  ;;  %v1344_v18 = vld [vmem:[%s1341_s20 + $0x10] sm:$0xff]  ;;  %4069 = vpush %v5350_v36  ;;  %3728 = vmatpush3.bf16.msra.mxu1 %v1676_v47  ;;  %v5389_v54 = vunpack.c.l.bf16 %v3373_v49  ;;  %v5403_v63 = vunpack.c.h.bf16 %v3394_v53  ;;  %v5409_v3 = vunpack.c.h.bf16 %v3373_v49  ;;  %v5416_v7 = vunpack.c.l.bf16 %v3394_v53 }
 0x266   : > { %v4013_v19 = vpack.c.bf16 %v1343_v17, %v1342_v16  ;;  %v1345_v20 = vld [vmem:[%s1341_s20 + $0x18] sm:$0xff]  ;;  %v1346_v22 = vld [vmem:[%s1341_s20 + $0x20] sm:$0xff]  ;;  %v1347_v23 = vld [vmem:[%s1341_s20 + $0x28] sm:$0xff]  ;;  %4071 = vpush %v5354_v37 }
 0x267   : > { %v4017_v21 = vpack.c.bf16 %v1345_v20, %v1344_v18  ;;  %v4021_v24 = vpack.c.bf16 %v1347_v23, %v1346_v22  ;;  %v1348_v25 = vld [vmem:[%s1341_s20 + $0x30] sm:$0xff]  ;;  %v1349_v26 = vld [vmem:[%s1341_s20 + $0x38] sm:$0xff]  ;;  %v3341_v1 = vld [vmem:[%s4964_s24] sm:$0xff]   ;;  %6124 = vst [vmem:[#allocation33_spill] sm:$0xff] %v5409_v3 }
 0x268   : > { %4014 = vmatprep.subr.bf16.mxu0 %v4013_v19  ;;  %v4025_v27 = vpack.c.bf16 %v1349_v26, %v1348_v25  ;;  %v3392_v57 = vld [vmem:[%s4935_s19 + $0x10] sm:$0xff]   ;;  %v3393_v61 = vld [vmem:[%s4935_s19 + $0x18] sm:$0xff]   ;;  %v5428_v16 = vunpack.c.l.bf16 %v3341_v1  ;;  %v3388_v17 = vld [vmem:[%s4964_s24 + $0x8] sm:$0xff]  }
 0x269   : > { %4016 = vmatpush3.bf16.msra.mxu0 %v4013_v19  ;;  %v5411_v4 = vunpack.c.l.bf16 %v3392_v57  ;;  %v3395_v5 = vld [vmem:[%s4942_s10 + $0x10] sm:$0xff]   ;;  %v5418_v8 = vunpack.c.h.bf16 %v3392_v57  ;;  %v5420_v9 = vunpack.c.l.bf16 %v3393_v61  ;;  %v5422_v10 = vunpack.c.h.bf16 %v3393_v61  ;;  %v3396_v26 = vld [vmem:[%s4942_s10 + $0x18] sm:$0xff]  }
 0x26a   : > { %4018 = vmatprep.subr.bf16.mxu0 %v4017_v21  ;;  %v5436_v22 = vunpack.c.l.bf16 %v3395_v5  ;;  %v5446_v47 = vunpack.c.h.bf16 %v3395_v5  ;;  %v5448_v48 = vunpack.c.h.bf16 %v3388_v17  ;;  %v5458_v5 = vunpack.c.l.bf16 %v3396_v26 }
 0x26d   : > { %4020 = vmatpush3.bf16.msra.mxu0 %v4017_v21 }
 0x26e   : > { %4022 = vmatprep.subr.bf16.mxu0 %v4021_v24 }
 0x271   : > { %4024 = vmatpush3.bf16.msra.mxu0 %v4021_v24 }
 0x272   : > { %4026 = vmatprep.subr.bf16.mxu0 %v4025_v27 }
 0x275   : > { %4028 = vmatpush3.bf16.msra.mxu0 %v4025_v27 }
 0x278   : > { %3714 = vmatmul.mubr.msk.f32.vlgmr.msra.gmra.mrb[0].mxu0 %vm1350_vm4, %v5315_v28 }
 0x279   : > { %3716 = vmatprep.mubr.msk.f32.mxu0 %vm1350_vm4, %v5318_v29 }
 0x27c   : > { %3717 = vmatmul.mubr.msk.f32.gmra.mrb[2].mxu0 %vm1350_vm4, %v5325_v30 }
 0x27d   : > { %3719 = vmatprep.mubr.msk.f32.mxu0 %vm1350_vm4, %v5328_v31 }
 0x280   : > { %3720 = vmatmul.mubr.msk.f32.gmra.mrb[4].mxu0 %vm1350_vm4, %v5335_v32  ;;  %v3390_v32 = vld [vmem:[%s4964_s24 + $0x18] sm:$0xff]  }
 0x281   : > { %3722 = vmatprep.mubr.msk.f32.mxu0 %vm1350_vm4, %v5338_v33 }
 0x284   : > { %3723 = vmatmul.mubr.msk.f32.gmra.mrb[6].mxu0 %vm1350_vm4, %v5345_v34 }
 0x296   : > { %s4070_s5 = spop %4069 }
 0x297   : > { %s4072_s23 = spop %4071  ;;  %v5385_v51 = vstv %s4070_s5 }
 0x298   : > { %v5393_v56 = vstv %s4072_s23  ;;  %v1547_v58 = vmul.f32 %v5383_v50, %v5385_v51  ;;  %v1550_v13 = vmul.f32 %v5398_v59, %v5385_v51  ;;  %v1548_v14 = vmul.f32 %v5400_v60, %v5385_v51 }
 0x299   : > { %v1567_v6 = vmul.f32 %v5389_v54, %v5393_v56  ;;  %v1570_v19 = vmul.f32 %v5403_v63, %v5393_v56  ;;  %v1549_v21 = vmul.f32 %v5405_v0, %v5385_v51  ;;  %v1568_v24 = vmul.f32 %v5409_v3, %v5393_v56 }
 0x29a   : > { %v1551_v25 = vmul.f32 %v5411_v4, %v5385_v51  ;;  %v1569_v46 = vmul.f32 %v5416_v7, %v5393_v56  ;;  %v1552_v53 = vmul.f32 %v5418_v8, %v5385_v51 }
 0x34b   : > { %v5357_v38 = vpop.f32.mrb[0].mxu0 }
 0x34c   : > { %v5359_v39 = vpop.f32.mrb[1].mxu0 }
 0x34d   : > { %1491 = vperm.xlu0 %4209, %v5359_v39  }
 0x34f   : > { %v5362_v40 = vpop.f32.mrb[2].mxu0 }
 0x350   : > { %1506 = vperm.xlu1 %4210, %v5362_v40   ;;  %v5365_v41 = vpop.f32.mrb[3].mxu0 }
 0x351   : > { %1496 = vperm.xlu0 %4209, %v5357_v38  }
 0x353   : > { %v5368_v42 = vpop.f32.mrb[4].mxu0 }
 0x354   : > { %1501 = vperm.xlu1 %4210, %v5365_v41   ;;  %v5371_v43 = vpop.f32.mrb[5].mxu0 }
 0x355   : > { %1511 = vperm.xlu0 %4209, %v5371_v43  }
 0x357   : > { %v5374_v44 = vpop.f32.mrb[6].mxu0 }
 0x358   : > { %1516 = vperm.xlu1 %4210, %v5368_v42   ;;  %v5377_v45 = vpop.f32.mrb[7].mxu0 }
 0x359   : > { %1521 = vperm.xlu0 %4209, %v5377_v45  }
 0x35c   : > { %1526 = vperm.xlu1 %4210, %v5374_v44  }
 0x3cc   : > { %v1492_v62 = vpop.permute.xlu0 %1491 }
 0x3cd   : > { %v1535_v2 = vadd.f32 %v5391_v55, %v1492_v62 }
 0x3cf   : > { %v1555_v11 = vadd.f32 %v1547_v58, %v1535_v2  ;;  %v1507_v12 = vpop.permute.xlu1 %1506  ;;  %v5453_v58 = vunpack.c.h.bf16 %v3341_v1 }
 0x3d0   : > { %v1538_v18 = vadd.f32 %v5391_v55, %v1507_v12  ;;  %v1497_v20 = vpop.permute.xlu0 %1496 }
 0x3d1   : > { %v1536_v23 = vadd.f32 %v5391_v55, %v1497_v20  ;;  %v1575_v27 = vadd.f32 %v1567_v6, %v1555_v11  ;;  %v1571_v6 = vmul.f32 %v5436_v22, %v5393_v56  ;;  %v3389_v11 = vld [vmem:[%s4964_s24 + $0x10] sm:$0xff]  }
 0x3d2   : > { %v1558_v35 = vadd.f32 %v1550_v13, %v1538_v18 }
 0x3d3   : > { %v1556_v49 = vadd.f32 %v1548_v14, %v1536_v23  ;;  %v1502_v52 = vpop.permute.xlu1 %1501  ;;  %v1583_v57 = vadd.f32 %v5428_v16, %v1575_v27  ;;  %v1553_v14 = vmul.f32 %v5420_v9, %v5385_v51  ;;  %v5467_v23 = vunpack.c.l.bf16 %v3388_v17 }
 0x3d4   : > { %v1578_v61 = vadd.f32 %v1570_v19, %v1558_v35  ;;  %v1537_v62 = vadd.f32 %v5391_v55, %v1502_v52  ;;  %v1512_v2 = vpop.permute.xlu0 %1511  ;;  %v1572_v19 = vmul.f32 %v5446_v47, %v5393_v56 }
 0x3d5   : > { %v1576_v12 = vadd.f32 %v1568_v24, %v1556_v49  ;;  %v1539_v13 = vadd.f32 %v5391_v55, %v1512_v2  ;;  %v1591_v18 = vmul.f32 0.2, %v1583_v57  ;;  %v5472_v49 = vunpack.c.l.bf16 %v3389_v11 }
 0x3d6   : > { %v1557_v1 = vadd.f32 %v1549_v21, %v1537_v62  ;;  %v1586_v20 = vadd.f32 %v5448_v48, %v1578_v61  ;;  %v1573_v21 = vmul.f32 %v5458_v5, %v5393_v56 }
 0x3d7   : > { %v1559_v27 = vadd.f32 %v1551_v25, %v1539_v13  ;;  %v1517_v35 = vpop.permute.xlu1 %1516  ;;  %v5469_v52 = vmax.f32 %v1583_v57, %v1591_v18  ;;  %v1584_v24 = vadd.f32 %v5453_v58, %v1576_v12  ;;  %v5480_v25 = vunpack.c.h.bf16 %v3396_v26 }
 0x3d8   : > { %v1577_v2 = vadd.f32 %v1569_v46, %v1557_v1  ;;  %v1540_v34 = vadd.f32 %v5391_v55, %v1517_v35  ;;  %v1522_v33 = vpop.permute.xlu0 %1521  ;;  %v1594_v62 = vmul.f32 0.2, %v1586_v20  ;;  %v5485_v18 = vunpack.c.h.bf16 %v3389_v11 }
 0x3d9   : > { %v1579_v61 = vadd.f32 %v1571_v6, %v1559_v27  ;;  %v1541_v17 = vadd.f32 %v5391_v55, %v1522_v33  ;;  %1607 = vmax.xlane.f32.xlu0 %v5469_v52  ;;  %v1592_v57 = vmul.f32 0.2, %v1584_v24  ;;  %v5488_v6 = vunpack.c.l.bf16 %v3390_v32 }
 0x3da   : > { %v1560_v12 = vadd.f32 %v1552_v53, %v1540_v34  ;;  %v5482_v13 = vmax.f32 %v1586_v20, %v1594_v62  ;;  %v1585_v46 = vadd.f32 %v5467_v23, %v1577_v2  ;;  %v1554_v26 = vmul.f32 %v5422_v10, %v5385_v51 }
 0x3db   : > { %v1561_v1 = vadd.f32 %v1553_v14, %v1541_v17  ;;  %v1527_v35 = vpop.permute.xlu1 %1526  ;;  %v1600_v31 = vmax.f32 %v1584_v24, %v1592_v57  ;;  %v1587_v30 = vadd.f32 %v5472_v49, %v1579_v61  ;;  %v1574_v20 = vmul.f32 %v5480_v25, %v5393_v56 }
 0x3dc   : > { %v1580_v33 = vadd.f32 %v1572_v19, %v1560_v12  ;;  %v1542_v27 = vadd.f32 %v5391_v55, %v1527_v35  ;;  %v1593_v34 = vmul.f32 0.2, %v1585_v46  ;;  %v5497_v62 = vunpack.c.h.bf16 %v3390_v32  ;;  %v1679_v32 = vld [vmem:[#allocation3 + $0x20] sm:$0xff]  ;;  %v1680_v35 = vld [vmem:[#allocation3 + $0x28] sm:$0xff] }
 0x3dd   : > { %v1581_v53 = vadd.f32 %v1573_v21, %v1561_v1  ;;  %1609 = vmax.xlane.f32.xlu1 %v1600_v31  ;;  %1613 = vmax.xlane.f32.xlu0 %v5482_v13  ;;  %v1595_v11 = vmul.f32 0.2, %v1587_v30  ;;  %v1677_v1 = vld [vmem:[#allocation3 + $0x10] sm:$0xff] }
 0x3de   : > { %v1562_v14 = vadd.f32 %v1554_v26, %v1542_v27  ;;  %v1601_v24 = vmax.f32 %v1585_v46, %v1593_v34  ;;  %v1588_v2 = vadd.f32 %v5485_v18, %v1580_v33  ;;  %3729 = vmatprep.subr.bf16.mxu1 %v1677_v1  ;;  %v1681_v33 = vld [vmem:[#allocation3 + $0x30] sm:$0xff]  ;;  %v1682_v27 = vld [vmem:[#allocation3 + $0x38] sm:$0xff] }
 0x3df   : > { %v1603_v19 = vmax.f32 %v1587_v30, %v1595_v11  ;;  %v1589_v55 = vadd.f32 %v5488_v6, %v1581_v53  ;;  %3730 = vmatpush3.bf16.msra.mxu1 %v1677_v1  ;;  %v1678_v30 = vld [vmem:[#allocation3 + $0x18] sm:$0xff] }
 0x3e0   : > { %v1582_v61 = vadd.f32 %v1574_v20, %v1562_v14  ;;  %v1596_v51 = vmul.f32 0.2, %v1588_v2  ;;  %3731 = vmatprep.subr.bf16.mxu1 %v1678_v30 }
 0x3e1   : > { %1615 = vmax.xlane.f32.xlu1 %v1603_v19  ;;  %1611 = vmax.xlane.f32.xlu0 %v1601_v24  ;;  %v1597_v21 = vmul.f32 0.2, %v1589_v55 }
 0x3e2   : > { %v1604_v17 = vmax.f32 %v1588_v2, %v1596_v51  ;;  %v1590_v56 = vadd.f32 %v5497_v62, %v1582_v61 }
 0x3e3   : > { %v1605_v57 = vmax.f32 %v1589_v55, %v1597_v21  ;;  %3732 = vmatpush3.bf16.msra.mxu1 %v1678_v30 }
 0x3e4   : > { %v1598_v12 = vmul.f32 0.2, %v1590_v56  ;;  %3733 = vmatprep.subr.bf16.mxu1 %v1679_v32 }
 0x3e5   : > { %1619 = vmax.xlane.f32.xlu1 %v1605_v57  ;;  %1617 = vmax.xlane.f32.xlu0 %v1604_v17 }
 0x3e6   : > { %v1606_v46 = vmax.f32 %v1590_v56, %v1598_v12 }
 0x3e7   : > { %3734 = vmatpush3.bf16.msra.mxu1 %v1679_v32 }
 0x3e8   : > { %3735 = vmatprep.subr.bf16.mxu1 %v1680_v35 }
 0x3e9   : > { %1621 = vmax.xlane.f32.xlu0 %v1606_v46 }
 0x3eb   : > { %3736 = vmatpush3.bf16.msra.mxu1 %v1680_v35 }
 0x3ec   : > { %3737 = vmatprep.subr.bf16.mxu1 %v1681_v33 }
 0x3ef   : > { %3738 = vmatpush3.bf16.msra.mxu1 %v1681_v33 }
 0x3f0   : > { %3739 = vmatprep.subr.bf16.mxu1 %v1682_v27 }
 0x3f3   : > { %3740 = vmatpush3.bf16.msra.mxu1 %v1682_v27 }
 0x466   : > { %v1608_v26 = vpop.xlane.xlu0 %1607 }
 0x467   : > { %v1623_v34 = vsub.f32 %v5469_v52, %v1608_v26 }
 0x469   : > { %v1631_v53 = vmul.f32 1.442695, %v1623_v34 }
 0x46a   : > { %v1610_v20 = vpop.xlane.xlu1 %1609  ;;  %v1614_v11 = vpop.xlane.xlu0 %1613 }
 0x46b   : > { %4211 = vpow2.f32 %v1631_v53  ;;  %v1624_v14 = vsub.f32 %v1600_v31, %v1610_v20  ;;  %v1626_v2 = vsub.f32 %v5482_v13, %v1614_v11 }
 0x46d   : > { %v1633_v55 = vmul.f32 1.442695, %v1624_v14  ;;  %v1637_v21 = vmul.f32 1.442695, %v1626_v2 }
 0x46e   : > { %v1616_v61 = vpop.xlane.xlu1 %1615  ;;  %v1612_v51 = vpop.xlane.xlu0 %1611 }
 0x46f   : > { %4213 = vpow2.f32 %v1633_v55  ;;  %v1627_v56 = vsub.f32 %v1603_v19, %v1616_v61  ;;  %v1625_v12 = vsub.f32 %v1601_v24, %v1612_v51  ;;  %v4608_v51 = vmov 0.0  }
 0x470   : > { %4215 = vpow2.f32 %v1637_v21  ;;  %1482 = vst.msk [vmem:[#allocation5 + $0x10] sm:$0xff] %vm1350_vm4, %v4608_v51  ;;  %1480 = vst.msk [vmem:[#allocation5] sm:$0xff] %vm1350_vm4, %v4608_v51 }
 0x471   : > { %v1635_v1 = vmul.f32 1.442695, %v1625_v12  ;;  %v1639_v35 = vmul.f32 1.442695, %v1627_v56  ;;  %1481 = vst.msk [vmem:[#allocation5 + $0x8] sm:$0xff] %vm1350_vm4, %v4608_v51  ;;  %1483 = vst.msk [vmem:[#allocation5 + $0x18] sm:$0xff] %vm1350_vm4, %v4608_v51 }
 0x472   : > { %v1620_v30 = vpop.xlane.xlu1 %1619  ;;  %v1618_v32 = vpop.xlane.xlu0 %1617  ;;  %1484 = vst.msk [vmem:[#allocation5 + $0x20] sm:$0xff] %vm1350_vm4, %v4608_v51  ;;  %1485 = vst.msk [vmem:[#allocation5 + $0x28] sm:$0xff] %vm1350_vm4, %v4608_v51 }
 0x473   : > { %v1629_v52 = vsub.f32 %v1605_v57, %v1620_v30  ;;  %v1628_v33 = vsub.f32 %v1604_v17, %v1618_v32  ;;  %4217 = vpow2.f32 %v1635_v1  ;;  %1486 = vst.msk [vmem:[#allocation5 + $0x30] sm:$0xff] %vm1350_vm4, %v4608_v51  ;;  %1487 = vst.msk [vmem:[#allocation5 + $0x38] sm:$0xff] %vm1350_vm4, %v4608_v51 }
 0x474   : > { %4219 = vpow2.f32 %v1639_v35 }
 0x475   : > { %v4212_v27 = vpop.eup %4211  ;;  %v1641_v26 = vmul.f32 1.442695, %v1628_v33  ;;  %v1643_v31 = vmul.f32 1.442695, %v1629_v52 }
 0x476   : > { %1647 = vadd.xlane.f32.xlu1 %v4212_v27  ;;  %v1622_v13 = vpop.xlane.xlu0 %1621 }
 0x477   : > { %v1630_v34 = vsub.f32 %v1606_v46, %v1622_v13  ;;  %4221 = vpow2.f32 %v1641_v26  ;;  %v1758_v26 = vld [vmem:[#allocation5 + $0x10] sm:$0xff] }
 0x478   : > { %4223 = vpow2.f32 %v1643_v31 }
 0x479   : > { %v4214_v53 = vpop.eup %4213  ;;  %v1645_v20 = vmul.f32 1.442695, %v1630_v34 }
 0x47a   : > { %1649 = vadd.xlane.f32.xlu0 %v4214_v53  ;;  %v1671_v24 = vpack.c.bf16 %v4214_v53, %v4212_v27  ;;  %v4216_v19 = vpop.eup %4215  ;;  %v1756_v53 = vld [vmem:[#allocation5] sm:$0xff] }
 0x47b   : > { %4225 = vpow2.f32 %v1645_v20 }
 0x47c   : > { %3741 = vmatprep.mubr.bf16.mxu1 %v1671_v24 }
 0x47d   : > { %v4218_v11 = vpop.eup %4217 }
 0x47e   : > { %1653 = vadd.xlane.f32.xlu0 %v4216_v19  ;;  %1651 = vadd.xlane.f32.xlu1 %v4218_v11  ;;  %v1672_v17 = vpack.c.bf16 %v4216_v19, %v4218_v11  ;;  %v4220_v57 = vpop.eup %4219  ;;  %v1759_v11 = vld [vmem:[#allocation5 + $0x18] sm:$0xff] }
 0x480   : > { %3742 = vmatmul.mubr.bf16.vlgmr.msra.gmra.mrb[0].mxu1 %v1672_v17 }
 0x481   : > { %v4222_v14 = vpop.eup %4221 }
 0x482   : > { %1655 = vadd.xlane.f32.xlu1 %v4220_v57  ;;  %1657 = vadd.xlane.f32.xlu0 %v4222_v14  ;;  %v1673_v2 = vpack.c.bf16 %v4222_v14, %v4220_v57  ;;  %v4224_v46 = vpop.eup %4223 }
 0x484   : > { %3745 = vmatprep.mubr.bf16.mxu1 %v1673_v2 }
 0x485   : > { %v4226_v55 = vpop.eup %4225 }
 0x486   : > { %v1674_v61 = vpack.c.bf16 %v4226_v55, %v4224_v46  ;;  %1659 = vadd.xlane.f32.xlu1 %v4224_v46  ;;  %1661 = vadd.xlane.f32.xlu0 %v4226_v55  ;;  %v1757_v46 = vld [vmem:[#allocation5 + $0x8] sm:$0xff] }
 0x488   : > { %3746 = vmatmul.mubr.bf16.gmra.mrb[4].mxu1 %v1674_v61 }
 0x503   : > { %v1648_v21 = vpop.xlane.xlu1 %1647 }
 0x507   : > { %v1650_v56 = vpop.xlane.xlu0 %1649 }
 0x50b   : > { %v1652_v12 = vpop.xlane.xlu1 %1651  ;;  %v1654_v1 = vpop.xlane.xlu0 %1653 }
 0x50c   : > { %4227 = vrcp.f32 %v1652_v12 }
 0x50d   : > { %4229 = vrcp.f32 %v1648_v21 }
 0x50e   : > { %4231 = vrcp.f32 %v1654_v1  ;;  %v1762_v1 = vld [vmem:[#allocation5 + $0x30] sm:$0xff] }
 0x50f   : > { %v1656_v30 = vpop.xlane.xlu1 %1655  ;;  %v1658_v32 = vpop.xlane.xlu0 %1657  ;;  %4233 = vrcp.f32 %v1650_v56 }
 0x513   : > { %v1660_v35 = vpop.xlane.xlu1 %1659  ;;  %v1662_v52 = vpop.xlane.xlu0 %1661 }
 0x514   : > { %4235 = vrcp.f32 %v1660_v35 }
 0x515   : > { %4237 = vrcp.f32 %v1656_v30 }
 0x516   : > { %v4228_v33 = vpop.eup %4227  ;;  %4239 = vrcp.f32 %v1662_v52  ;;  %v1760_v52 = vld [vmem:[#allocation5 + $0x20] sm:$0xff] }
 0x517   : > { %v4230_v31 = vpop.eup %4229  ;;  %4241 = vrcp.f32 %v1658_v32 }
 0x518   : > { %v4232_v20 = vpop.eup %4231 }
 0x519   : > { %v4234_v17 = vpop.eup %4233 }
 0x51e   : > { %v4236_v56 = vpop.eup %4235 }
 0x51f   : > { %v4238_v30 = vpop.eup %4237 }
 0x553   : > { %v3743_v27 = vpop.f32.mrb[0].mxu1 }
 0x554   : > { %v1750_v13 = vmul.f32 %v4228_v33, %v3743_v27  ;;  %v1717_v34 = vpop.f32.mrb[1].mxu1  ;;  %v4240_v33 = vpop.eup %4239 }
 0x555   : > { %v1748_v24 = vmul.f32 %v4230_v31, %v1717_v34  ;;  %v3744_v19 = vpop.f32.mrb[2].mxu1  ;;  %v1763_v31 = vld [vmem:[#allocation5 + $0x38] sm:$0xff] }
 0x556   : > { %v1766_v57 = vadd.f32 %v1758_v26, %v1750_v13  ;;  %v1751_v14 = vmul.f32 %v4232_v20, %v3744_v19  ;;  %v1720_v2 = vpop.f32.mrb[3].mxu1  ;;  %v4242_v13 = vpop.eup %4241 }
 0x557   : > { %v1764_v55 = vadd.f32 %v1756_v53, %v1748_v24  ;;  %v1749_v61 = vmul.f32 %v4234_v17, %v1720_v2  ;;  %v1761_v24 = vld [vmem:[#allocation5 + $0x28] sm:$0xff] }
 0x558   : > { %1774 = vst.msk [vmem:[#allocation5 + $0x10] sm:$0xff] %vm1350_vm4, %v1766_v57  ;;  %v1767_v51 = vadd.f32 %v1759_v11, %v1751_v14 }
 0x559   : > { %1772 = vst.msk [vmem:[#allocation5] sm:$0xff] %vm1350_vm4, %v1764_v55  ;;  %v1765_v21 = vadd.f32 %v1757_v46, %v1749_v61 }
 0x55a   : > { %1775 = vst.msk [vmem:[#allocation5 + $0x18] sm:$0xff] %vm1350_vm4, %v1767_v51 }
 0x55b   : > { %1773 = vst.msk [vmem:[#allocation5 + $0x8] sm:$0xff] %vm1350_vm4, %v1765_v21  ;;  %v3747_v12 = vpop.f32.mrb[4].mxu1 }
 0x55c   : > { %v1754_v32 = vmul.f32 %v4236_v56, %v3747_v12  ;;  %v1733_v35 = vpop.f32.mrb[5].mxu1 }
 0x55d   : > { %v1752_v27 = vmul.f32 %v4238_v30, %v1733_v35  ;;  %v3748_v26 = vpop.f32.mrb[6].mxu1  ;;  %1783 = sbr.rel (%p3307_p6) target bundleno = 1985 (0x7c1), region = 100 }
 0x55e   : > { %v1770_v34 = vadd.f32 %v1762_v1, %v1754_v32  ;;  %v1755_v53 = vmul.f32 %v4240_v33, %v3748_v26  ;;  %v1736_v20 = vpop.f32.mrb[7].mxu1 }
 0x55f   : > { %v1768_v19 = vadd.f32 %v1760_v52, %v1752_v27  ;;  %v1753_v11 = vmul.f32 %v4242_v13, %v1736_v20 }
 0x560   : > { %1778 = vst.msk [vmem:[#allocation5 + $0x30] sm:$0xff] %vm1350_vm4, %v1770_v34  ;;  %v1771_v17 = vadd.f32 %v1763_v31, %v1755_v53 }
 0x561   : > { %1776 = vst.msk [vmem:[#allocation5 + $0x20] sm:$0xff] %vm1350_vm4, %v1768_v19  ;;  %v1769_v57 = vadd.f32 %v1761_v24, %v1753_v11 }
 0x562   : > { %1779 = vst.msk [vmem:[#allocation5 + $0x38] sm:$0xff] %vm1350_vm4, %v1771_v17 }
 0x563   : > { %1777 = vst.msk [vmem:[#allocation5 + $0x28] sm:$0xff] %vm1350_vm4, %v1769_v57 }
 0x564   : > { %s4609_s19 = smov 126   ;;  %s4610_s10 = smov 127   ;;  %v4611_v14 = vmov 1   ;;  %v4613_v2 = vmov 2   ;;  %v3308_v52 = vld [vmem:[#allocation4 + $0x1] ss:$0 sm:$0xff] }
 0x565   : > { %2120 = vrot.lane.b32.xlu1 %v5350_v36, %s4609_s19  ;;  %1832 = vrot.lane.b32.xlu0 %v5350_v36, %s4610_s10  ;;  %s4612_s24 = smov 125   ;;  %v5550_v33 = vld [vmem:[#allocation4 + $0x2] ss:$0 sm:$0xff]  ;;  %v5556_v57 = vld [vmem:[#allocation4 + $0x3] ss:$0 sm:$0xff] }
 0x566   : > { %4244 = vset.pattern.permute.xlu1 %v4611_v14  ;;  %4243 = vset.pattern.permute.xlu0 %v4611_v14 }
 0x569   : > { %2141 = vrot.lane.b32.xlu1 %v5354_v37, %s4609_s19  ;;  %1853 = vrot.lane.b32.xlu0 %v5354_v37, %s4610_s10 }
 0x56d   : > { %2429 = vrot.lane.b32.xlu1 %v5354_v37, %s4612_s24  ;;  %2408 = vrot.lane.b32.xlu0 %v5350_v36, %s4612_s24  ;;  %v4614_v36 = vmov 3   ;;  %v1967_v37 = vld [vmem:[#allocation3 + $0x40] sm:$0xff] }
 0x56e   : > { %3749 = vmatprep.subr.bf16.mxu0 %v1967_v37 }
 0x56f   : > { %3750 = vmatpush3.bf16.msra.mxu0 %v1967_v37 }
 0x571   : > { %1791 = vperm.xlu1 %4244, %v5357_v38   ;;  %1787 = vperm.xlu0 %4243, %v5359_v39  }
 0x575   : > { %4245 = vset.pattern.permute.xlu1 %v4613_v2  ;;  %1803 = vperm.xlu0 %4243, %v5371_v43  }
 0x576   : > { %2075 = vperm.xlu1 %4245, %v5359_v39  }
 0x579   : > { %1815 = vperm.xlu0 %4243, %v5374_v44  }
 0x57a   : > { %4246 = vset.pattern.permute.xlu1 %v4611_v14 }
 0x57b   : > { %1795 = vperm.xlu1 %4246, %v5365_v41  }
 0x57d   : > { %4249 = vset.pattern.permute.xlu0 %v4613_v2 }
 0x57e   : > { %2079 = vperm.xlu0 %4249, %v5357_v38  }
 0x57f   : > { %1799 = vperm.xlu1 %4246, %v5362_v40  }
 0x582   : > { %2083 = vperm.xlu0 %4249, %v5365_v41  }
 0x583   : > { %4247 = vset.pattern.permute.xlu1 %v4613_v2 }
 0x584   : > { %2087 = vperm.xlu1 %4247, %v5362_v40  }
 0x586   : > { %2095 = vperm.xlu0 %4249, %v5368_v42  }
 0x588   : > { %4248 = vset.pattern.permute.xlu1 %v4611_v14 }
 0x589   : > { %1807 = vperm.xlu1 %4248, %v5368_v42  }
 0x58a   : > { %4251 = vset.pattern.permute.xlu0 %v4614_v36 }
 0x58b   : > { %2363 = vperm.xlu0 %4251, %v5359_v39   ;;  %v1968_v39 = vld [vmem:[#allocation3 + $0x48] sm:$0xff] }
 0x58c   : > { %3751 = vmatprep.subr.bf16.mxu0 %v1968_v39 }
 0x58d   : > { %1811 = vperm.xlu1 %4248, %v5377_v45   ;;  %3752 = vmatpush3.bf16.msra.mxu0 %v1968_v39 }
 0x58f   : > { %2383 = vperm.xlu0 %4251, %v5368_v42   ;;  %v2255_v42 = vld [vmem:[#allocation3 + $0x80] sm:$0xff] }
 0x590   : > { %3773 = vmatprep.subr.bf16.mxu1 %v2255_v42 }
 0x591   : > { %4250 = vset.pattern.permute.xlu1 %v4613_v2  ;;  %3774 = vmatpush3.bf16.msra.mxu1 %v2255_v42 }
 0x592   : > { %2091 = vperm.xlu1 %4250, %v5371_v43  }
 0x593   : > { %2375 = vperm.xlu0 %4251, %v5362_v40  }
 0x596   : > { %2099 = vperm.xlu1 %4250, %v5377_v45  }
 0x597   : > { %2391 = vperm.xlu0 %4251, %v5374_v44  }
 0x59a   : > { %2103 = vperm.xlu1 %4250, %v5374_v44  }
 0x59e   : > { %4252 = vset.pattern.permute.xlu1 %v4614_v36 }
 0x59f   : > { %2367 = vperm.xlu1 %4252, %v5357_v38  }
 0x5a3   : > { %2379 = vperm.xlu1 %4252, %v5371_v43  }
 0x5a7   : > { %2371 = vperm.xlu1 %4252, %v5365_v41  }
 0x5ab   : > { %2387 = vperm.xlu1 %4252, %v5377_v45  }
 0x5d7   : > { %v1833_v40 = vpop.permute.xlu0 %1832  ;;  %v2121_v44 = vpop.permute.xlu1 %2120 }
 0x5d8   : > { %4073 = vpush %v1833_v40 }
 0x5db   : > { %v1854_v46 = vpop.permute.xlu0 %1853  ;;  %v2142_v38 = vpop.permute.xlu1 %2141 }
 0x5dc   : > { %4075 = vpush %v1854_v46 }
 0x5dd   : > { %4077 = vpush %v2121_v44 }
 0x5de   : > { %4079 = vpush %v2142_v38 }
 0x5df   : > { %v2409_v41 = vpop.permute.xlu0 %2408  ;;  %v2430_v43 = vpop.permute.xlu1 %2429 }
 0x5e0   : > { %4081 = vpush %v2409_v41 }
 0x5e1   : > { %4083 = vpush %v2430_v43 }
 0x5f0   : > { %v1792_v45 = vpop.permute.xlu1 %1791  ;;  %v1788_v55 = vpop.permute.xlu0 %1787 }
 0x5f1   : > { %v1825_v26 = vadd.f32 %v3308_v52, %v1792_v45  ;;  %v1824_v31 = vadd.f32 %v3308_v52, %v1788_v55 }
 0x5f4   : > { %v1804_v61 = vpop.permute.xlu0 %1803 }
 0x5f5   : > { %v2076_v51 = vpop.permute.xlu1 %2075  ;;  %v1828_v13 = vadd.f32 %v3308_v52, %v1804_v61 }
 0x5f6   : > { %v2112_v34 = vadd.f32 %v5550_v33, %v2076_v51 }
 0x5f8   : > { %v1816_v21 = vpop.permute.xlu0 %1815 }
 0x5f9   : > { %v5553_v20 = vadd.f32 %v3308_v52, %v1816_v21 }
 0x5fa   : > { %v1796_v56 = vpop.permute.xlu1 %1795 }
 0x5fb   : > { %v1826_v53 = vadd.f32 %v3308_v52, %v1796_v56 }
 0x5fd   : > { %v2080_v12 = vpop.permute.xlu0 %2079 }
 0x5fe   : > { %v1800_v1 = vpop.permute.xlu1 %1799  ;;  %v2113_v17 = vadd.f32 %v5550_v33, %v2080_v12 }
 0x5ff   : > { %v1827_v11 = vadd.f32 %v3308_v52, %v1800_v1 }
 0x601   : > { %v2084_v30 = vpop.permute.xlu0 %2083 }
 0x602   : > { %v5564_v37 = vadd.f32 %v5550_v33, %v2084_v30 }
 0x603   : > { %v2088_v32 = vpop.permute.xlu1 %2087 }
 0x604   : > { %v5561_v36 = vadd.f32 %v5550_v33, %v2088_v32 }
 0x605   : > { %v2096_v35 = vpop.permute.xlu0 %2095 }
 0x606   : > { %v5572_v38 = vadd.f32 %v5550_v33, %v2096_v35 }
 0x608   : > { %v1808_v27 = vpop.permute.xlu1 %1807 }
 0x609   : > { %s4074_s25 = spop %4073  ;;  %v5568_v44 = vadd.f32 %v3308_v52, %v1808_v27 }
 0x60a   : > { %v1835_v24 = vstv %s4074_s25  ;;  %v2364_v19 = vpop.permute.xlu0 %2363 }
 0x60b   : > { %v1838_v14 = vmul.f32 %v5400_v60, %v1835_v24  ;;  %v1837_v2 = vmul.f32 %v5383_v50, %v1835_v24  ;;  %v1839_v42 = vmul.f32 %v5405_v0, %v1835_v24  ;;  %v1840_v40 = vmul.f32 %v5398_v59, %v1835_v24 }
 0x60c   : > { %v1812_v39 = vpop.permute.xlu1 %1811  ;;  %v1843_v46 = vmul.f32 %v5420_v9, %v1835_v24  ;;  %v1841_v41 = vmul.f32 %v5411_v4, %v1835_v24  ;;  %v5578_v55 = vadd.f32 %v5556_v57, %v2364_v19  ;;  %v5581_v51 = vmul.f32 %v5418_v8, %v1835_v24 }
 0x60d   : > { %s4076_s11 = spop %4075  ;;  %v1830_v43 = vadd.f32 %v3308_v52, %v1812_v39  ;;  %v1846_v56 = vadd.f32 %v1838_v14, %v1825_v26  ;;  %v1845_v1 = vadd.f32 %v1837_v2, %v1824_v31  ;;  %v1847_v32 = vadd.f32 %v1839_v42, %v1826_v53 }
 0x60e   : > { %v5575_v45 = vstv %s4076_s11  ;;  %s4078_s6 = spop %4077  ;;  %6125 = vst [vmem:[#allocation34_spill] sm:$0xff] %v5578_v55  ;;  %v2384_v61 = vpop.permute.xlu0 %2383  ;;  %v1848_v35 = vadd.f32 %v1840_v40, %v1827_v11  ;;  %v5590_v52 = vmul.f32 %v5422_v10, %v1835_v24  ;;  %v5596_v26 = vadd.f32 %v1841_v41, %v1828_v13 }
 0x60f   : > { %v5583_v21 = vstv %s4078_s6  ;;  %s4080_s9 = spop %4079  ;;  %v1859_v12 = vmul.f32 %v5409_v3, %v5575_v45  ;;  %v1858_v39 = vmul.f32 %v5389_v54, %v5575_v45  ;;  %v5598_v14 = vadd.f32 %v1843_v46, %v1830_v43 }
 0x610   : > { %v5587_v30 = vstv %s4080_s9  ;;  %v2125_v29 = vmul.f32 %v5383_v50, %v5583_v21  ;;  %v2126_v53 = vmul.f32 %v5400_v60, %v5583_v21  ;;  %v2129_v11 = vmul.f32 %v5411_v4, %v5583_v21 }
 0x611   : > { %v2092_v27 = vpop.permute.xlu1 %2091  ;;  %v1867_v19 = vadd.f32 %v1859_v12, %v1846_v56  ;;  %s4082_s8 = spop %4081  ;;  %v2146_v31 = vmul.f32 %v5389_v54, %v5587_v30  ;;  %v2147_v24 = vmul.f32 %v5409_v3, %v5587_v30  ;;  %v5609_v2 = vadd.f32 %v5556_v57, %v2384_v61 }
 0x612   : > { %v2376_v13 = vpop.permute.xlu0 %2375  ;;  %v1866_v40 = vadd.f32 %v1858_v39, %v1845_v1  ;;  %v2116_v46 = vadd.f32 %v5550_v33, %v2092_v27  ;;  %v2131_v41 = vmul.f32 %v5420_v9, %v5583_v21  ;;  %v2133_v43 = vadd.f32 %v2125_v29, %v2112_v34  ;;  %s4084_s7 = spop %4083 }
 0x613   : > { %6126 = vst [vmem:[#allocation35_spill] sm:$0xff] %v5609_v2  ;;  %v1875_v42 = vadd.f32 %v5453_v58, %v1867_v19  ;;  %v2134_v56 = vadd.f32 %v2126_v53, %v2113_v17  ;;  %v5616_v3 = vstv %s4082_s8  ;;  %v1860_v61 = vmul.f32 %v5416_v7, %v5575_v45 }
 0x614   : > { %v1874_v15 = vadd.f32 %v5428_v16, %v1866_v40  ;;  %v2132_v19 = vmul.f32 %v5422_v10, %v5583_v21  ;;  %v2154_v1 = vadd.f32 %v2146_v31, %v2133_v43  ;;  %v1861_v27 = vmul.f32 %v5403_v63, %v5575_v45 }
 0x615   : > { %v2100_v12 = vpop.permute.xlu1 %2099  ;;  %v1883_v28 = vmul.f32 0.2, %v1875_v42  ;;  %v2155_v39 = vadd.f32 %v2147_v24, %v2134_v56  ;;  %v5625_v29 = vadd.f32 %v5556_v57, %v2376_v13  ;;  %v1868_v53 = vadd.f32 %v1860_v61, %v1847_v32 }
 0x616   : > { %v1882_v17 = vmul.f32 0.2, %v1874_v15  ;;  %v5631_v40 = vmul.f32 %v5422_v10, %v5616_v3  ;;  %v2162_v2 = vadd.f32 %v5428_v16, %v2154_v1  ;;  %v1869_v31 = vadd.f32 %v1861_v27, %v1848_v35 }
 0x617   : > { %v5627_v34 = vmax.f32 %v1875_v42, %v1883_v28  ;;  %v2163_v55 = vadd.f32 %v5453_v58, %v2155_v39  ;;  %v2137_v24 = vadd.f32 %v2129_v11, %v2116_v46  ;;  %v2118_v43 = vadd.f32 %v5550_v33, %v2100_v12  ;;  %v2392_v28 = vpop.permute.xlu0 %2391 }
 0x618   : > { %v5637_v13 = vmax.f32 %v1874_v15, %v1882_v17  ;;  %v1876_v32 = vadd.f32 %v5467_v23, %v1868_v53  ;;  %v2170_v10 = vmul.f32 0.2, %v2162_v2  ;;  %v1877_v1 = vadd.f32 %v5448_v48, %v1869_v31 }
 0x619   : > { %v2104_v56 = vpop.permute.xlu1 %2103  ;;  %1900 = vmax.xlane.f32.xlu0 %v5627_v34  ;;  %v2171_v61 = vmul.f32 0.2, %v2163_v55  ;;  %v2414_v35 = vmul.f32 %v5400_v60, %v5616_v3  ;;  %v2127_v11 = vmul.f32 %v5405_v0, %v5583_v21  ;;  %v2148_v15 = vmul.f32 %v5416_v7, %v5587_v30 }
 0x61a   : > { %6127 = vst [vmem:[#allocation36_spill] sm:$0xff] %v5637_v13  ;;  %v2119_v42 = vadd.f32 %v5550_v33, %v2104_v56  ;;  %1898 = vmax.xlane.f32.xlu1 %v5637_v13  ;;  %v2128_v46 = vmul.f32 %v5398_v59, %v5583_v21  ;;  %v5652_v33 = vadd.f32 %v5556_v57, %v2392_v28  ;;  %v1884_v39 = vmul.f32 0.2, %v1876_v32 }
 0x61b   : > { %v5654_v12 = vmax.f32 %v2162_v2, %v2170_v10  ;;  %v1885_v27 = vmul.f32 0.2, %v1877_v1  ;;  %v5656_v17 = vmax.f32 %v2163_v55, %v2171_v61  ;;  %v2135_v60 = vadd.f32 %v2127_v11, %v5564_v37 }
 0x61c   : > { %v2136_v53 = vadd.f32 %v2128_v46, %v5561_v36  ;;  %v2149_v31 = vmul.f32 %v5403_v63, %v5587_v30  ;;  %v5662_v56 = vadd.f32 %v2131_v41, %v2118_v43  ;;  %v5664_v13 = vadd.f32 %v2132_v19, %v2119_v42 }
 0x61d   : > { %2186 = vmax.xlane.f32.xlu0 %v5654_v12  ;;  %v2417_v2 = vmul.f32 %v5411_v4, %v5616_v3  ;;  %v1862_v55 = vmul.f32 %v5436_v22, %v5575_v45  ;;  %v2156_v37 = vadd.f32 %v2148_v15, %v2135_v60  ;;  %v1850_v10 = vadd.f32 %v5581_v51, %v5568_v44 }
 0x61e   : > { %v2368_v28 = vpop.permute.xlu1 %2367  ;;  %2188 = vmax.xlane.f32.xlu1 %v5656_v17  ;;  %v2157_v36 = vadd.f32 %v2149_v31, %v2136_v53  ;;  %v1863_v41 = vmul.f32 %v5446_v47, %v5575_v45  ;;  %v5676_v19 = vmax.f32 %v1876_v32, %v1884_v39  ;;  %v5678_v43 = vmax.f32 %v1877_v1, %v1885_v27 }
 0x61f   : > { %v1870_v42 = vadd.f32 %v1862_v55, %v5596_v26  ;;  %v1864_v4 = vmul.f32 %v5458_v5, %v5575_v45  ;;  %v2164_v61 = vadd.f32 %v5467_v23, %v2156_v37  ;;  %v1852_v44 = vadd.f32 %v5590_v52, %v5553_v20 }
 0x620   : > { %v2165_v11 = vadd.f32 %v5448_v48, %v2157_v36  ;;  %v1871_v15 = vadd.f32 %v1863_v41, %v1850_v10  ;;  %v1865_v26 = vmul.f32 %v5480_v25, %v5575_v45  ;;  %v2150_v46 = vmul.f32 %v5436_v22, %v5587_v30 }
 0x621   : > { %1902 = vmax.xlane.f32.xlu0 %v5676_v19  ;;  %v1878_v32 = vadd.f32 %v5472_v49, %v1870_v42  ;;  %v1872_v1 = vadd.f32 %v1864_v4, %v5598_v14  ;;  %v2401_v39 = vadd.f32 %v5556_v57, %v2368_v28  ;;  %v2172_v27 = vmul.f32 0.2, %v2164_v61 }
 0x622   : > { %v2380_v51 = vpop.permute.xlu1 %2379  ;;  %1904 = vmax.xlane.f32.xlu1 %v5678_v43  ;;  %v2173_v60 = vmul.f32 0.2, %v2165_v11  ;;  %v1879_v20 = vadd.f32 %v5485_v18, %v1871_v15  ;;  %v1873_v14 = vadd.f32 %v1865_v26, %v1852_v44  ;;  %v2158_v31 = vadd.f32 %v2150_v46, %v2137_v24 }
 0x623   : > { %v2404_v52 = vadd.f32 %v5556_v57, %v2380_v51  ;;  %v1880_v53 = vadd.f32 %v5488_v6, %v1872_v1  ;;  %v5699_v55 = vmax.f32 %v2164_v61, %v2172_v27  ;;  %v1886_v37 = vmul.f32 0.2, %v1878_v32 }
 0x624   : > { %v5701_v45 = vmax.f32 %v2165_v11, %v2173_v60  ;;  %v1887_v36 = vmul.f32 0.2, %v1879_v20  ;;  %v2415_v28 = vmul.f32 %v5405_v0, %v5616_v3  ;;  %v2419_v41 = vmul.f32 %v5420_v9, %v5616_v3 }
 0x625   : > { %v1888_v42 = vmul.f32 0.2, %v1880_v53  ;;  %v1881_v4 = vadd.f32 %v5497_v62, %v1873_v14  ;;  %v5708_v15 = vstv %s4084_s7  ;;  %2190 = vmax.xlane.f32.xlu0 %v5699_v55  ;;  %v2166_v61 = vadd.f32 %v5472_v49, %v2158_v31  ;;  %v6128_v14 = vld [vmem:[#allocation34_spill] sm:$0xff] }
 0x626   : > { %v2372_v10 = vpop.permute.xlu1 %2371  ;;  %2192 = vmax.xlane.f32.xlu1 %v5701_v45  ;;  %v2130_v0 = vmul.f32 %v5418_v8, %v5583_v21  ;;  %v2422_v11 = vadd.f32 %v2414_v35, %v2401_v39  ;;  %v2425_v44 = vadd.f32 %v2417_v2, %v2404_v52  ;;  %v2151_v9 = vmul.f32 %v5446_v47, %v5587_v30 }
 0x627   : > { %v2402_v24 = vadd.f32 %v5556_v57, %v2372_v10  ;;  %v1889_v51 = vmul.f32 0.2, %v1881_v4  ;;  %v5718_v1 = vmax.f32 %v1878_v32, %v1886_v37  ;;  %v5720_v26 = vmax.f32 %v1879_v20, %v1887_v36 }
 0x628   : > { %v2138_v46 = vadd.f32 %v2130_v0, %v5572_v38  ;;  %v2152_v27 = vmul.f32 %v5458_v5, %v5587_v30  ;;  %v5725_v60 = vmax.f32 %v1880_v53, %v1888_v42  ;;  %v2153_v21 = vmul.f32 %v5480_v25, %v5587_v30  ;;  %v2256_v42 = vld [vmem:[#allocation3 + $0x88] sm:$0xff] }
 0x629   : > { %v2413_v35 = vmul.f32 %v5383_v50, %v5616_v3  ;;  %v2434_v2 = vmul.f32 %v5389_v54, %v5708_v15  ;;  %v2423_v32 = vadd.f32 %v2415_v28, %v2402_v24  ;;  %1906 = vmax.xlane.f32.xlu0 %v5718_v1  ;;  %v2174_v39 = vmul.f32 0.2, %v2166_v61  ;;  %v6129_v50 = vld [vmem:[#allocation33_spill] sm:$0xff]  ;;  %3775 = vmatprep.subr.bf16.mxu1 %v2256_v42 }
 0x62a   : > { %1908 = vmax.xlane.f32.xlu1 %v5720_v26  ;;  %v2388_v38 = vpop.permute.xlu1 %2387  ;;  %v2159_v20 = vadd.f32 %v2151_v9, %v2138_v46  ;;  %v2160_v52 = vadd.f32 %v2152_v27, %v5662_v56  ;;  %v5736_v53 = vmax.f32 %v1881_v4, %v1889_v51  ;;  %v2161_v30 = vadd.f32 %v2153_v21, %v5664_v13  ;;  %v1969_v56 = vld [vmem:[#allocation3 + $0x50] sm:$0xff]  ;;  %v6130_v46 = vld [vmem:[#allocation35_spill] sm:$0xff] }
 0x62b   : > { %v2421_v31 = vadd.f32 %v2413_v35, %v6128_v14  ;;  %v2435_v37 = vmul.f32 %v6129_v50, %v5708_v15  ;;  %v2438_v28 = vmul.f32 %v5436_v22, %v5708_v15  ;;  %v2418_v10 = vmul.f32 %v5418_v8, %v5616_v3  ;;  %3753 = vmatprep.subr.bf16.mxu0 %v1969_v56  ;;  %v2258_v50 = vld [vmem:[#allocation3 + $0x98] sm:$0xff] }
 0x62c   : > { %v2167_v54 = vadd.f32 %v5485_v18, %v2159_v20  ;;  %v2168_v36 = vadd.f32 %v5488_v6, %v2160_v52  ;;  %v2406_v4 = vadd.f32 %v5556_v57, %v2388_v38  ;;  %v2169_v13 = vadd.f32 %v5497_v62, %v2161_v30  ;;  %3754 = vmatpush3.bf16.msra.mxu0 %v1969_v56  ;;  %v2257_v20 = vld [vmem:[#allocation3 + $0x90] sm:$0xff]  ;;  %v2259_v56 = vld [vmem:[#allocation3 + $0xa0] sm:$0xff] }
 0x62d   : > { %v2442_v24 = vadd.f32 %v2434_v2, %v2421_v31  ;;  %v2443_v0 = vadd.f32 %v2435_v37, %v2422_v11  ;;  %1910 = vmax.xlane.f32.xlu0 %v5725_v60  ;;  %v2446_v9 = vadd.f32 %v2438_v28, %v2425_v44  ;;  %v2426_v22 = vadd.f32 %v2418_v10, %v6130_v46  ;;  %v1970_v44 = vld [vmem:[#allocation3 + $0x58] sm:$0xff]  ;;  %v1972_v10 = vld [vmem:[#allocation3 + $0x68] sm:$0xff] }
 0x62e   : > { %1912 = vmax.xlane.f32.xlu1 %v5736_v53  ;;  %v2175_v51 = vmul.f32 0.2, %v2167_v54  ;;  %v2439_v8 = vmul.f32 %v5446_v47, %v5708_v15  ;;  %v5755_v27 = vmax.f32 %v2166_v61, %v2174_v39  ;;  %v2176_v35 = vmul.f32 0.2, %v2168_v36  ;;  %3776 = vmatpush3.bf16.msra.mxu1 %v2256_v42 }
 0x62f   : > { %v2450_v57 = vadd.f32 %v5428_v16, %v2442_v24  ;;  %v2451_v21 = vadd.f32 %v5453_v58, %v2443_v0  ;;  %v2177_v2 = vmul.f32 0.2, %v2169_v13  ;;  %v2428_v52 = vadd.f32 %v5631_v40, %v5652_v33  ;;  %3755 = vmatprep.subr.bf16.mxu0 %v1970_v44  ;;  %3777 = vmatprep.subr.bf16.mxu1 %v2257_v20  ;;  %v2260_v24 = vld [vmem:[#allocation3 + $0xa8] sm:$0xff] }
 0x630   : > { %v5759_v11 = vmax.f32 %v2167_v54, %v2175_v51  ;;  %v2447_v38 = vadd.f32 %v2439_v8, %v2426_v22  ;;  %v2427_v47 = vadd.f32 %v2419_v41, %v2406_v4  ;;  %v2454_v16 = vadd.f32 %v5472_v49, %v2446_v9  ;;  %3756 = vmatpush3.bf16.msra.mxu0 %v1970_v44 }
 0x631   : > { %2194 = vmax.xlane.f32.xlu0 %v5755_v27  ;;  %v2436_v58 = vmul.f32 %v5416_v7, %v5708_v15  ;;  %v2416_v61 = vmul.f32 %v5398_v59, %v5616_v3  ;;  %v2458_v39 = vmul.f32 0.2, %v2450_v57  ;;  %v2459_v30 = vmul.f32 0.2, %v2451_v21  ;;  %v1971_v7 = vld [vmem:[#allocation3 + $0x60] sm:$0xff] }
 0x632   : > { %2196 = vmax.xlane.f32.xlu1 %v5759_v11  ;;  %v2455_v14 = vadd.f32 %v5485_v18, %v2447_v38  ;;  %v2437_v40 = vmul.f32 %v5403_v63, %v5708_v15  ;;  %v5773_v33 = vmax.f32 %v2168_v36, %v2176_v35  ;;  %v5775_v41 = vmax.f32 %v2169_v13, %v2177_v2  ;;  %v1973_v13 = vld [vmem:[#allocation3 + $0x70] sm:$0xff] }
 0x633   : > { %v2444_v31 = vadd.f32 %v2436_v58, %v2423_v32  ;;  %v2424_v49 = vadd.f32 %v2416_v61, %v5625_v29  ;;  %3778 = vmatpush3.bf16.msra.mxu1 %v2257_v20  ;;  %v2441_v59 = vmul.f32 %v5480_v25, %v5708_v15  ;;  %3757 = vmatprep.subr.bf16.mxu0 %v1971_v7  ;;  %v2462_v29 = vmul.f32 0.2, %v2454_v16  ;;  %v6131_v20 = vld [vmem:[#allocation36_spill] sm:$0xff] }
 0x634   : > { %3779 = vmatprep.subr.bf16.mxu1 %v2258_v50  ;;  %v2440_v3 = vmul.f32 %v5458_v5, %v5708_v15  ;;  %v5784_v18 = vmax.f32 %v2450_v57, %v2458_v39  ;;  %v5786_v32 = vmax.f32 %v2451_v21, %v2459_v30  ;;  %v2463_v37 = vmul.f32 0.2, %v2455_v14  ;;  %3758 = vmatpush3.bf16.msra.mxu0 %v1971_v7  ;;  %v2262_v57 = vld [vmem:[#allocation3 + $0xb8] sm:$0xff]  ;;  %v5810_v21 = vld [vmem:[#allocation3 + $0xc0] sm:$0xff] }
 0x635   : > { %2198 = vmax.xlane.f32.xlu0 %v5773_v33  ;;  %v2445_v63 = vadd.f32 %v2437_v40, %v2424_v49  ;;  %v2452_v54 = vadd.f32 %v5467_v23, %v2444_v31  ;;  %v2449_v28 = vadd.f32 %v2441_v59, %v2428_v52  ;;  %v5792_v5 = vmax.f32 %v2454_v16, %v2462_v29 }
 0x636   : > { %2200 = vmax.xlane.f32.xlu1 %v5775_v41  ;;  %v2448_v36 = vadd.f32 %v2440_v3, %v2427_v47  ;;  %v5794_v15 = vmax.f32 %v2455_v14, %v2463_v37  ;;  %3759 = vmatprep.subr.bf16.mxu0 %v1972_v10 }
 0x637   : > { %v2453_v25 = vadd.f32 %v5448_v48, %v2445_v63  ;;  %3780 = vmatpush3.bf16.msra.mxu1 %v2258_v50  ;;  %v2460_v42 = vmul.f32 0.2, %v2452_v54  ;;  %v2457_v48 = vadd.f32 %v5497_v62, %v2449_v28  ;;  %v2261_v62 = vld [vmem:[#allocation3 + $0xb0] sm:$0xff] }
 0x638   : > { %3781 = vmatprep.subr.bf16.mxu1 %v2259_v56  ;;  %v2456_v23 = vadd.f32 %v5488_v6, %v2448_v36  ;;  %3760 = vmatpush3.bf16.msra.mxu0 %v1972_v10  ;;  %v1974_v6 = vld [vmem:[#allocation3 + $0x78] sm:$0xff] }
 0x639   : > { %2474 = vmax.xlane.f32.xlu0 %v5784_v18  ;;  %v2461_v4 = vmul.f32 0.2, %v2453_v25  ;;  %3761 = vmatprep.subr.bf16.mxu0 %v1973_v13  ;;  %v5800_v0 = vmax.f32 %v2452_v54, %v2460_v42  ;;  %v2465_v46 = vmul.f32 0.2, %v2457_v48 }
 0x63a   : > { %2476 = vmax.xlane.f32.xlu1 %v5786_v32  ;;  %v2464_v9 = vmul.f32 0.2, %v2456_v23 }
 0x63b   : > { %3782 = vmatpush3.bf16.msra.mxu1 %v2259_v56  ;;  %v5802_v51 = vmax.f32 %v2453_v25, %v2461_v4  ;;  %v5808_v8 = vmax.f32 %v2457_v48, %v2465_v46 }
 0x63c   : > { %3783 = vmatprep.subr.bf16.mxu1 %v2260_v24  ;;  %3762 = vmatpush3.bf16.msra.mxu0 %v1973_v13  ;;  %v5806_v22 = vmax.f32 %v2456_v23, %v2464_v9 }
 0x63d   : > { %2482 = vmax.xlane.f32.xlu0 %v5792_v5  ;;  %3763 = vmatprep.subr.bf16.mxu0 %v1974_v6 }
 0x63e   : > { %2484 = vmax.xlane.f32.xlu1 %v5794_v15 }
 0x63f   : > { %3784 = vmatpush3.bf16.msra.mxu1 %v2260_v24 }
 0x640   : > { %3785 = vmatprep.subr.bf16.mxu1 %v2261_v62  ;;  %3764 = vmatpush3.bf16.msra.mxu0 %v1974_v6 }
 0x641   : > { %2478 = vmax.xlane.f32.xlu0 %v5800_v0  ;;  %3797 = vmatprep.subr.bf16.mxu0 %v5810_v21 }
 0x642   : > { %2480 = vmax.xlane.f32.xlu1 %v5802_v51 }
 0x643   : > { %3786 = vmatpush3.bf16.msra.mxu1 %v2261_v62 }
 0x644   : > { %3787 = vmatprep.subr.bf16.mxu1 %v2262_v57 }
 0x645   : > { %2486 = vmax.xlane.f32.xlu0 %v5806_v22 }
 0x646   : > { %2488 = vmax.xlane.f32.xlu1 %v5808_v8 }
 0x647   : > { %3788 = vmatpush3.bf16.msra.mxu1 %v2262_v57 }
 0x648   : > { %4053 = vmatprep.subr.bf16.mxu1 %v5810_v21 }
 0x6a6   : > { %v1901_v35 = vpop.xlane.xlu0 %1900 }
 0x6a7   : > { %v1915_v2 = vsub.f32 %v5627_v34, %v1901_v35  ;;  %v1899_v38 = vpop.xlane.xlu1 %1898 }
 0x6a8   : > { %v1914_v52 = vsub.f32 %v6131_v20, %v1899_v38 }
 0x6a9   : > { %v1924_v44 = vmul.f32 1.442695, %v1915_v2  ;;  %v2544_v2 = vld [vmem:[#allocation3 + $0xc8] sm:$0xff] }
 0x6aa   : > { %v1922_v47 = vmul.f32 1.442695, %v1914_v52  ;;  %v2187_v16 = vpop.xlane.xlu0 %2186 }
 0x6ab   : > { %4253 = vpow2.f32 %v1924_v44  ;;  %v2202_v58 = vsub.f32 %v5654_v12, %v2187_v16  ;;  %v2189_v61 = vpop.xlane.xlu1 %2188 }
 0x6ac   : > { %4255 = vpow2.f32 %v1922_v47  ;;  %v2203_v39 = vsub.f32 %v5656_v17, %v2189_v61 }
 0x6ad   : > { %v2210_v30 = vmul.f32 1.442695, %v2202_v58 }
 0x6ae   : > { %v2212_v14 = vmul.f32 1.442695, %v2203_v39  ;;  %v1903_v40 = vpop.xlane.xlu0 %1902  ;;  %v2545_v39 = vld [vmem:[#allocation3 + $0xd0] sm:$0xff] }
 0x6af   : > { %4257 = vpow2.f32 %v2210_v30  ;;  %v1916_v31 = vsub.f32 %v5676_v19, %v1903_v40  ;;  %v1905_v34 = vpop.xlane.xlu1 %1904 }
 0x6b0   : > { %4259 = vpow2.f32 %v2212_v14  ;;  %v1917_v49 = vsub.f32 %v5678_v43, %v1905_v34 }
 0x6b1   : > { %v1926_v7 = vmul.f32 1.442695, %v1916_v31 }
 0x6b2   : > { %v1928_v50 = vmul.f32 1.442695, %v1917_v49  ;;  %v2191_v59 = vpop.xlane.xlu0 %2190 }
 0x6b3   : > { %4261 = vpow2.f32 %v1926_v7  ;;  %v2193_v63 = vpop.xlane.xlu1 %2192  ;;  %v2204_v3 = vsub.f32 %v5699_v55, %v2191_v59 }
 0x6b4   : > { %4263 = vpow2.f32 %v1928_v50  ;;  %v2205_v17 = vsub.f32 %v5701_v45, %v2193_v63  ;;  %v2546_v50 = vld [vmem:[#allocation3 + $0xd8] sm:$0xff] }
 0x6b5   : > { %v4254_v12 = vpop.eup %4253  ;;  %v2214_v37 = vmul.f32 1.442695, %v2204_v3 }
 0x6b6   : > { %1940 = vadd.xlane.f32.xlu1 %v4254_v12  ;;  %v4256_v29 = vpop.eup %4255  ;;  %v2216_v54 = vmul.f32 1.442695, %v2205_v17  ;;  %v1907_v19 = vpop.xlane.xlu0 %1906 }
 0x6b7   : > { %1938 = vadd.xlane.f32.xlu0 %v4256_v29  ;;  %v1909_v25 = vpop.xlane.xlu1 %1908  ;;  %v1962_v36 = vpack.c.bf16 %v4254_v12, %v4256_v29  ;;  %4265 = vpow2.f32 %v2214_v37  ;;  %v1918_v43 = vsub.f32 %v5718_v1, %v1907_v19  ;;  %v2547_v37 = vld [vmem:[#allocation3 + $0xe0] sm:$0xff] }
 0x6b8   : > { %v1919_v28 = vsub.f32 %v5720_v26, %v1909_v25  ;;  %4267 = vpow2.f32 %v2216_v54 }
 0x6b9   : > { %v5826_v10 = vpop.eup %4257  ;;  %3765 = vmatprep.mubr.bf16.mxu0 %v1962_v36  ;;  %v1930_v45 = vmul.f32 1.442695, %v1918_v43 }
 0x6ba   : > { %v5828_v55 = vpop.eup %4259  ;;  %v1932_v56 = vmul.f32 1.442695, %v1919_v28  ;;  %v1911_v42 = vpop.xlane.xlu0 %1910 }
 0x6bb   : > { %v1913_v4 = vpop.xlane.xlu1 %1912  ;;  %v2250_v23 = vpack.c.bf16 %v5828_v55, %v5826_v10  ;;  %4269 = vpow2.f32 %v1930_v45  ;;  %v1920_v48 = vsub.f32 %v5725_v60, %v1911_v42 }
 0x6bc   : > { %v1921_v1 = vsub.f32 %v5736_v53, %v1913_v4  ;;  %4271 = vpow2.f32 %v1932_v56  ;;  %v2548_v56 = vld [vmem:[#allocation3 + $0xe8] sm:$0xff] }
 0x6bd   : > { %v4262_v13 = vpop.eup %4261  ;;  %3789 = vmatprep.mubr.bf16.mxu1 %v2250_v23  ;;  %v1934_v24 = vmul.f32 1.442695, %v1920_v48 }
 0x6be   : > { %v4264_v26 = vpop.eup %4263  ;;  %v1936_v9 = vmul.f32 1.442695, %v1921_v1  ;;  %1942 = vadd.xlane.f32.xlu0 %v4262_v13  ;;  %v2195_v46 = vpop.xlane.xlu0 %2194 }
 0x6bf   : > { %1944 = vadd.xlane.f32.xlu1 %v4264_v26  ;;  %v2197_v6 = vpop.xlane.xlu1 %2196  ;;  %v1963_v62 = vpack.c.bf16 %v4264_v26, %v4262_v13  ;;  %4273 = vpow2.f32 %v1934_v24  ;;  %v2206_v57 = vsub.f32 %v5755_v27, %v2195_v46  ;;  %v2549_v13 = vld [vmem:[#allocation3 + $0xf0] sm:$0xff]  ;;  %v2550_v24 = vld [vmem:[#allocation3 + $0xf8] sm:$0xff] }
 0x6c0   : > { %v2207_v35 = vsub.f32 %v5759_v11, %v2197_v6  ;;  %4275 = vpow2.f32 %v1936_v9 }
 0x6c1   : > { %3766 = vmatmul.mubr.bf16.vlgmr.msra.gmra.mrb[0].mxu0 %v1963_v62  ;;  %v5836_v60 = vpop.eup %4265  ;;  %v2218_v53 = vmul.f32 1.442695, %v2206_v57 }
 0x6c2   : > { %v2220_v38 = vmul.f32 1.442695, %v2207_v35  ;;  %3798 = vmatpush3.bf16.msra.mxu0 %v5810_v21  ;;  %v5839_v44 = vpop.eup %4267  ;;  %v2199_v20 = vpop.xlane.xlu0 %2198 }
 0x6c3   : > { %v2201_v52 = vpop.xlane.xlu1 %2200  ;;  %3799 = vmatprep.subr.bf16.mxu0 %v2544_v2  ;;  %4277 = vpow2.f32 %v2218_v53  ;;  %v2208_v47 = vsub.f32 %v5773_v33, %v2199_v20  ;;  %v2251_v11 = vpack.c.bf16 %v5839_v44, %v5836_v60 }
 0x6c4   : > { %v2209_v27 = vsub.f32 %v5775_v41, %v2201_v52  ;;  %4279 = vpow2.f32 %v2220_v38 }
 0x6c5   : > { %v4270_v16 = vpop.eup %4269  ;;  %v2222_v58 = vmul.f32 1.442695, %v2208_v47  ;;  %3790 = vmatmul.mubr.bf16.vlgmr.msra.gmra.mrb[0].mxu1 %v2251_v11 }
 0x6c6   : > { %v2224_v61 = vmul.f32 1.442695, %v2209_v27  ;;  %3800 = vmatpush3.bf16.msra.mxu0 %v2544_v2  ;;  %v4272_v30 = vpop.eup %4271  ;;  %4061 = vmatpush3.bf16.msra.mxu1 %v5810_v21  ;;  %v2475_v14 = vpop.xlane.xlu0 %2474 }
 0x6c7   : > { %1946 = vadd.xlane.f32.xlu0 %v4270_v16  ;;  %v2477_v40 = vpop.xlane.xlu1 %2476  ;;  %4281 = vpow2.f32 %v2222_v58  ;;  %v2490_v33 = vsub.f32 %v5784_v18, %v2475_v14  ;;  %1948 = vadd.xlane.f32.xlu1 %v4272_v30  ;;  %v1964_v31 = vpack.c.bf16 %v4272_v30, %v4270_v16 }
 0x6c8   : > { %v2491_v41 = vsub.f32 %v5786_v32, %v2477_v40  ;;  %4054 = vmatprep.subr.bf16.mxu1 %v2544_v2  ;;  %4283 = vpow2.f32 %v2224_v61  ;;  %3801 = vmatprep.subr.bf16.mxu0 %v2545_v39 }
 0x6c9   : > { %v4274_v34 = vpop.eup %4273  ;;  %v2498_v49 = vmul.f32 1.442695, %v2490_v33  ;;  %3769 = vmatprep.mubr.bf16.mxu0 %v1964_v31  ;;  %v2050_v31 = vld [vmem:[#allocation5 + $0x10] sm:$0xff] }
 0x6ca   : > { %v2500_v7 = vmul.f32 1.442695, %v2491_v41  ;;  %3802 = vmatpush3.bf16.msra.mxu0 %v2545_v39  ;;  %v4276_v21 = vpop.eup %4275  ;;  %4062 = vmatpush3.bf16.msra.mxu1 %v2544_v2  ;;  %v2483_v59 = vpop.xlane.xlu0 %2482 }
 0x6cb   : > { %1950 = vadd.xlane.f32.xlu0 %v4274_v34  ;;  %v2485_v63 = vpop.xlane.xlu1 %2484  ;;  %4285 = vpow2.f32 %v2498_v49  ;;  %v2494_v18 = vsub.f32 %v5792_v5, %v2483_v59  ;;  %1952 = vadd.xlane.f32.xlu1 %v4276_v21  ;;  %v1965_v12 = vpack.c.bf16 %v4276_v21, %v4274_v34 }
 0x6cc   : > { %v2495_v32 = vsub.f32 %v5794_v15, %v2485_v63  ;;  %4055 = vmatprep.subr.bf16.mxu1 %v2545_v39  ;;  %4287 = vpow2.f32 %v2500_v7  ;;  %3803 = vmatprep.subr.bf16.mxu0 %v2546_v50 }
 0x6cd   : > { %v4278_v3 = vpop.eup %4277  ;;  %v2506_v17 = vmul.f32 1.442695, %v2494_v18  ;;  %3770 = vmatmul.mubr.bf16.gmra.mrb[4].mxu0 %v1965_v12 }
 0x6ce   : > { %v2508_v29 = vmul.f32 1.442695, %v2495_v32  ;;  %v4280_v54 = vpop.eup %4279  ;;  %4063 = vmatpush3.bf16.msra.mxu1 %v2545_v39  ;;  %3804 = vmatpush3.bf16.msra.mxu0 %v2546_v50  ;;  %v2479_v19 = vpop.xlane.xlu0 %2478  ;;  %v2051_v32 = vld [vmem:[#allocation5 + $0x18] sm:$0xff] }
 0x6cf   : > { %v2481_v25 = vpop.xlane.xlu1 %2480  ;;  %4289 = vpow2.f32 %v2506_v17  ;;  %v2492_v5 = vsub.f32 %v5800_v0, %v2479_v19  ;;  %2226 = vadd.xlane.f32.xlu0 %v5826_v10  ;;  %2228 = vadd.xlane.f32.xlu1 %v5828_v55  ;;  %v2252_v36 = vpack.c.bf16 %v4280_v54, %v4278_v3 }
 0x6d0   : > { %v2493_v15 = vsub.f32 %v5802_v51, %v2481_v25  ;;  %4291 = vpow2.f32 %v2508_v29  ;;  %4056 = vmatprep.subr.bf16.mxu1 %v2546_v50  ;;  %3805 = vmatprep.subr.bf16.mxu0 %v2547_v37 }
 0x6d1   : > { %v4282_v43 = vpop.eup %4281  ;;  %v2502_v28 = vmul.f32 1.442695, %v2492_v5  ;;  %3793 = vmatprep.mubr.bf16.mxu1 %v2252_v36 }
 0x6d2   : > { %v2504_v45 = vmul.f32 1.442695, %v2493_v15  ;;  %v4284_v42 = vpop.eup %4283  ;;  %4064 = vmatpush3.bf16.msra.mxu1 %v2546_v50  ;;  %3806 = vmatpush3.bf16.msra.mxu0 %v2547_v37  ;;  %v2487_v4 = vpop.xlane.xlu0 %2486  ;;  %v2048_v50 = vld [vmem:[#allocation5] sm:$0xff] }
 0x6d3   : > { %v2489_v0 = vpop.xlane.xlu1 %2488  ;;  %4293 = vpow2.f32 %v2502_v28  ;;  %v2496_v10 = vsub.f32 %v5806_v22, %v2487_v4  ;;  %2230 = vadd.xlane.f32.xlu0 %v5836_v60  ;;  %2232 = vadd.xlane.f32.xlu1 %v5839_v44  ;;  %v2253_v55 = vpack.c.bf16 %v4284_v42, %v4282_v43 }
 0x6d4   : > { %v2497_v51 = vsub.f32 %v5808_v8, %v2489_v0  ;;  %4295 = vpow2.f32 %v2504_v45  ;;  %4057 = vmatprep.subr.bf16.mxu1 %v2547_v37  ;;  %3807 = vmatprep.subr.bf16.mxu0 %v2548_v56 }
 0x6d5   : > { %v4286_v23 = vpop.eup %4285  ;;  %v2510_v48 = vmul.f32 1.442695, %v2496_v10  ;;  %3794 = vmatmul.mubr.bf16.gmra.mrb[4].mxu1 %v2253_v55 }
 0x6d6   : > { %v2512_v1 = vmul.f32 1.442695, %v2497_v51  ;;  %v4288_v26 = vpop.eup %4287  ;;  %4065 = vmatpush3.bf16.msra.mxu1 %v2547_v37  ;;  %3808 = vmatpush3.bf16.msra.mxu0 %v2548_v56  ;;  %v2049_v37 = vld [vmem:[#allocation5 + $0x8] sm:$0xff] }
 0x6d7   : > { %4297 = vpow2.f32 %v2510_v48  ;;  %2234 = vadd.xlane.f32.xlu0 %v4278_v3  ;;  %2236 = vadd.xlane.f32.xlu1 %v4280_v54  ;;  %v2538_v22 = vpack.c.bf16 %v4288_v26, %v4286_v23 }
 0x6d8   : > { %4299 = vpow2.f32 %v2512_v1  ;;  %4058 = vmatprep.subr.bf16.mxu1 %v2548_v56  ;;  %3809 = vmatprep.subr.bf16.mxu0 %v2549_v13 }
 0x6d9   : > { %v4290_v8 = vpop.eup %4289  ;;  %3813 = vmatprep.mubr.bf16.mxu0 %v2538_v22 }
 0x6da   : > { %v4292_v9 = vpop.eup %4291  ;;  %4066 = vmatpush3.bf16.msra.mxu1 %v2548_v56  ;;  %3810 = vmatpush3.bf16.msra.mxu0 %v2549_v13 }
 0x6db   : > { %2238 = vadd.xlane.f32.xlu0 %v4282_v43  ;;  %2240 = vadd.xlane.f32.xlu1 %v4284_v42  ;;  %v2540_v46 = vpack.c.bf16 %v4292_v9, %v4290_v8 }
 0x6dc   : > { %4059 = vmatprep.subr.bf16.mxu1 %v2549_v13  ;;  %3811 = vmatprep.subr.bf16.mxu0 %v2550_v24 }
 0x6dd   : > { %v4294_v6 = vpop.eup %4293  ;;  %3817 = vmatprep.mubr.bf16.mxu1 %v2540_v46 }
 0x6de   : > { %v4296_v62 = vpop.eup %4295  ;;  %4067 = vmatpush3.bf16.msra.mxu1 %v2549_v13  ;;  %3812 = vmatpush3.bf16.msra.mxu0 %v2550_v24 }
 0x6df   : > { %2514 = vadd.xlane.f32.xlu0 %v4286_v23  ;;  %2516 = vadd.xlane.f32.xlu1 %v4288_v26  ;;  %v2539_v57 = vpack.c.bf16 %v4296_v62, %v4294_v6 }
 0x6e0   : > { %4060 = vmatprep.subr.bf16.mxu1 %v2550_v24 }
 0x6e1   : > { %v4298_v35 = vpop.eup %4297  ;;  %3814 = vmatmul.mubr.bf16.vlgmr.msra.gmra.mrb[8].mxu0 %v2539_v57 }
 0x6e2   : > { %v4300_v2 = vpop.eup %4299  ;;  %4068 = vmatpush3.bf16.msra.mxu1 %v2550_v24  ;;  %v2054_v24 = vld [vmem:[#allocation5 + $0x30] sm:$0xff] }
 0x6e3   : > { %2518 = vadd.xlane.f32.xlu0 %v4294_v6  ;;  %2520 = vadd.xlane.f32.xlu1 %v4296_v62  ;;  %v2541_v60 = vpack.c.bf16 %v4300_v2, %v4298_v35 }
 0x6e5   : > { %3818 = vmatmul.mubr.bf16.vlgmr.msra.gmra.mrb[8].mxu1 %v2541_v60  ;;  %v2052_v60 = vld [vmem:[#allocation5 + $0x20] sm:$0xff] }
 0x6e7   : > { %2522 = vadd.xlane.f32.xlu0 %v4290_v8  ;;  %2524 = vadd.xlane.f32.xlu1 %v4292_v9 }
 0x6eb   : > { %2526 = vadd.xlane.f32.xlu0 %v4298_v35  ;;  %2528 = vadd.xlane.f32.xlu1 %v4300_v2 }
 0x743   : > { %v1941_v38 = vpop.xlane.xlu1 %1940 }
 0x744   : > { %v1939_v53 = vpop.xlane.xlu0 %1938 }
 0x74b   : > { %v1943_v44 = vpop.xlane.xlu0 %1942 }
 0x74c   : > { %v1945_v20 = vpop.xlane.xlu1 %1944  ;;  %4301 = vrcp.f32 %v1943_v44 }
 0x74d   : > { %4303 = vrcp.f32 %v1939_v53 }
 0x74e   : > { %4305 = vrcp.f32 %v1945_v20 }
 0x74f   : > { %4307 = vrcp.f32 %v1941_v38 }
 0x754   : > { %v1947_v52 = vpop.xlane.xlu0 %1946  ;;  %v1949_v47 = vpop.xlane.xlu1 %1948 }
 0x756   : > { %v4302_v40 = vpop.eup %4301 }
 0x757   : > { %v4304_v34 = vpop.eup %4303 }
 0x758   : > { %v1951_v27 = vpop.xlane.xlu0 %1950  ;;  %v1953_v11 = vpop.xlane.xlu1 %1952 }
 0x759   : > { %4309 = vrcp.f32 %v1951_v27  ;;  %v4306_v21 = vpop.eup %4305 }
 0x75a   : > { %v4308_v12 = vpop.eup %4307 }
 0x75c   : > { %v2227_v16 = vpop.xlane.xlu0 %2226  ;;  %v2229_v58 = vpop.xlane.xlu1 %2228 }
 0x760   : > { %v2231_v61 = vpop.xlane.xlu0 %2230  ;;  %v2233_v39 = vpop.xlane.xlu1 %2232 }
 0x761   : > { %4311 = vrcp.f32 %v2231_v61 }
 0x762   : > { %4313 = vrcp.f32 %v2227_v16 }
 0x763   : > { %4315 = vrcp.f32 %v2233_v39  ;;  %v4310_v42 = vpop.eup %4309  ;;  %v2053_v39 = vld [vmem:[#allocation5 + $0x28] sm:$0xff] }
 0x764   : > { %v2235_v30 = vpop.xlane.xlu0 %2234  ;;  %v5858_v14 = vpop.xlane.xlu1 %2236  ;;  %4317 = vrcp.f32 %v2229_v58 }
 0x765   : > { %4319 = vrcp.f32 %v1947_v52 }
 0x766   : > { %4321 = vrcp.f32 %v1953_v11 }
 0x767   : > { %4323 = vrcp.f32 %v1949_v47  ;;  %v2055_v47 = vld [vmem:[#allocation5 + $0x38] sm:$0xff] }
 0x768   : > { %v2239_v33 = vpop.xlane.xlu0 %2238  ;;  %v2241_v59 = vpop.xlane.xlu1 %2240 }
 0x769   : > { %4325 = vrcp.f32 %v2239_v33 }
 0x76a   : > { %4327 = vrcp.f32 %v2235_v30 }
 0x76b   : > { %v4312_v4 = vpop.eup %4311  ;;  %4329 = vrcp.f32 %v2241_v59 }
 0x76c   : > { %v5861_v15 = vpop.xlane.xlu0 %2514  ;;  %v5865_v45 = vpop.xlane.xlu1 %2516  ;;  %4331 = vrcp.f32 %v5858_v14 }
 0x76d   : > { %v4314_v0 = vpop.eup %4313 }
 0x76e   : > { %v4316_v51 = vpop.eup %4315 }
 0x76f   : > { %v4318_v1 = vpop.eup %4317 }
 0x770   : > { %v2519_v55 = vpop.xlane.xlu0 %2518  ;;  %v4320_v9 = vpop.eup %4319 }
 0x771   : > { %v2521_v46 = vpop.xlane.xlu1 %2520  ;;  %v4322_v53 = vpop.eup %4321  ;;  %4333 = vrcp.f32 %v2519_v55 }
 0x772   : > { %v4324_v27 = vpop.eup %4323  ;;  %4335 = vrcp.f32 %v5861_v15 }
 0x773   : > { %4337 = vrcp.f32 %v2521_v46 }
 0x774   : > { %v2523_v33 = vpop.xlane.xlu0 %2522  ;;  %4339 = vrcp.f32 %v5865_v45 }
 0x778   : > { %v2527_v59 = vpop.xlane.xlu0 %2526 }
 0x779   : > { %4341 = vrcp.f32 %v2527_v59 }
 0x77a   : > { %4343 = vrcp.f32 %v2523_v33 }
 0x794   : > { %v3767_v41 = vpop.f32.mrb[0].mxu0 }
 0x795   : > { %v2042_v49 = vmul.f32 %v4302_v40, %v3767_v41  ;;  %v2009_v7 = vpop.f32.mrb[1].mxu0 }
 0x796   : > { %v2040_v63 = vmul.f32 %v4304_v34, %v2009_v7  ;;  %v3768_v18 = vpop.f32.mrb[2].mxu0  ;;  %v4326_v7 = vpop.eup %4325 }
 0x797   : > { %v2058_v3 = vadd.f32 %v2050_v31, %v2042_v49  ;;  %v2043_v17 = vmul.f32 %v4306_v21, %v3768_v18  ;;  %v2012_v29 = vpop.f32.mrb[3].mxu0  ;;  %v2525_v31 = vpop.xlane.xlu1 %2524 }
 0x798   : > { %v2056_v54 = vadd.f32 %v2048_v50, %v2040_v63  ;;  %v2041_v19 = vmul.f32 %v4308_v12, %v2012_v29  ;;  %v3791_v5 = vpop.f32.mrb[0].mxu1  ;;  %v4328_v21 = vpop.eup %4327 }
 0x799   : > { %2066 = vst.msk [vmem:[#allocation5 + $0x10] sm:$0xff] %vm1350_vm4, %v2058_v3  ;;  %v2059_v25 = vadd.f32 %v2051_v32, %v2043_v17  ;;  %v2297_v43 = vpop.f32.mrb[1].mxu1  ;;  %v2330_v10 = vmul.f32 %v4312_v4, %v3791_v5  ;;  %v4330_v32 = vpop.eup %4329 }
 0x79a   : > { %2064 = vst.msk [vmem:[#allocation5] sm:$0xff] %vm1350_vm4, %v2056_v54  ;;  %v2057_v36 = vadd.f32 %v2049_v37, %v2041_v19  ;;  %v3792_v28 = vpop.f32.mrb[2].mxu1  ;;  %v2328_v48 = vmul.f32 %v4314_v0, %v2297_v43  ;;  %v4332_v17 = vpop.eup %4331 }
 0x79b   : > { %2067 = vst.msk [vmem:[#allocation5 + $0x18] sm:$0xff] %vm1350_vm4, %v2059_v25  ;;  %v2300_v56 = vpop.f32.mrb[3].mxu1  ;;  %v2331_v22 = vmul.f32 %v4316_v51, %v3792_v28  ;;  %v2529_v29 = vpop.xlane.xlu1 %2528 }
 0x79c   : > { %2065 = vst.msk [vmem:[#allocation5 + $0x8] sm:$0xff] %vm1350_vm4, %v2057_v36  ;;  %v2329_v57 = vmul.f32 %v4318_v1, %v2300_v56  ;;  %4345 = vrcp.f32 %v2529_v29  ;;  %v4334_v45 = vpop.eup %4333 }
 0x79d   : > { %4347 = vrcp.f32 %v2525_v31 }
 0x7a0   : > { %v2338_v23 = vld [vmem:[#allocation5 + $0x10] sm:$0xff]  ;;  %v3771_v8 = vpop.f32.mrb[4].mxu0 }
 0x7a1   : > { %v2346_v13 = vadd.f32 %v2338_v23, %v2330_v10  ;;  %v2336_v26 = vld [vmem:[#allocation5] sm:$0xff]  ;;  %v2046_v35 = vmul.f32 %v4310_v42, %v3771_v8  ;;  %v2025_v2 = vpop.f32.mrb[5].mxu0  ;;  %v4336_v42 = vpop.eup %4335 }
 0x7a2   : > { %v2344_v6 = vadd.f32 %v2336_v26, %v2328_v48  ;;  %v2339_v62 = vld [vmem:[#allocation5 + $0x18] sm:$0xff]  ;;  %v2044_v20 = vmul.f32 %v4320_v9, %v2025_v2  ;;  %v3772_v52 = vpop.f32.mrb[6].mxu0  ;;  %v4338_v10 = vpop.eup %4337 }
 0x7a3   : > { %2354 = vst.msk [vmem:[#allocation5 + $0x10] sm:$0xff] %vm1350_vm4, %v2346_v13  ;;  %v2347_v38 = vadd.f32 %v2339_v62, %v2331_v22  ;;  %v2337_v44 = vld [vmem:[#allocation5 + $0x8] sm:$0xff]  ;;  %v2062_v16 = vadd.f32 %v2054_v24, %v2046_v35  ;;  %v2047_v58 = vmul.f32 %v4322_v53, %v3772_v52  ;;  %v2028_v61 = vpop.f32.mrb[7].mxu0  ;;  %v4340_v48 = vpop.eup %4339 }
 0x7a4   : > { %2352 = vst.msk [vmem:[#allocation5] sm:$0xff] %vm1350_vm4, %v2344_v6  ;;  %v2345_v11 = vadd.f32 %v2337_v44, %v2329_v57  ;;  %v2060_v30 = vadd.f32 %v2052_v60, %v2044_v20  ;;  %v2045_v40 = vmul.f32 %v4324_v27, %v2028_v61  ;;  %v4342_v8 = vpop.eup %4341 }
 0x7a5   : > { %2355 = vst.msk [vmem:[#allocation5 + $0x18] sm:$0xff] %vm1350_vm4, %v2347_v38  ;;  %2070 = vst.msk [vmem:[#allocation5 + $0x30] sm:$0xff] %vm1350_vm4, %v2062_v16  ;;  %v2063_v41 = vadd.f32 %v2055_v47, %v2047_v58  ;;  %v4344_v62 = vpop.eup %4343 }
 0x7a6   : > { %2353 = vst.msk [vmem:[#allocation5 + $0x8] sm:$0xff] %vm1350_vm4, %v2345_v11  ;;  %2068 = vst.msk [vmem:[#allocation5 + $0x20] sm:$0xff] %vm1350_vm4, %v2060_v30  ;;  %v2061_v14 = vadd.f32 %v2053_v39, %v2045_v40  ;;  %v4346_v53 = vpop.eup %4345 }
 0x7a7   : > { %2071 = vst.msk [vmem:[#allocation5 + $0x38] sm:$0xff] %vm1350_vm4, %v2063_v41  ;;  %v4348_v47 = vpop.eup %4347 }
 0x7a8   : > { %2069 = vst.msk [vmem:[#allocation5 + $0x28] sm:$0xff] %vm1350_vm4, %v2061_v14  ;;  %v3795_v34 = vpop.f32.mrb[4].mxu1 }
 0x7a9   : > { %v2313_v49 = vpop.f32.mrb[5].mxu1  ;;  %v2334_v63 = vmul.f32 %v4326_v7, %v3795_v34 }
 0x7aa   : > { %v3796_v50 = vpop.f32.mrb[6].mxu1  ;;  %v2332_v3 = vmul.f32 %v4328_v21, %v2313_v49  ;;  %v2626_v51 = vld [vmem:[#allocation5 + $0x10] sm:$0xff] }
 0x7ab   : > { %v2316_v18 = vpop.f32.mrb[7].mxu1  ;;  %v2335_v19 = vmul.f32 %v4330_v32, %v3796_v50  ;;  %v2624_v13 = vld [vmem:[#allocation5] sm:$0xff] }
 0x7ac   : > { %v2342_v12 = vld [vmem:[#allocation5 + $0x30] sm:$0xff]  ;;  %v2333_v36 = vmul.f32 %v4332_v17, %v2316_v18  ;;  %v2627_v9 = vld [vmem:[#allocation5 + $0x18] sm:$0xff] }
 0x7ad   : > { %v2350_v37 = vadd.f32 %v2342_v12, %v2334_v63  ;;  %v2340_v54 = vld [vmem:[#allocation5 + $0x20] sm:$0xff]  ;;  %v2625_v35 = vld [vmem:[#allocation5 + $0x8] sm:$0xff] }
 0x7ae   : > { %v2348_v25 = vadd.f32 %v2340_v54, %v2332_v3  ;;  %v2343_v5 = vld [vmem:[#allocation5 + $0x38] sm:$0xff] }
 0x7af   : > { %2358 = vst.msk [vmem:[#allocation5 + $0x30] sm:$0xff] %vm1350_vm4, %v2350_v37  ;;  %v2351_v15 = vadd.f32 %v2343_v5, %v2335_v19  ;;  %v2341_v43 = vld [vmem:[#allocation5 + $0x28] sm:$0xff] }
 0x7b0   : > { %2356 = vst.msk [vmem:[#allocation5 + $0x20] sm:$0xff] %vm1350_vm4, %v2348_v25  ;;  %v2349_v28 = vadd.f32 %v2341_v43, %v2333_v36 }
 0x7b1   : > { %2359 = vst.msk [vmem:[#allocation5 + $0x38] sm:$0xff] %vm1350_vm4, %v2351_v15 }
 0x7b2   : > { %2357 = vst.msk [vmem:[#allocation5 + $0x28] sm:$0xff] %vm1350_vm4, %v2349_v28 }
 0x7b4   : > { %v3815_v56 = vpop.f32.mrb[8].mxu0 }
 0x7b5   : > { %v2618_v4 = vmul.f32 %v4334_v45, %v3815_v56  ;;  %v2585_v0 = vpop.f32.mrb[9].mxu0 }
 0x7b6   : > { %v2616_v55 = vmul.f32 %v4336_v42, %v2585_v0  ;;  %v3816_v23 = vpop.f32.mrb[10].mxu0  ;;  %v2630_v44 = vld [vmem:[#allocation5 + $0x30] sm:$0xff] }
 0x7b7   : > { %v2634_v1 = vadd.f32 %v2626_v51, %v2618_v4  ;;  %v2619_v26 = vmul.f32 %v4338_v10, %v3816_v23  ;;  %v2588_v22 = vpop.f32.mrb[11].mxu0  ;;  %v2628_v11 = vld [vmem:[#allocation5 + $0x20] sm:$0xff] }
 0x7b8   : > { %v2632_v24 = vadd.f32 %v2624_v13, %v2616_v55  ;;  %v2617_v46 = vmul.f32 %v4340_v48, %v2588_v22  ;;  %v3819_v6 = vpop.f32.mrb[8].mxu1  ;;  %v2631_v39 = vld [vmem:[#allocation5 + $0x38] sm:$0xff] }
 0x7b9   : > { %2642 = vst.msk [vmem:[#allocation5 + $0x10] sm:$0xff] %vm1350_vm4, %v2634_v1  ;;  %v2635_v57 = vadd.f32 %v2627_v9, %v2619_v26  ;;  %v2622_v2 = vmul.f32 %v4342_v8, %v3819_v6  ;;  %v2601_v60 = vpop.f32.mrb[9].mxu1  ;;  %v2629_v33 = vld [vmem:[#allocation5 + $0x28] sm:$0xff] }
 0x7ba   : > { %2640 = vst.msk [vmem:[#allocation5] sm:$0xff] %vm1350_vm4, %v2632_v24  ;;  %v2633_v38 = vadd.f32 %v2625_v35, %v2617_v46  ;;  %v2620_v20 = vmul.f32 %v4344_v62, %v2601_v60  ;;  %v3820_v52 = vpop.f32.mrb[10].mxu1 }
 0x7bb   : > { %2643 = vst.msk [vmem:[#allocation5 + $0x18] sm:$0xff] %vm1350_vm4, %v2635_v57  ;;  %v2638_v27 = vadd.f32 %v2630_v44, %v2622_v2  ;;  %v2623_v16 = vmul.f32 %v4346_v53, %v3820_v52  ;;  %v2604_v58 = vpop.f32.mrb[11].mxu1 }
 0x7bc   : > { %2641 = vst.msk [vmem:[#allocation5 + $0x8] sm:$0xff] %vm1350_vm4, %v2633_v38  ;;  %v2636_v61 = vadd.f32 %v2628_v11, %v2620_v20  ;;  %v2621_v30 = vmul.f32 %v4348_v47, %v2604_v58 }
 0x7bd   : > { %2646 = vst.msk [vmem:[#allocation5 + $0x30] sm:$0xff] %vm1350_vm4, %v2638_v27  ;;  %v2639_v40 = vadd.f32 %v2631_v39, %v2623_v16 }
 0x7be   : > { %2644 = vst.msk [vmem:[#allocation5 + $0x20] sm:$0xff] %vm1350_vm4, %v2636_v61  ;;  %v2637_v41 = vadd.f32 %v2629_v33, %v2621_v30 }
 0x7bf   : > { %2647 = vst.msk [vmem:[#allocation5 + $0x38] sm:$0xff] %vm1350_vm4, %v2639_v40 }
 0x7c0   : > { %2645 = vst.msk [vmem:[#allocation5 + $0x28] sm:$0xff] %vm1350_vm4, %v2637_v41 }
 0x7c1 PF: > { %v2648_v14 = vld [vmem:[#allocation5] sm:$0xff]  ;;  %v2650_v34 = vld [vmem:[#allocation5 + $0x10] sm:$0xff]  ;;  %s2656_s12 = scalar_lea.vmem [#allocation12], %s4579_s29  ;;  %p3312_p13 = scmp.ne.s32.totalorder %s4579_s29, 2 }
 0x7c2   : > { %v3311_v49 = vld [vmem:[%s2656_s12] ss:$0 sm:$0xff]  ;;  %v6132_v56 = vld [vmem:[#allocation25_spill] sm:$0xff]  ;;  %v6133_v4 = vld [vmem:[#allocation26_spill] sm:$0xff]  ;;  %s6140_s22 = sld [smem:[#allocation42_spill]] (!%p3312_p13)  ;;  %s6141_s8 = sld [smem:[#allocation44_spill]] (!%p3312_p13) }
 0x7c3   : > { %v2649_v31 = vld [vmem:[#allocation5 + $0x8] sm:$0xff]  ;;  %v2651_v7 = vld [vmem:[#allocation5 + $0x18] sm:$0xff]  ;;  %v2664_v21 = vadd.f32 %v3311_v49, %v2648_v14  ;;  %v2666_v63 = vadd.f32 %v3311_v49, %v2650_v34  ;;  %s6142_s25 = sld [smem:[#allocation43_spill]] (!%p3312_p13)  ;;  %vm2863_vm5 = vcmask (!%p3312_p13), 261120   ;;  %s6143_s9 = sld [smem:[#allocation45_spill]] (!%p3312_p13) }
 0x7c4   : > { %v2665_v59 = vadd.f32 %v3311_v49, %v2649_v31  ;;  %v2667_v18 = vadd.f32 %v3311_v49, %v2651_v7  ;;  %v2654_v12 = vld [vmem:[#allocation5 + $0x30] sm:$0xff]  ;;  %v6134_v10 = vld [vmem:[#allocation27_spill] sm:$0xff]  ;;  %v6135_v55 = vld [vmem:[#allocation28_spill] sm:$0xff] }
 0x7c5   : > { %v2652_v50 = vld [vmem:[#allocation5 + $0x20] sm:$0xff]  ;;  %v2670_v37 = vadd.f32 %v3311_v49, %v2654_v12  ;;  %v2672_v19 = vmax.f32 %v2664_v21, 0.0  ;;  %v2674_v5 = vmax.f32 %v2666_v63, 0.0  ;;  %v6136_v48 = vld [vmem:[#allocation29_spill] sm:$0xff]  ;;  %v6137_v13 = vld [vmem:[#allocation30_spill] sm:$0xff] }
 0x7c6   : > { %v2655_v3 = vld [vmem:[#allocation5 + $0x38] sm:$0xff]  ;;  %v2668_v17 = vadd.f32 %v3311_v49, %v2652_v50  ;;  %v2673_v25 = vmax.f32 %v2665_v59, 0.0  ;;  %v2675_v36 = vmax.f32 %v2667_v18, 0.0  ;;  %v6139_v24 = vld [vmem:[#allocation32_spill] sm:$0xff] }
 0x7c7   : > { %v2653_v32 = vld [vmem:[#allocation5 + $0x28] sm:$0xff]  ;;  %v2671_v54 = vadd.f32 %v3311_v49, %v2655_v3  ;;  %v2678_v28 = vmax.f32 %v2670_v37, 0.0  ;;  %v2680_v42 = vadd.f32 %v2672_v19, %v6132_v56  ;;  %v2682_v51 = vadd.f32 %v2674_v5, %v6134_v10  ;;  %v6138_v22 = vld [vmem:[#allocation31_spill] sm:$0xff] }
 0x7c8   : > { %v2669_v29 = vadd.f32 %v3311_v49, %v2653_v32  ;;  %v2676_v15 = vmax.f32 %v2668_v17, 0.0  ;;  %v2681_v0 = vadd.f32 %v2673_v25, %v6133_v4  ;;  %v2683_v23 = vadd.f32 %v2675_v36, %v6135_v55  ;;  %2699 = sbr.rel (%p3312_p13) target bundleno = 2468 (0x9a4), region = 104  ;;  %v2700_v46 = vld [vmem:[%s6140_s22] sm:$0xff] (!%p3312_p13)  ;;  %v2701_v6 = vld [vmem:[%s6140_s22 + $0x8] sm:$0xff] (!%p3312_p13)  ;;  %v2702_v62 = vld [vmem:[%s6140_s22 + $0x10] sm:$0xff] (!%p3312_p13) }
 0x7c9   : > { %v2679_v45 = vmax.f32 %v2671_v54, 0.0  ;;  %v2686_v8 = vadd.f32 %v2678_v28, %v6138_v22  ;;  %2688 = vst.msk [vmem:[%s5307_s13] sm:$0xff] %vm1350_vm4, %v2680_v42  ;;  %2690 = vst.msk [vmem:[%s5307_s13 + $0x10] sm:$0xff] %vm1350_vm4, %v2682_v51  ;;  %3837 = vmatprep.mubr.msk.f32.mxu0 (!%p3312_p13), %vm1350_vm4, %v2680_v42  ;;  %v4029_v57 = vpack.c.bf16 (!%p3312_p13), %v2701_v6, %v2700_v46  ;;  %v2703_v35 = vld [vmem:[%s6140_s22 + $0x18] sm:$0xff] (!%p3312_p13)  ;;  %v2704_v60 = vld [vmem:[%s6140_s22 + $0x20] sm:$0xff] (!%p3312_p13) }
 0x7ca   : > { %v2677_v43 = vmax.f32 %v2669_v29, 0.0  ;;  %v2684_v1 = vadd.f32 %v2676_v15, %v6136_v48  ;;  %2689 = vst.msk [vmem:[%s5307_s13 + $0x8] sm:$0xff] %vm1350_vm4, %v2681_v0  ;;  %2691 = vst.msk [vmem:[%s5307_s13 + $0x18] sm:$0xff] %vm1350_vm4, %v2683_v23  ;;  %v4033_v2 = vpack.c.bf16 (!%p3312_p13), %v2703_v35, %v2702_v62  ;;  %v2705_v53 = vld [vmem:[%s6140_s22 + $0x28] sm:$0xff] (!%p3312_p13)  ;;  %v2852_v38 = vld [vmem:[%s6141_s8] sm:$0xff] (!%p3312_p13) }
 0x7cb   : > { %v2687_v9 = vadd.f32 %v2679_v45, %v6139_v24  ;;  %2694 = vst.msk [vmem:[%s5307_s13 + $0x30] sm:$0xff] %vm1350_vm4, %v2686_v8  ;;  %4030 = vmatprep.subr.bf16.mxu0 (!%p3312_p13), %v4029_v57  ;;  %v2853_v44 = vld [vmem:[%s6141_s8 + $0x8] sm:$0xff] (!%p3312_p13)  ;;  %v4037_v52 = vpack.c.bf16 (!%p3312_p13), %v2705_v53, %v2704_v60  ;;  %v2706_v47 = vld [vmem:[%s6140_s22 + $0x30] sm:$0xff] (!%p3312_p13)  ;;  %v2707_v27 = vld [vmem:[%s6140_s22 + $0x38] sm:$0xff] (!%p3312_p13) }
 0x7cc   : > { %v2685_v26 = vadd.f32 %v2677_v43, %v6137_v13  ;;  %2692 = vst.msk [vmem:[%s5307_s13 + $0x20] sm:$0xff] %vm1350_vm4, %v2684_v1  ;;  %4032 = vmatpush3.bf16.msra.mxu0 (!%p3312_p13), %v4029_v57  ;;  %v4045_v20 = vpack.c.bf16 (!%p3312_p13), %v2853_v44, %v2852_v38  ;;  %v4041_v11 = vpack.c.bf16 (!%p3312_p13), %v2707_v27, %v2706_v47  ;;  %v2854_v16 = vld [vmem:[%s6141_s8 + $0x10] sm:$0xff] (!%p3312_p13)  ;;  %v2855_v58 = vld [vmem:[%s6141_s8 + $0x18] sm:$0xff] (!%p3312_p13)  ;;  %v3313_v39 = vld [vmem:[%s6142_s25] ss:$0 sm:$0xff] (!%p3312_p13) }
 0x7cd   : > { %2695 = vst.msk [vmem:[%s5307_s13 + $0x38] sm:$0xff] %vm1350_vm4, %v2687_v9  ;;  %4034 = vmatprep.subr.bf16.mxu0 (!%p3312_p13), %v4033_v2  ;;  %v4049_v61 = vpack.c.bf16 (!%p3312_p13), %v2855_v58, %v2854_v16  ;;  %v3322_v36 = vld [vmem:[%s6143_s9] ss:$0 sm:$0xff] (!%p3312_p13) }
 0x7ce   : > { %2693 = vst.msk [vmem:[%s5307_s13 + $0x28] sm:$0xff] %vm1350_vm4, %v2685_v26  ;;  %4046 = vmatprep.subr.bf16.mxu1 (!%p3312_p13), %v4045_v20 }
 0x7cf   : > { %4048 = vmatpush3.bf16.msra.mxu1 %v4045_v20 }
 0x7d0   : > { %4036 = vmatpush3.bf16.msra.mxu0 %v4033_v2  ;;  %4050 = vmatprep.subr.bf16.mxu1 %v4049_v61 }
 0x7d1   : > { %4038 = vmatprep.subr.bf16.mxu0 %v4037_v52 }
 0x7d3   : > { %4052 = vmatpush3.bf16.msra.mxu1 %v4049_v61 }
 0x7d4   : > { %4040 = vmatpush3.bf16.msra.mxu0 %v4037_v52 }
 0x7d5   : > { %4042 = vmatprep.subr.bf16.mxu0 %v4041_v11 }
 0x7d8   : > { %4044 = vmatpush3.bf16.msra.mxu0 %v4041_v11 }
 0x7db   : > { %3838 = vmatmul.mubr.msk.f32.vlgmr.msra.gmra.mrb[0].mxu0 %vm1350_vm4, %v2681_v0 }
 0x7dc   : > { %3840 = vmatprep.mubr.msk.f32.mxu0 %vm1350_vm4, %v2682_v51 }
 0x7df   : > { %3841 = vmatmul.mubr.msk.f32.gmra.mrb[2].mxu0 %vm1350_vm4, %v2683_v23 }
 0x7e0   : > { %3843 = vmatprep.mubr.msk.f32.mxu0 %vm1350_vm4, %v2684_v1 }
 0x7e3   : > { %3844 = vmatmul.mubr.msk.f32.gmra.mrb[4].mxu0 %vm1350_vm4, %v2685_v26 }
 0x7e4   : > { %3846 = vmatprep.mubr.msk.f32.mxu0 %vm1350_vm4, %v2686_v8 }
 0x7e7   : > { %3847 = vmatmul.mubr.msk.f32.gmra.mrb[6].mxu0 %vm1350_vm4, %v2687_v9 }
 0x8ae   : > { %v3839_v30 = vpop.f32.mrb[0].mxu0 }
 0x8af   : > { %v2811_v40 = vadd.f32 %v3839_v30, %v3313_v39  ;;  %v2805_v33 = vpop.f32.mrb[1].mxu0 }
 0x8b0   : > { %v2806_v41 = vadd.f32 %v3313_v39, %v2805_v33 }
 0x8b1   : > { %v2845_v34 = vmax.f32 %v2811_v40, 0.0 }
 0x8b2   : > { %v2844_v14 = vmax.f32 %v2806_v41, 0.0  ;;  %v3842_v31 = vpop.f32.mrb[2].mxu0 }
 0x8b3   : > { %v2821_v49 = vadd.f32 %v3842_v31, %v3313_v39  ;;  %v2815_v7 = vpop.f32.mrb[3].mxu0 }
 0x8b4   : > { %v2816_v50 = vadd.f32 %v3313_v39, %v2815_v7  ;;  %3857 = vmatprep.mubr.msk.f32.mxu1 %vm2863_vm5, %v2844_v14 }
 0x8b5   : > { %3858 = vmatmul.mubr.msk.f32.vlgmr.msra.gmra.mrb[0].mxu1 %vm2863_vm5, %v2845_v34  ;;  %v2847_v63 = vmax.f32 %v2821_v49, 0.0 }
 0x8b6   : > { %v2846_v21 = vmax.f32 %v2816_v50, 0.0  ;;  %v3845_v59 = vpop.f32.mrb[4].mxu0 }
 0x8b7   : > { %v2831_v18 = vadd.f32 %v3845_v59, %v3313_v39  ;;  %v2825_v32 = vpop.f32.mrb[5].mxu0 }
 0x8b8   : > { %v2826_v12 = vadd.f32 %v3313_v39, %v2825_v32  ;;  %3860 = vmatprep.mubr.msk.f32.mxu1 %vm2863_vm5, %v2846_v21 }
 0x8b9   : > { %3861 = vmatmul.mubr.msk.f32.gmra.mrb[2].mxu1 %vm2863_vm5, %v2847_v63  ;;  %v2849_v29 = vmax.f32 %v2831_v18, 0.0 }
 0x8ba   : > { %v2848_v3 = vmax.f32 %v2826_v12, 0.0  ;;  %v3848_v17 = vpop.f32.mrb[6].mxu0 }
 0x8bb   : > { %v2841_v37 = vadd.f32 %v3848_v17, %v3313_v39  ;;  %v2835_v54 = vpop.f32.mrb[7].mxu0 }
 0x8bc   : > { %v2836_v19 = vadd.f32 %v3313_v39, %v2835_v54  ;;  %3863 = vmatprep.mubr.msk.f32.mxu1 %vm2863_vm5, %v2848_v3 }
 0x8bd   : > { %3864 = vmatmul.mubr.msk.f32.gmra.mrb[4].mxu1 %vm2863_vm5, %v2849_v29  ;;  %v2851_v5 = vmax.f32 %v2841_v37, 0.0 }
 0x8be   : > { %v2850_v25 = vmax.f32 %v2836_v19, 0.0 }
 0x8c0   : > { %3866 = vmatprep.mubr.msk.f32.mxu1 %vm2863_vm5, %v2850_v25 }
 0x8c1   : > { %3867 = vmatmul.mubr.msk.f32.gmra.mrb[6].mxu1 %vm2863_vm5, %v2851_v5 }
 0x988   : > { %v3859_v15 = vpop.f32.mrb[0].mxu1 }
 0x989   : > { %v2960_v43 = vadd.f32 %v3859_v15, %v3322_v36  ;;  %v2954_v28 = vpop.f32.mrb[1].mxu1 }
 0x98a   : > { %v2955_v45 = vadd.f32 %v3322_v36, %v2954_v28 }
 0x98b   : > { %4349 = vtanh.f32 %v2960_v43 }
 0x98c   : > { %4351 = vtanh.f32 %v2955_v45  ;;  %v3862_v56 = vpop.f32.mrb[2].mxu1 }
 0x98d   : > { %v2970_v42 = vadd.f32 %v3862_v56, %v3322_v36  ;;  %v2964_v4 = vpop.f32.mrb[3].mxu1 }
 0x98e   : > { %v2965_v0 = vadd.f32 %v3322_v36, %v2964_v4 }
 0x98f   : > { %4353 = vtanh.f32 %v2970_v42 }
 0x990   : > { %4355 = vtanh.f32 %v2965_v0  ;;  %v3865_v10 = vpop.f32.mrb[4].mxu1 }
 0x991   : > { %v2980_v51 = vadd.f32 %v3865_v10, %v3322_v36  ;;  %v2974_v55 = vpop.f32.mrb[5].mxu1 }
 0x992   : > { %v2975_v23 = vadd.f32 %v3322_v36, %v2974_v55 }
 0x993   : > { %4357 = vtanh.f32 %v2980_v51 }
 0x994   : > { %4359 = vtanh.f32 %v2975_v23  ;;  %v3868_v48 = vpop.f32.mrb[6].mxu1 }
 0x995   : > { %v4350_v1 = vpop.eup %4349  ;;  %v2990_v13 = vadd.f32 %v3868_v48, %v3322_v36  ;;  %v2984_v26 = vpop.f32.mrb[7].mxu1 }
 0x996   : > { %v4352_v22 = vpop.eup %4351  ;;  %3002 = vst [vmem:[%s4966_s16 + $0x8] sm:$0xff] %v4350_v1  ;;  %v2985_v8 = vadd.f32 %v3322_v36, %v2984_v26 }
 0x997   : > { %3001 = vst [vmem:[%s4966_s16] sm:$0xff] %v4352_v22  ;;  %4361 = vtanh.f32 %v2990_v13 }
 0x998   : > { %4363 = vtanh.f32 %v2985_v8 }
 0x999   : > { %v4354_v24 = vpop.eup %4353 }
 0x99a   : > { %v4356_v9 = vpop.eup %4355  ;;  %3004 = vst [vmem:[%s4966_s16 + $0x18] sm:$0xff] %v4354_v24 }
 0x99b   : > { %3003 = vst [vmem:[%s4966_s16 + $0x10] sm:$0xff] %v4356_v9 }
 0x99d   : > { %v4358_v46 = vpop.eup %4357 }
 0x99e   : > { %v4360_v6 = vpop.eup %4359  ;;  %3006 = vst [vmem:[%s4966_s16 + $0x28] sm:$0xff] %v4358_v46 }
 0x99f   : > { %3005 = vst [vmem:[%s4966_s16 + $0x20] sm:$0xff] %v4360_v6 }
 0x9a1   : > { %v4362_v62 = vpop.eup %4361 }
 0x9a2   : > { %v4364_v57 = vpop.eup %4363  ;;  %3008 = vst [vmem:[%s4966_s16 + $0x38] sm:$0xff] %v4362_v62 }
 0x9a3   : > { %3007 = vst [vmem:[%s4966_s16 + $0x30] sm:$0xff] %v4364_v57 }
 0x9a4 PF: > { %s3339_s7 = sshll.u32 %s4575_s28, 10  ;;  %s6144_s20 = sld [smem:[#allocation46_spill]] }
 0x9a5   : > { %s3023_s5 = sshll.u32 %s4966_s16, 4  ;;  %s3010_s23 = scalar_lea.sflag [#allocation8], %s4931_s14  ;;  %s5990_s5 = int_to_ptr.vmem [resolvable:$true] %s3023_s5 }
 0x9a6   : > { %s4481_s19 = scalar_lea.vmem %s5990_s5, 1024  ;;  %s4615_s10 = smov [#allocation14]  }
 0x9a7   : > { %p4482_p5 = scmp.ne.s32.totalorder %s5990_s5, %s4481_s19  ;;  %s4485_s13 = sshll.u32 %s4615_s10, 4  ;;  %s4486_s13 = int_to_ptr.vmem [resolvable:$false] %s4485_s13 }
 0x9a8   : > { %s4487_s28 = scalar_lea.vmem %s4486_s13, 2048  ;;  %p4488_p3 = scmp.lt.s32.totalorder %s5990_s5, %s4486_s13 }
 0x9a9   : > { %p4483_p10 = pnand %p4482_p5, %p4827_p8  ;;  %p4489_p7 = scmp.lt.s32.totalorder %s4487_s28, %s4481_s19 }
 0x9aa   : > { %s5987_s18 = scalar_lea.hbm %s6144_s20, %s3339_s7 }
 0x9ab   : > { %p4484_p0 = pneg %p4483_p10  ;;  %p4490_p12 = por %p4489_p7, %p4488_p3 }
 0x9ad   : > { %p4491_p11 = pnand %p4490_p12, %p4484_p0 }
 0x9af   : > { %4494 = shalt.err (!%p4491_p11)
}
 0x9b0   : > { %s4495_s16 = scalar_lea.hbm %s5987_s18, 1024  ;;  %s4499_s25 = scalar_lea.hbm %s6144_s20, 2048 }
 0x9b1   : > { %p4496_p1 = scmp.ne.s32.totalorder %s5987_s18, %s4495_s16  ;;  %p4500_p4 = scmp.lt.u32.totalorder %s5987_s18, %s6144_s20 }
 0x9b2   : > { %p4501_p6 = scmp.lt.u32.totalorder %s4499_s25, %s4495_s16  ;;  %p4503_p5 = scmp.lt.u32.totalorder %s4495_s16, %s5987_s18 }
 0x9b3   : > { %p4497_p9 = pnand %p4496_p1, %p4827_p8 }
 0x9b4   : > { %p4502_p13 = por %p4501_p6, %p4500_p4 }
 0x9b5   : > { %p4498_p2 = pneg %p4497_p9 }
 0x9b6   : > { %p4504_p10 = por %p4503_p5, %p4502_p13 }
 0x9b8   : > { %p4505_p0 = pnand %p4504_p10, %p4498_p2 }
 0x9ba   : > { %4508 = shalt.err (!%p4505_p0)
}
 0x9bb   : > { %s4616_s9 = smov 128   ;;  %s4617_s7 = smov 8  }
 0x9bc   : > { %4097 = dma.vmem_to_hbm [thread:$0]  (%p4827_p8), %s5990_s5, 1024, %s5987_s18, %s3010_s23, %s4616_s9, %s4616_s9, %s4617_s7  }
 0x9bd PF: > { %s6145_s12 = sld [smem:[#allocation20_spill]]  ;;  %s6146_s2 = sld [smem:[#allocation22_spill]] }
 0x9be   : > { %p4122_p3 = scmp.ge.s32.totalorder %s4591_s15, 2 }
 0x9c3   : > { %s3038_s19 = sand.u32 1, %s6145_s12   ;;  %p6147_p7 = scmp.ne.s32.totalorder %s6146_s2, 0 }
 0x9c4   : > { %s3039_s10 = scalar_lea.sflag [#allocation8], %s3038_s19 }
 0x9c5   : > { %p4114_p12 = pnand %p4122_p3, %p6147_p7 }
 0x9c7   : > { %4558 = dma.done.wait (!%p4114_p12), %s3039_s10, 1024  }
 0x9c8   : > { %4560 = vsyncadd (!%p4114_p12), %s3039_s10, 4294966272  ;;  %s33_s15 = sadd.s32 1, %s4591_s15   ;;  %s6148_s29 = sld [smem:[#allocation21_spill]] }
 0x9c9   : > { %p30_p11 = scmp.ge.s32.totalorder %s33_s15, 8   ;;  %s6149_s17 = sld [smem:[#allocation23_spill]] }
 0x9ca   : > { %s6150_s14 = sld [smem:[#allocation24_spill]]  ;;  %s6151_s25 = smov %s4567_s26 }
 0x9cb   : > { %s6152_s26 = smov %s4571_s27  ;;  %s6153_s27 = smov %s4835_s21 }
 0x9cc   : > { %s6154_s28 = smov %s4583_s30  ;;  %32 = sbr.rel (!%p30_p11) target bundleno = 21 (0x15), region = 178 }
 0x9cf   : > { %s6155_s30 = smov %s6149_s17 }
 0x9d3   :  { %3044 = vsyncpa [#allocation7], 1 }
 0x9d4   :  { %3046 = vsyncpa [#allocation7 + $0x1], 1 }
 0x9d5   :  { %3047 = vsyncpa [#allocation10], 1 }
 0x9d6   :  { %3049 = vsyncpa [#allocation10 + $0x1], 1 }
 0x9d7   :  { %3050 = vsyncpa [#allocation13], 1 }
 0x9d8   :  { %3051 = vsyncpa [#allocation8], 1 }
 0x9d9   :  { %3053 = vsyncpa [#allocation8 + $0x1], 1 }

</bundles_post_ra>
